<compile_context>
chip_gen: v6e
topology: v6e:2x2x1
jax: 0.10.0
libtpu: 0.0.40
codegen_flags: <defaults>
</compile_context>

<pallas_src>
import jax
import jax.numpy as jnp
from jax.experimental import pallas as pl
from jax.experimental.pallas import tpu as pltpu


# --------------------------------------------------------------------------
# Kernel
# --------------------------------------------------------------------------
def lstm_kernel(x_ref,      # (B, T)    f32   raw scalar inputs (I == 1)
                wih0_ref,   # (1, 4Hp)  f32   layer-0 input weight row
                b0_ref,     # (1, 4Hp)  f32   layer-0 combined bias
                whh0_ref,   # (Hp, 4Hp) bf16  layer-0 recurrent weight
                wih1_ref,   # (Hp, 4Hp) bf16  layer-1 input weight
                whh1_ref,   # (Hp, 4Hp) bf16  layer-1 recurrent weight
                b1_ref,     # (1, 4Hp)  f32   layer-1 combined bias
                wfc_ref,    # (1, Hp)   f32   fc weight row
                bfc_ref,    # (1, 1)    f32   fc bias
                out_ref):   # (B, 1)    f32
    B, T = x_ref.shape
    Hp, G = whh0_ref.shape            # G == 4 * Hp, each gate a 128-lane block
    bf16 = jnp.bfloat16

    # Tiny rows: cheap to hoist (a couple of vregs each).
    wih0 = wih0_ref[...]
    b0 = b0_ref[...]
    b1 = b1_ref[...]

    def sig(v):
        # sigmoid(x) = 0.5*(1 + tanh(x/2))  -> a single EUP push per gate.
        return 0.5 * (jnp.tanh(0.5 * v) + 1.0)

    def cell(gates, c):
        # PyTorch gate order [i, f, g, o]; each gate is a whole 128-lane block.
        i_g = sig(gates[:, 0 * Hp:1 * Hp])
        f_g = sig(gates[:, 1 * Hp:2 * Hp])
        g_g = jnp.tanh(gates[:, 2 * Hp:3 * Hp])
        o_g = sig(gates[:, 3 * Hp:4 * Hp])
        c_new = f_g * c + i_g * g_g
        h_new = o_g * jnp.tanh(c_new)
        return h_new, c_new

    # State lives in vregs for the whole recurrence.
    h0 = jnp.zeros((B, Hp), jnp.float32)
    c0 = jnp.zeros((B, Hp), jnp.float32)
    h1 = jnp.zeros((B, Hp), jnp.float32)
    c1 = jnp.zeros((B, Hp), jnp.float32)

    # Recurrent half of layer-1 gates for step 0: h1 is zero, so it is just b1.
    g1_rec = b1

    # T is static -> full unroll (LLO scheduler overlaps layer-0 work of step
    # t+1 with layer-1 EUP work of step t, and the off-chain dots fill MXU).
    for t in range(T):
        # layer 0: input projection is a VPU broadcast multiply (I == 1),
        # only the recurrent dot is on the serial chain.
        xt = x_ref[:, t:t + 1]                                      # (B, 1)
        g0 = xt * wih0 + b0 + jnp.dot(h0.astype(bf16), whh0_ref[...],
                                      preferred_element_type=jnp.float32)
        h0, c0 = cell(g0, c0)

        # layer 1: only the h0_t-dependent half is on the critical path;
        # the h1_{t-1} half (g1_rec) was issued a full layer earlier.
        g1 = jnp.dot(h0.astype(bf16), wih1_ref[...],
                     preferred_element_type=jnp.float32) + g1_rec
        h1, c1 = cell(g1, c1)

        if t + 1 < T:
            # depends only on h1_t -> overlaps with next step's layer-0 work.
            g1_rec = jnp.dot(h1.astype(bf16), whh1_ref[...],
                             preferred_element_type=jnp.float32) + b1

    # fc on the last timestep's layer-2 hidden state.
    # O == 1 -> VPU multiply + lane reduction instead of an N=1 MXU dot.
    out_ref[...] = (jnp.sum(h1 * wfc_ref[...], axis=-1, keepdims=True)
                    + bfc_ref[...])


# --------------------------------------------------------------------------
# One-time weight layout prep (runs once, outside the per-call jit)
# --------------------------------------------------------------------------
def _pad_gate_cols(w, H, Hp):
    """(K, 4H) -> (K, 4Hp): gate k's H columns placed at [k*Hp, k*Hp+H)."""
    K = w.shape[0]
    out = jnp.zeros((K, 4 * Hp), w.dtype)
    for k in range(4):
        out = out.at[:, k * Hp:k * Hp + H].set(w[:, k * H:(k + 1) * H])
    return out


def _pad_rows(w, Kp):
    """Zero-pad the leading (contraction) axis to Kp rows."""
    return jnp.zeros((Kp,) + w.shape[1:], w.dtype).at[:w.shape[0]].set(w)


def prepare_params(params):
    """Pad gates to 128-lane blocks, stack biases, cast matmul weights to bf16.

    The zero padding is exact (bf16(0) == 0), which keeps the pad lanes of
    h/c at exactly 0 throughout the recurrence.
    """
    H = params["w_hh_l0"].shape[1]
    I = params["w_ih_l0"].shape[1]
    O = params["w_fc"].shape[0]
    assert I == 1, "kernel folds the input projection assuming input_size == 1"
    assert O == 1, "kernel uses a lane-reduce fc assuming output_size == 1"
    Hp = -(-H // 128) * 128

    f32, bf16 = jnp.float32, jnp.bfloat16

    wih0 = _pad_gate_cols(params["w_ih_l0"].T.astype(f32), H, Hp)        # (1, 4Hp)
    b0 = _pad_gate_cols((params["b_ih_l0"] + params["b_hh_l0"])
                        .reshape(1, 4 * H).astype(f32), H, Hp)           # (1, 4Hp)
    whh0 = _pad_rows(_pad_gate_cols(params["w_hh_l0"].T.astype(f32), H, Hp),
                     Hp).astype(bf16)                                    # (Hp, 4Hp)
    wih1 = _pad_rows(_pad_gate_cols(params["w_ih_l1"].T.astype(f32), H, Hp),
                     Hp).astype(bf16)                                    # (Hp, 4Hp)
    whh1 = _pad_rows(_pad_gate_cols(params["w_hh_l1"].T.astype(f32), H, Hp),
                     Hp).astype(bf16)                                    # (Hp, 4Hp)
    b1 = _pad_gate_cols((params["b_ih_l1"] + params["b_hh_l1"])
                        .reshape(1, 4 * H).astype(f32), H, Hp)           # (1, 4Hp)
    wfc = jnp.zeros((1, Hp), f32).at[:, :H].set(
        params["w_fc"].reshape(1, H).astype(f32))                        # (1, Hp)
    bfc = params["b_fc"].reshape(1, 1).astype(f32)                       # (1, 1)

    return {"wih0": wih0, "b0": b0, "whh0": whh0, "wih1": wih1,
            "whh1": whh1, "b1": b1, "wfc": wfc, "bfc": bfc}


# --------------------------------------------------------------------------
# Jitted forward: squeeze x and call the kernel, nothing else.
# --------------------------------------------------------------------------
@jax.jit
def lstm_model_forward(x, prep):
    """x: (B, T, 1) float32 -> (B, 1) float32."""
    B = x.shape[0]
    x2 = x[:, :, 0].astype(jnp.float32)                                  # (B, T)
    vmem = pl.BlockSpec(memory_space=pltpu.MemorySpace.VMEM)
    return pl.pallas_call(
        lstm_kernel,
        out_shape=jax.ShapeDtypeStruct((B, 1), jnp.float32),
        in_specs=[vmem] * 9,
        out_specs=vmem,
    )(x2, prep["wih0"], prep["b0"], prep["whh0"], prep["wih1"],
      prep["whh1"], prep["b1"], prep["wfc"], prep["bfc"])


# --------------------------------------------------------------------------
# Params + pure-JAX f32 reference (torch.nn.LSTM semantics)
# --------------------------------------------------------------------------
def init_params(key, input_size=1, hidden_size=50, output_size=1):
    """Deterministic PyTorch-style init (uniform +/- 1/sqrt(H))."""
    H = hidden_size
    k = 1.0 / jnp.sqrt(jnp.float32(H))
    keys = jax.random.split(key, 10)

    def u(k_, shape):
        return jax.random.uniform(k_, shape, jnp.float32, -k, k)

    return {
        "w_ih_l0": u(keys[0], (4 * H, input_size)),
        "w_hh_l0": u(keys[1], (4 * H, H)),
        "b_ih_l0": u(keys[2], (4 * H,)),
        "b_hh_l0": u(keys[3], (4 * H,)),
        "w_ih_l1": u(keys[4], (4 * H, H)),
        "w_hh_l1": u(keys[5], (4 * H, H)),
        "b_ih_l1": u(keys[6], (4 * H,)),
        "b_hh_l1": u(keys[7], (4 * H,)),
        "w_fc": u(keys[8], (output_size, H)),
        "b_fc": u(keys[9], (output_size,)),
    }


def lstm_model_reference(x, params):
    B, T, I = x.shape
    H = params["w_hh_l0"].shape[1]

    def layer(inp, w_ih, w_hh, b_ih, b_hh):
        h = jnp.zeros((B, H), jnp.float32)
        c = jnp.zeros((B, H), jnp.float32)
        outs = []
        for t in range(T):
            g = inp[:, t, :] @ w_ih.T + b_ih + h @ w_hh.T + b_hh
            i_g = jax.nn.sigmoid(g[:, 0 * H:1 * H])
            f_g = jax.nn.sigmoid(g[:, 1 * H:2 * H])
            g_g = jnp.tanh(g[:, 2 * H:3 * H])
            o_g = jax.nn.sigmoid(g[:, 3 * H:4 * H])
            c = f_g * c + i_g * g_g
            h = o_g * jnp.tanh(c)
            outs.append(h)
        return jnp.stack(outs, axis=1)

    y0 = layer(x, params["w_ih_l0"], params["w_hh_l0"],
               params["b_ih_l0"], params["b_hh_l0"])
    y1 = layer(y0, params["w_ih_l1"], params["w_hh_l1"],
               params["b_ih_l1"], params["b_hh_l1"])
    return y1[:, -1, :] @ params["w_fc"].T + params["b_fc"]


if __name__ == "__main__":
    B, T, I, H, O = 2, 8, 1, 50, 1
    key = jax.random.PRNGKey(0)
    kx, kp = jax.random.split(key)
    x = jax.random.normal(kx, (B, T, I), jnp.float32)
    params = init_params(kp, input_size=I, hidden_size=H, output_size=O)

    prep = prepare_params(params)            # one-time layout prep
    out = lstm_model_forward(x, prep)
    out = jax.block_until_ready(out)

    ref = lstm_model_reference(x, params)
    assert out.shape == (B, O), out.shape
    # Tolerance relaxed vs. the pure-f32 version: recurrent matmul operands
    # are bf16 (f32 accumulation); expected error ~1e-3..1e-2.
    assert jnp.allclose(out, ref, atol=2e-2, rtol=2e-2), (out, ref)

    print("KERNEL_OK")
</pallas_src>

<mosaic_0001>
module attributes {stable_mosaic.version = 11 : i64} {
  func.func @lstm_kernel(%arg0: memref<2x8xf32, #tpu.memory_space<vmem>>, %arg1: memref<1x512xf32, #tpu.memory_space<vmem>>, %arg2: memref<1x512xf32, #tpu.memory_space<vmem>>, %arg3: memref<128x512xbf16, #tpu.memory_space<vmem>>, %arg4: memref<128x512xbf16, #tpu.memory_space<vmem>>, %arg5: memref<128x512xbf16, #tpu.memory_space<vmem>>, %arg6: memref<1x512xf32, #tpu.memory_space<vmem>>, %arg7: memref<1x128xf32, #tpu.memory_space<vmem>>, %arg8: memref<1x1xf32, #tpu.memory_space<vmem>>, %arg9: memref<2x1xf32, #tpu.memory_space<vmem>>) attributes {dimension_semantics = [], scalar_prefetch = 0 : i64, scratch_operands = 0 : i64, tpu.core_type = #tpu.core_type<tc>} {
    %c0 = arith.constant 0 : index
    %c0_0 = arith.constant 0 : index
    %0 = vector.load %arg1[%c0, %c0_0] : memref<1x512xf32, #tpu.memory_space<vmem>>, vector<1x512xf32>
    %c0_1 = arith.constant 0 : index
    %c0_2 = arith.constant 0 : index
    %1 = vector.load %arg2[%c0_1, %c0_2] : memref<1x512xf32, #tpu.memory_space<vmem>>, vector<1x512xf32>
    %c0_3 = arith.constant 0 : index
    %c0_4 = arith.constant 0 : index
    %2 = vector.load %arg6[%c0_3, %c0_4] : memref<1x512xf32, #tpu.memory_space<vmem>>, vector<1x512xf32>
    %cst = arith.constant 0.000000e+00 : f32
    %3 = vector.broadcast %cst : f32 to vector<2x128xf32>
    %cst_5 = arith.constant 0.000000e+00 : f32
    %4 = vector.broadcast %cst_5 : f32 to vector<2x128xf32>
    %cst_6 = arith.constant 0.000000e+00 : f32
    %5 = vector.broadcast %cst_6 : f32 to vector<2x128xf32>
    %c0_7 = arith.constant 0 : index
    %c0_8 = arith.constant 0 : index
    %6 = vector.load %arg0[%c0_7, %c0_8] : memref<2x8xf32, #tpu.memory_space<vmem>>, vector<2x1xf32>
    %7 = vector.broadcast %6 : vector<2x1xf32> to vector<2x512xf32>
    %8 = vector.broadcast %0 : vector<1x512xf32> to vector<2x512xf32>
    %9 = arith.mulf %7, %8 : vector<2x512xf32>
    %10 = vector.broadcast %1 : vector<1x512xf32> to vector<2x512xf32>
    %11 = arith.addf %9, %10 : vector<2x512xf32>
    %12 = arith.truncf %3 : vector<2x128xf32> to vector<2x128xbf16>
    %c0_9 = arith.constant 0 : index
    %c0_10 = arith.constant 0 : index
    %13 = vector.load %arg3[%c0_9, %c0_10] : memref<128x512xbf16, #tpu.memory_space<vmem>>, vector<128x512xbf16>
    %cst_11 = arith.constant dense<0.000000e+00> : vector<2x512xf32>
    %14 = tpu.matmul %12, %13, %cst_11 {dimension_numbers = #tpu.dot_dimension_numbers<[1], [0], [0], [1], [0, 0, 1, 1], [], []>} : vector<2x128xbf16>, vector<128x512xbf16>, vector<2x512xf32> -> vector<2x512xf32>
    %15 = arith.addf %11, %14 : vector<2x512xf32>
    %16 = vector.extract_strided_slice %15 {offsets = [0, 0], sizes = [2, 128], strides = [1, 1]} : vector<2x512xf32> to vector<2x128xf32>
    %cst_12 = arith.constant 5.000000e-01 : f32
    %17 = vector.broadcast %cst_12 : f32 to vector<2x128xf32>
    %18 = arith.mulf %17, %16 : vector<2x128xf32>
    %19 = math.tanh %18 : vector<2x128xf32>
    %cst_13 = arith.constant 1.000000e+00 : f32
    %20 = vector.broadcast %cst_13 : f32 to vector<2x128xf32>
    %21 = arith.addf %19, %20 : vector<2x128xf32>
    %cst_14 = arith.constant 5.000000e-01 : f32
    %22 = vector.broadcast %cst_14 : f32 to vector<2x128xf32>
    %23 = arith.mulf %22, %21 : vector<2x128xf32>
    %24 = vector.extract_strided_slice %15 {offsets = [0, 128], sizes = [2, 128], strides = [1, 1]} : vector<2x512xf32> to vector<2x128xf32>
    %cst_15 = arith.constant 5.000000e-01 : f32
    %25 = vector.broadcast %cst_15 : f32 to vector<2x128xf32>
    %26 = arith.mulf %25, %24 : vector<2x128xf32>
    %27 = math.tanh %26 : vector<2x128xf32>
    %cst_16 = arith.constant 1.000000e+00 : f32
    %28 = vector.broadcast %cst_16 : f32 to vector<2x128xf32>
    %29 = arith.addf %27, %28 : vector<2x128xf32>
    %cst_17 = arith.constant 5.000000e-01 : f32
    %30 = vector.broadcast %cst_17 : f32 to vector<2x128xf32>
    %31 = arith.mulf %30, %29 : vector<2x128xf32>
    %32 = vector.extract_strided_slice %15 {offsets = [0, 256], sizes = [2, 128], strides = [1, 1]} : vector<2x512xf32> to vector<2x128xf32>
    %33 = math.tanh %32 : vector<2x128xf32>
    %34 = vector.extract_strided_slice %15 {offsets = [0, 384], sizes = [2, 128], strides = [1, 1]} : vector<2x512xf32> to vector<2x128xf32>
    %cst_18 = arith.constant 5.000000e-01 : f32
    %35 = vector.broadcast %cst_18 : f32 to vector<2x128xf32>
    %36 = arith.mulf %35, %34 : vector<2x128xf32>
    %37 = math.tanh %36 : vector<2x128xf32>
    %cst_19 = arith.constant 1.000000e+00 : f32
    %38 = vector.broadcast %cst_19 : f32 to vector<2x128xf32>
    %39 = arith.addf %37, %38 : vector<2x128xf32>
    %cst_20 = arith.constant 5.000000e-01 : f32
    %40 = vector.broadcast %cst_20 : f32 to vector<2x128xf32>
    %41 = arith.mulf %40, %39 : vector<2x128xf32>
    %42 = arith.mulf %31, %4 : vector<2x128xf32>
    %43 = arith.mulf %23, %33 : vector<2x128xf32>
    %44 = arith.addf %42, %43 : vector<2x128xf32>
    %45 = math.tanh %44 : vector<2x128xf32>
    %46 = arith.mulf %41, %45 : vector<2x128xf32>
    %47 = arith.truncf %46 : vector<2x128xf32> to vector<2x128xbf16>
    %c0_21 = arith.constant 0 : index
    %c0_22 = arith.constant 0 : index
    %48 = vector.load %arg4[%c0_21, %c0_22] : memref<128x512xbf16, #tpu.memory_space<vmem>>, vector<128x512xbf16>
    %cst_23 = arith.constant dense<0.000000e+00> : vector<2x512xf32>
    %49 = tpu.matmul %47, %48, %cst_23 {dimension_numbers = #tpu.dot_dimension_numbers<[1], [0], [0], [1], [0, 0, 1, 1], [], []>} : vector<2x128xbf16>, vector<128x512xbf16>, vector<2x512xf32> -> vector<2x512xf32>
    %50 = vector.broadcast %2 : vector<1x512xf32> to vector<2x512xf32>
    %51 = arith.addf %49, %50 : vector<2x512xf32>
    %52 = vector.extract_strided_slice %51 {offsets = [0, 0], sizes = [2, 128], strides = [1, 1]} : vector<2x512xf32> to vector<2x128xf32>
    %cst_24 = arith.constant 5.000000e-01 : f32
    %53 = vector.broadcast %cst_24 : f32 to vector<2x128xf32>
    %54 = arith.mulf %53, %52 : vector<2x128xf32>
    %55 = math.tanh %54 : vector<2x128xf32>
    %cst_25 = arith.constant 1.000000e+00 : f32
    %56 = vector.broadcast %cst_25 : f32 to vector<2x128xf32>
    %57 = arith.addf %55, %56 : vector<2x128xf32>
    %cst_26 = arith.constant 5.000000e-01 : f32
    %58 = vector.broadcast %cst_26 : f32 to vector<2x128xf32>
    %59 = arith.mulf %58, %57 : vector<2x128xf32>
    %60 = vector.extract_strided_slice %51 {offsets = [0, 128], sizes = [2, 128], strides = [1, 1]} : vector<2x512xf32> to vector<2x128xf32>
    %cst_27 = arith.constant 5.000000e-01 : f32
    %61 = vector.broadcast %cst_27 : f32 to vector<2x128xf32>
    %62 = arith.mulf %61, %60 : vector<2x128xf32>
    %63 = math.tanh %62 : vector<2x128xf32>
    %cst_28 = arith.constant 1.000000e+00 : f32
    %64 = vector.broadcast %cst_28 : f32 to vector<2x128xf32>
    %65 = arith.addf %63, %64 : vector<2x128xf32>
    %cst_29 = arith.constant 5.000000e-01 : f32
    %66 = vector.broadcast %cst_29 : f32 to vector<2x128xf32>
    %67 = arith.mulf %66, %65 : vector<2x128xf32>
    %68 = vector.extract_strided_slice %51 {offsets = [0, 256], sizes = [2, 128], strides = [1, 1]} : vector<2x512xf32> to vector<2x128xf32>
    %69 = math.tanh %68 : vector<2x128xf32>
    %70 = vector.extract_strided_slice %51 {offsets = [0, 384], sizes = [2, 128], strides = [1, 1]} : vector<2x512xf32> to vector<2x128xf32>
    %cst_30 = arith.constant 5.000000e-01 : f32
    %71 = vector.broadcast %cst_30 : f32 to vector<2x128xf32>
    %72 = arith.mulf %71, %70 : vector<2x128xf32>
    %73 = math.tanh %72 : vector<2x128xf32>
    %cst_31 = arith.constant 1.000000e+00 : f32
    %74 = vector.broadcast %cst_31 : f32 to vector<2x128xf32>
    %75 = arith.addf %73, %74 : vector<2x128xf32>
    %cst_32 = arith.constant 5.000000e-01 : f32
    %76 = vector.broadcast %cst_32 : f32 to vector<2x128xf32>
    %77 = arith.mulf %76, %75 : vector<2x128xf32>
    %78 = arith.mulf %67, %5 : vector<2x128xf32>
    %79 = arith.mulf %59, %69 : vector<2x128xf32>
    %80 = arith.addf %78, %79 : vector<2x128xf32>
    %81 = math.tanh %80 : vector<2x128xf32>
    %82 = arith.mulf %77, %81 : vector<2x128xf32>
    %83 = arith.truncf %82 : vector<2x128xf32> to vector<2x128xbf16>
    %c0_33 = arith.constant 0 : index
    %c0_34 = arith.constant 0 : index
    %84 = vector.load %arg5[%c0_33, %c0_34] : memref<128x512xbf16, #tpu.memory_space<vmem>>, vector<128x512xbf16>
    %cst_35 = arith.constant dense<0.000000e+00> : vector<2x512xf32>
    %85 = tpu.matmul %83, %84, %cst_35 {dimension_numbers = #tpu.dot_dimension_numbers<[1], [0], [0], [1], [0, 0, 1, 1], [], []>} : vector<2x128xbf16>, vector<128x512xbf16>, vector<2x512xf32> -> vector<2x512xf32>
    %86 = vector.broadcast %2 : vector<1x512xf32> to vector<2x512xf32>
    %87 = arith.addf %85, %86 : vector<2x512xf32>
    %c0_36 = arith.constant 0 : index
    %c1 = arith.constant 1 : index
    %88 = vector.load %arg0[%c0_36, %c1] : memref<2x8xf32, #tpu.memory_space<vmem>>, vector<2x1xf32>
    %89 = vector.broadcast %88 : vector<2x1xf32> to vector<2x512xf32>
    %90 = vector.broadcast %0 : vector<1x512xf32> to vector<2x512xf32>
    %91 = arith.mulf %89, %90 : vector<2x512xf32>
    %92 = vector.broadcast %1 : vector<1x512xf32> to vector<2x512xf32>
    %93 = arith.addf %91, %92 : vector<2x512xf32>
    %94 = arith.truncf %46 : vector<2x128xf32> to vector<2x128xbf16>
    %c0_37 = arith.constant 0 : index
    %c0_38 = arith.constant 0 : index
    %95 = vector.load %arg3[%c0_37, %c0_38] : memref<128x512xbf16, #tpu.memory_space<vmem>>, vector<128x512xbf16>
    %cst_39 = arith.constant dense<0.000000e+00> : vector<2x512xf32>
    %96 = tpu.matmul %94, %95, %cst_39 {dimension_numbers = #tpu.dot_dimension_numbers<[1], [0], [0], [1], [0, 0, 1, 1], [], []>} : vector<2x128xbf16>, vector<128x512xbf16>, vector<2x512xf32> -> vector<2x512xf32>
    %97 = arith.addf %93, %96 : vector<2x512xf32>
    %98 = vector.extract_strided_slice %97 {offsets = [0, 0], sizes = [2, 128], strides = [1, 1]} : vector<2x512xf32> to vector<2x128xf32>
    %cst_40 = arith.constant 5.000000e-01 : f32
    %99 = vector.broadcast %cst_40 : f32 to vector<2x128xf32>
    %100 = arith.mulf %99, %98 : vector<2x128xf32>
    %101 = math.tanh %100 : vector<2x128xf32>
    %cst_41 = arith.constant 1.000000e+00 : f32
    %102 = vector.broadcast %cst_41 : f32 to vector<2x128xf32>
    %103 = arith.addf %101, %102 : vector<2x128xf32>
    %cst_42 = arith.constant 5.000000e-01 : f32
    %104 = vector.broadcast %cst_42 : f32 to vector<2x128xf32>
    %105 = arith.mulf %104, %103 : vector<2x128xf32>
    %106 = vector.extract_strided_slice %97 {offsets = [0, 128], sizes = [2, 128], strides = [1, 1]} : vector<2x512xf32> to vector<2x128xf32>
    %cst_43 = arith.constant 5.000000e-01 : f32
    %107 = vector.broadcast %cst_43 : f32 to vector<2x128xf32>
    %108 = arith.mulf %107, %106 : vector<2x128xf32>
    %109 = math.tanh %108 : vector<2x128xf32>
    %cst_44 = arith.constant 1.000000e+00 : f32
    %110 = vector.broadcast %cst_44 : f32 to vector<2x128xf32>
    %111 = arith.addf %109, %110 : vector<2x128xf32>
    %cst_45 = arith.constant 5.000000e-01 : f32
    %112 = vector.broadcast %cst_45 : f32 to vector<2x128xf32>
    %113 = arith.mulf %112, %111 : vector<2x128xf32>
    %114 = vector.extract_strided_slice %97 {offsets = [0, 256], sizes = [2, 128], strides = [1, 1]} : vector<2x512xf32> to vector<2x128xf32>
    %115 = math.tanh %114 : vector<2x128xf32>
    %116 = vector.extract_strided_slice %97 {offsets = [0, 384], sizes = [2, 128], strides = [1, 1]} : vector<2x512xf32> to vector<2x128xf32>
    %cst_46 = arith.constant 5.000000e-01 : f32
    %117 = vector.broadcast %cst_46 : f32 to vector<2x128xf32>
    %118 = arith.mulf %117, %116 : vector<2x128xf32>
    %119 = math.tanh %118 : vector<2x128xf32>
    %cst_47 = arith.constant 1.000000e+00 : f32
    %120 = vector.broadcast %cst_47 : f32 to vector<2x128xf32>
    %121 = arith.addf %119, %120 : vector<2x128xf32>
    %cst_48 = arith.constant 5.000000e-01 : f32
    %122 = vector.broadcast %cst_48 : f32 to vector<2x128xf32>
    %123 = arith.mulf %122, %121 : vector<2x128xf32>
    %124 = arith.mulf %113, %44 : vector<2x128xf32>
    %125 = arith.mulf %105, %115 : vector<2x128xf32>
    %126 = arith.addf %124, %125 : vector<2x128xf32>
    %127 = math.tanh %126 : vector<2x128xf32>
    %128 = arith.mulf %123, %127 : vector<2x128xf32>
    %129 = arith.truncf %128 : vector<2x128xf32> to vector<2x128xbf16>
    %c0_49 = arith.constant 0 : index
    %c0_50 = arith.constant 0 : index
    %130 = vector.load %arg4[%c0_49, %c0_50] : memref<128x512xbf16, #tpu.memory_space<vmem>>, vector<128x512xbf16>
    %cst_51 = arith.constant dense<0.000000e+00> : vector<2x512xf32>
    %131 = tpu.matmul %129, %130, %cst_51 {dimension_numbers = #tpu.dot_dimension_numbers<[1], [0], [0], [1], [0, 0, 1, 1], [], []>} : vector<2x128xbf16>, vector<128x512xbf16>, vector<2x512xf32> -> vector<2x512xf32>
    %132 = arith.addf %131, %87 : vector<2x512xf32>
    %133 = vector.extract_strided_slice %132 {offsets = [0, 0], sizes = [2, 128], strides = [1, 1]} : vector<2x512xf32> to vector<2x128xf32>
    %cst_52 = arith.constant 5.000000e-01 : f32
    %134 = vector.broadcast %cst_52 : f32 to vector<2x128xf32>
    %135 = arith.mulf %134, %133 : vector<2x128xf32>
    %136 = math.tanh %135 : vector<2x128xf32>
    %cst_53 = arith.constant 1.000000e+00 : f32
    %137 = vector.broadcast %cst_53 : f32 to vector<2x128xf32>
    %138 = arith.addf %136, %137 : vector<2x128xf32>
    %cst_54 = arith.constant 5.000000e-01 : f32
    %139 = vector.broadcast %cst_54 : f32 to vector<2x128xf32>
    %140 = arith.mulf %139, %138 : vector<2x128xf32>
    %141 = vector.extract_strided_slice %132 {offsets = [0, 128], sizes = [2, 128], strides = [1, 1]} : vector<2x512xf32> to vector<2x128xf32>
    %cst_55 = arith.constant 5.000000e-01 : f32
    %142 = vector.broadcast %cst_55 : f32 to vector<2x128xf32>
    %143 = arith.mulf %142, %141 : vector<2x128xf32>
    %144 = math.tanh %143 : vector<2x128xf32>
    %cst_56 = arith.constant 1.000000e+00 : f32
    %145 = vector.broadcast %cst_56 : f32 to vector<2x128xf32>
    %146 = arith.addf %144, %145 : vector<2x128xf32>
    %cst_57 = arith.constant 5.000000e-01 : f32
    %147 = vector.broadcast %cst_57 : f32 to vector<2x128xf32>
    %148 = arith.mulf %147, %146 : vector<2x128xf32>
    %149 = vector.extract_strided_slice %132 {offsets = [0, 256], sizes = [2, 128], strides = [1, 1]} : vector<2x512xf32> to vector<2x128xf32>
    %150 = math.tanh %149 : vector<2x128xf32>
    %151 = vector.extract_strided_slice %132 {offsets = [0, 384], sizes = [2, 128], strides = [1, 1]} : vector<2x512xf32> to vector<2x128xf32>
    %cst_58 = arith.constant 5.000000e-01 : f32
    %152 = vector.broadcast %cst_58 : f32 to vector<2x128xf32>
    %153 = arith.mulf %152, %151 : vector<2x128xf32>
    %154 = math.tanh %153 : vector<2x128xf32>
    %cst_59 = arith.constant 1.000000e+00 : f32
    %155 = vector.broadcast %cst_59 : f32 to vector<2x128xf32>
    %156 = arith.addf %154, %155 : vector<2x128xf32>
    %cst_60 = arith.constant 5.000000e-01 : f32
    %157 = vector.broadcast %cst_60 : f32 to vector<2x128xf32>
    %158 = arith.mulf %157, %156 : vector<2x128xf32>
    %159 = arith.mulf %148, %80 : vector<2x128xf32>
    %160 = arith.mulf %140, %150 : vector<2x128xf32>
    %161 = arith.addf %159, %160 : vector<2x128xf32>
    %162 = math.tanh %161 : vector<2x128xf32>
    %163 = arith.mulf %158, %162 : vector<2x128xf32>
    %164 = arith.truncf %163 : vector<2x128xf32> to vector<2x128xbf16>
    %c0_61 = arith.constant 0 : index
    %c0_62 = arith.constant 0 : index
    %165 = vector.load %arg5[%c0_61, %c0_62] : memref<128x512xbf16, #tpu.memory_space<vmem>>, vector<128x512xbf16>
    %cst_63 = arith.constant dense<0.000000e+00> : vector<2x512xf32>
    %166 = tpu.matmul %164, %165, %cst_63 {dimension_numbers = #tpu.dot_dimension_numbers<[1], [0], [0], [1], [0, 0, 1, 1], [], []>} : vector<2x128xbf16>, vector<128x512xbf16>, vector<2x512xf32> -> vector<2x512xf32>
    %167 = vector.broadcast %2 : vector<1x512xf32> to vector<2x512xf32>
    %168 = arith.addf %166, %167 : vector<2x512xf32>
    %c0_64 = arith.constant 0 : index
    %c2 = arith.constant 2 : index
    %169 = vector.load %arg0[%c0_64, %c2] : memref<2x8xf32, #tpu.memory_space<vmem>>, vector<2x1xf32>
    %170 = vector.broadcast %169 : vector<2x1xf32> to vector<2x512xf32>
    %171 = vector.broadcast %0 : vector<1x512xf32> to vector<2x512xf32>
    %172 = arith.mulf %170, %171 : vector<2x512xf32>
    %173 = vector.broadcast %1 : vector<1x512xf32> to vector<2x512xf32>
    %174 = arith.addf %172, %173 : vector<2x512xf32>
    %175 = arith.truncf %128 : vector<2x128xf32> to vector<2x128xbf16>
    %c0_65 = arith.constant 0 : index
    %c0_66 = arith.constant 0 : index
    %176 = vector.load %arg3[%c0_65, %c0_66] : memref<128x512xbf16, #tpu.memory_space<vmem>>, vector<128x512xbf16>
    %cst_67 = arith.constant dense<0.000000e+00> : vector<2x512xf32>
    %177 = tpu.matmul %175, %176, %cst_67 {dimension_numbers = #tpu.dot_dimension_numbers<[1], [0], [0], [1], [0, 0, 1, 1], [], []>} : vector<2x128xbf16>, vector<128x512xbf16>, vector<2x512xf32> -> vector<2x512xf32>
    %178 = arith.addf %174, %177 : vector<2x512xf32>
    %179 = vector.extract_strided_slice %178 {offsets = [0, 0], sizes = [2, 128], strides = [1, 1]} : vector<2x512xf32> to vector<2x128xf32>
    %cst_68 = arith.constant 5.000000e-01 : f32
    %180 = vector.broadcast %cst_68 : f32 to vector<2x128xf32>
    %181 = arith.mulf %180, %179 : vector<2x128xf32>
    %182 = math.tanh %181 : vector<2x128xf32>
    %cst_69 = arith.constant 1.000000e+00 : f32
    %183 = vector.broadcast %cst_69 : f32 to vector<2x128xf32>
    %184 = arith.addf %182, %183 : vector<2x128xf32>
    %cst_70 = arith.constant 5.000000e-01 : f32
    %185 = vector.broadcast %cst_70 : f32 to vector<2x128xf32>
    %186 = arith.mulf %185, %184 : vector<2x128xf32>
    %187 = vector.extract_strided_slice %178 {offsets = [0, 128], sizes = [2, 128], strides = [1, 1]} : vector<2x512xf32> to vector<2x128xf32>
    %cst_71 = arith.constant 5.000000e-01 : f32
    %188 = vector.broadcast %cst_71 : f32 to vector<2x128xf32>
    %189 = arith.mulf %188, %187 : vector<2x128xf32>
    %190 = math.tanh %189 : vector<2x128xf32>
    %cst_72 = arith.constant 1.000000e+00 : f32
    %191 = vector.broadcast %cst_72 : f32 to vector<2x128xf32>
    %192 = arith.addf %190, %191 : vector<2x128xf32>
    %cst_73 = arith.constant 5.000000e-01 : f32
    %193 = vector.broadcast %cst_73 : f32 to vector<2x128xf32>
    %194 = arith.mulf %193, %192 : vector<2x128xf32>
    %195 = vector.extract_strided_slice %178 {offsets = [0, 256], sizes = [2, 128], strides = [1, 1]} : vector<2x512xf32> to vector<2x128xf32>
    %196 = math.tanh %195 : vector<2x128xf32>
    %197 = vector.extract_strided_slice %178 {offsets = [0, 384], sizes = [2, 128], strides = [1, 1]} : vector<2x512xf32> to vector<2x128xf32>
    %cst_74 = arith.constant 5.000000e-01 : f32
    %198 = vector.broadcast %cst_74 : f32 to vector<2x128xf32>
    %199 = arith.mulf %198, %197 : vector<2x128xf32>
    %200 = math.tanh %199 : vector<2x128xf32>
    %cst_75 = arith.constant 1.000000e+00 : f32
    %201 = vector.broadcast %cst_75 : f32 to vector<2x128xf32>
    %202 = arith.addf %200, %201 : vector<2x128xf32>
    %cst_76 = arith.constant 5.000000e-01 : f32
    %203 = vector.broadcast %cst_76 : f32 to vector<2x128xf32>
    %204 = arith.mulf %203, %202 : vector<2x128xf32>
    %205 = arith.mulf %194, %126 : vector<2x128xf32>
    %206 = arith.mulf %186, %196 : vector<2x128xf32>
    %207 = arith.addf %205, %206 : vector<2x128xf32>
    %208 = math.tanh %207 : vector<2x128xf32>
    %209 = arith.mulf %204, %208 : vector<2x128xf32>
    %210 = arith.truncf %209 : vector<2x128xf32> to vector<2x128xbf16>
    %c0_77 = arith.constant 0 : index
    %c0_78 = arith.constant 0 : index
    %211 = vector.load %arg4[%c0_77, %c0_78] : memref<128x512xbf16, #tpu.memory_space<vmem>>, vector<128x512xbf16>
    %cst_79 = arith.constant dense<0.000000e+00> : vector<2x512xf32>
    %212 = tpu.matmul %210, %211, %cst_79 {dimension_numbers = #tpu.dot_dimension_numbers<[1], [0], [0], [1], [0, 0, 1, 1], [], []>} : vector<2x128xbf16>, vector<128x512xbf16>, vector<2x512xf32> -> vector<2x512xf32>
    %213 = arith.addf %212, %168 : vector<2x512xf32>
    %214 = vector.extract_strided_slice %213 {offsets = [0, 0], sizes = [2, 128], strides = [1, 1]} : vector<2x512xf32> to vector<2x128xf32>
    %cst_80 = arith.constant 5.000000e-01 : f32
    %215 = vector.broadcast %cst_80 : f32 to vector<2x128xf32>
    %216 = arith.mulf %215, %214 : vector<2x128xf32>
    %217 = math.tanh %216 : vector<2x128xf32>
    %cst_81 = arith.constant 1.000000e+00 : f32
    %218 = vector.broadcast %cst_81 : f32 to vector<2x128xf32>
    %219 = arith.addf %217, %218 : vector<2x128xf32>
    %cst_82 = arith.constant 5.000000e-01 : f32
    %220 = vector.broadcast %cst_82 : f32 to vector<2x128xf32>
    %221 = arith.mulf %220, %219 : vector<2x128xf32>
    %222 = vector.extract_strided_slice %213 {offsets = [0, 128], sizes = [2, 128], strides = [1, 1]} : vector<2x512xf32> to vector<2x128xf32>
    %cst_83 = arith.constant 5.000000e-01 : f32
    %223 = vector.broadcast %cst_83 : f32 to vector<2x128xf32>
    %224 = arith.mulf %223, %222 : vector<2x128xf32>
    %225 = math.tanh %224 : vector<2x128xf32>
    %cst_84 = arith.constant 1.000000e+00 : f32
    %226 = vector.broadcast %cst_84 : f32 to vector<2x128xf32>
    %227 = arith.addf %225, %226 : vector<2x128xf32>
    %cst_85 = arith.constant 5.000000e-01 : f32
    %228 = vector.broadcast %cst_85 : f32 to vector<2x128xf32>
    %229 = arith.mulf %228, %227 : vector<2x128xf32>
    %230 = vector.extract_strided_slice %213 {offsets = [0, 256], sizes = [2, 128], strides = [1, 1]} : vector<2x512xf32> to vector<2x128xf32>
    %231 = math.tanh %230 : vector<2x128xf32>
    %232 = vector.extract_strided_slice %213 {offsets = [0, 384], sizes = [2, 128], strides = [1, 1]} : vector<2x512xf32> to vector<2x128xf32>
    %cst_86 = arith.constant 5.000000e-01 : f32
    %233 = vector.broadcast %cst_86 : f32 to vector<2x128xf32>
    %234 = arith.mulf %233, %232 : vector<2x128xf32>
    %235 = math.tanh %234 : vector<2x128xf32>
    %cst_87 = arith.constant 1.000000e+00 : f32
    %236 = vector.broadcast %cst_87 : f32 to vector<2x128xf32>
    %237 = arith.addf %235, %236 : vector<2x128xf32>
    %cst_88 = arith.constant 5.000000e-01 : f32
    %238 = vector.broadcast %cst_88 : f32 to vector<2x128xf32>
    %239 = arith.mulf %238, %237 : vector<2x128xf32>
    %240 = arith.mulf %229, %161 : vector<2x128xf32>
    %241 = arith.mulf %221, %231 : vector<2x128xf32>
    %242 = arith.addf %240, %241 : vector<2x128xf32>
    %243 = math.tanh %242 : vector<2x128xf32>
    %244 = arith.mulf %239, %243 : vector<2x128xf32>
    %245 = arith.truncf %244 : vector<2x128xf32> to vector<2x128xbf16>
    %c0_89 = arith.constant 0 : index
    %c0_90 = arith.constant 0 : index
    %246 = vector.load %arg5[%c0_89, %c0_90] : memref<128x512xbf16, #tpu.memory_space<vmem>>, vector<128x512xbf16>
    %cst_91 = arith.constant dense<0.000000e+00> : vector<2x512xf32>
    %247 = tpu.matmul %245, %246, %cst_91 {dimension_numbers = #tpu.dot_dimension_numbers<[1], [0], [0], [1], [0, 0, 1, 1], [], []>} : vector<2x128xbf16>, vector<128x512xbf16>, vector<2x512xf32> -> vector<2x512xf32>
    %248 = vector.broadcast %2 : vector<1x512xf32> to vector<2x512xf32>
    %249 = arith.addf %247, %248 : vector<2x512xf32>
    %c0_92 = arith.constant 0 : index
    %c3 = arith.constant 3 : index
    %250 = vector.load %arg0[%c0_92, %c3] : memref<2x8xf32, #tpu.memory_space<vmem>>, vector<2x1xf32>
    %251 = vector.broadcast %250 : vector<2x1xf32> to vector<2x512xf32>
    %252 = vector.broadcast %0 : vector<1x512xf32> to vector<2x512xf32>
    %253 = arith.mulf %251, %252 : vector<2x512xf32>
    %254 = vector.broadcast %1 : vector<1x512xf32> to vector<2x512xf32>
    %255 = arith.addf %253, %254 : vector<2x512xf32>
    %256 = arith.truncf %209 : vector<2x128xf32> to vector<2x128xbf16>
    %c0_93 = arith.constant 0 : index
    %c0_94 = arith.constant 0 : index
    %257 = vector.load %arg3[%c0_93, %c0_94] : memref<128x512xbf16, #tpu.memory_space<vmem>>, vector<128x512xbf16>
    %cst_95 = arith.constant dense<0.000000e+00> : vector<2x512xf32>
    %258 = tpu.matmul %256, %257, %cst_95 {dimension_numbers = #tpu.dot_dimension_numbers<[1], [0], [0], [1], [0, 0, 1, 1], [], []>} : vector<2x128xbf16>, vector<128x512xbf16>, vector<2x512xf32> -> vector<2x512xf32>
    %259 = arith.addf %255, %258 : vector<2x512xf32>
    %260 = vector.extract_strided_slice %259 {offsets = [0, 0], sizes = [2, 128], strides = [1, 1]} : vector<2x512xf32> to vector<2x128xf32>
    %cst_96 = arith.constant 5.000000e-01 : f32
    %261 = vector.broadcast %cst_96 : f32 to vector<2x128xf32>
    %262 = arith.mulf %261, %260 : vector<2x128xf32>
    %263 = math.tanh %262 : vector<2x128xf32>
    %cst_97 = arith.constant 1.000000e+00 : f32
    %264 = vector.broadcast %cst_97 : f32 to vector<2x128xf32>
    %265 = arith.addf %263, %264 : vector<2x128xf32>
    %cst_98 = arith.constant 5.000000e-01 : f32
    %266 = vector.broadcast %cst_98 : f32 to vector<2x128xf32>
    %267 = arith.mulf %266, %265 : vector<2x128xf32>
    %268 = vector.extract_strided_slice %259 {offsets = [0, 128], sizes = [2, 128], strides = [1, 1]} : vector<2x512xf32> to vector<2x128xf32>
    %cst_99 = arith.constant 5.000000e-01 : f32
    %269 = vector.broadcast %cst_99 : f32 to vector<2x128xf32>
    %270 = arith.mulf %269, %268 : vector<2x128xf32>
    %271 = math.tanh %270 : vector<2x128xf32>
    %cst_100 = arith.constant 1.000000e+00 : f32
    %272 = vector.broadcast %cst_100 : f32 to vector<2x128xf32>
    %273 = arith.addf %271, %272 : vector<2x128xf32>
    %cst_101 = arith.constant 5.000000e-01 : f32
    %274 = vector.broadcast %cst_101 : f32 to vector<2x128xf32>
    %275 = arith.mulf %274, %273 : vector<2x128xf32>
    %276 = vector.extract_strided_slice %259 {offsets = [0, 256], sizes = [2, 128], strides = [1, 1]} : vector<2x512xf32> to vector<2x128xf32>
    %277 = math.tanh %276 : vector<2x128xf32>
    %278 = vector.extract_strided_slice %259 {offsets = [0, 384], sizes = [2, 128], strides = [1, 1]} : vector<2x512xf32> to vector<2x128xf32>
    %cst_102 = arith.constant 5.000000e-01 : f32
    %279 = vector.broadcast %cst_102 : f32 to vector<2x128xf32>
    %280 = arith.mulf %279, %278 : vector<2x128xf32>
    %281 = math.tanh %280 : vector<2x128xf32>
    %cst_103 = arith.constant 1.000000e+00 : f32
    %282 = vector.broadcast %cst_103 : f32 to vector<2x128xf32>
    %283 = arith.addf %281, %282 : vector<2x128xf32>
    %cst_104 = arith.constant 5.000000e-01 : f32
    %284 = vector.broadcast %cst_104 : f32 to vector<2x128xf32>
    %285 = arith.mulf %284, %283 : vector<2x128xf32>
    %286 = arith.mulf %275, %207 : vector<2x128xf32>
    %287 = arith.mulf %267, %277 : vector<2x128xf32>
    %288 = arith.addf %286, %287 : vector<2x128xf32>
    %289 = math.tanh %288 : vector<2x128xf32>
    %290 = arith.mulf %285, %289 : vector<2x128xf32>
    %291 = arith.truncf %290 : vector<2x128xf32> to vector<2x128xbf16>
    %c0_105 = arith.constant 0 : index
    %c0_106 = arith.constant 0 : index
    %292 = vector.load %arg4[%c0_105, %c0_106] : memref<128x512xbf16, #tpu.memory_space<vmem>>, vector<128x512xbf16>
    %cst_107 = arith.constant dense<0.000000e+00> : vector<2x512xf32>
    %293 = tpu.matmul %291, %292, %cst_107 {dimension_numbers = #tpu.dot_dimension_numbers<[1], [0], [0], [1], [0, 0, 1, 1], [], []>} : vector<2x128xbf16>, vector<128x512xbf16>, vector<2x512xf32> -> vector<2x512xf32>
    %294 = arith.addf %293, %249 : vector<2x512xf32>
    %295 = vector.extract_strided_slice %294 {offsets = [0, 0], sizes = [2, 128], strides = [1, 1]} : vector<2x512xf32> to vector<2x128xf32>
    %cst_108 = arith.constant 5.000000e-01 : f32
    %296 = vector.broadcast %cst_108 : f32 to vector<2x128xf32>
    %297 = arith.mulf %296, %295 : vector<2x128xf32>
    %298 = math.tanh %297 : vector<2x128xf32>
    %cst_109 = arith.constant 1.000000e+00 : f32
    %299 = vector.broadcast %cst_109 : f32 to vector<2x128xf32>
    %300 = arith.addf %298, %299 : vector<2x128xf32>
    %cst_110 = arith.constant 5.000000e-01 : f32
    %301 = vector.broadcast %cst_110 : f32 to vector<2x128xf32>
    %302 = arith.mulf %301, %300 : vector<2x128xf32>
    %303 = vector.extract_strided_slice %294 {offsets = [0, 128], sizes = [2, 128], strides = [1, 1]} : vector<2x512xf32> to vector<2x128xf32>
    %cst_111 = arith.constant 5.000000e-01 : f32
    %304 = vector.broadcast %cst_111 : f32 to vector<2x128xf32>
    %305 = arith.mulf %304, %303 : vector<2x128xf32>
    %306 = math.tanh %305 : vector<2x128xf32>
    %cst_112 = arith.constant 1.000000e+00 : f32
    %307 = vector.broadcast %cst_112 : f32 to vector<2x128xf32>
    %308 = arith.addf %306, %307 : vector<2x128xf32>
    %cst_113 = arith.constant 5.000000e-01 : f32
    %309 = vector.broadcast %cst_113 : f32 to vector<2x128xf32>
    %310 = arith.mulf %309, %308 : vector<2x128xf32>
    %311 = vector.extract_strided_slice %294 {offsets = [0, 256], sizes = [2, 128], strides = [1, 1]} : vector<2x512xf32> to vector<2x128xf32>
    %312 = math.tanh %311 : vector<2x128xf32>
    %313 = vector.extract_strided_slice %294 {offsets = [0, 384], sizes = [2, 128], strides = [1, 1]} : vector<2x512xf32> to vector<2x128xf32>
    %cst_114 = arith.constant 5.000000e-01 : f32
    %314 = vector.broadcast %cst_114 : f32 to vector<2x128xf32>
    %315 = arith.mulf %314, %313 : vector<2x128xf32>
    %316 = math.tanh %315 : vector<2x128xf32>
    %cst_115 = arith.constant 1.000000e+00 : f32
    %317 = vector.broadcast %cst_115 : f32 to vector<2x128xf32>
    %318 = arith.addf %316, %317 : vector<2x128xf32>
    %cst_116 = arith.constant 5.000000e-01 : f32
    %319 = vector.broadcast %cst_116 : f32 to vector<2x128xf32>
    %320 = arith.mulf %319, %318 : vector<2x128xf32>
    %321 = arith.mulf %310, %242 : vector<2x128xf32>
    %322 = arith.mulf %302, %312 : vector<2x128xf32>
    %323 = arith.addf %321, %322 : vector<2x128xf32>
    %324 = math.tanh %323 : vector<2x128xf32>
    %325 = arith.mulf %320, %324 : vector<2x128xf32>
    %326 = arith.truncf %325 : vector<2x128xf32> to vector<2x128xbf16>
    %c0_117 = arith.constant 0 : index
    %c0_118 = arith.constant 0 : index
    %327 = vector.load %arg5[%c0_117, %c0_118] : memref<128x512xbf16, #tpu.memory_space<vmem>>, vector<128x512xbf16>
    %cst_119 = arith.constant dense<0.000000e+00> : vector<2x512xf32>
    %328 = tpu.matmul %326, %327, %cst_119 {dimension_numbers = #tpu.dot_dimension_numbers<[1], [0], [0], [1], [0, 0, 1, 1], [], []>} : vector<2x128xbf16>, vector<128x512xbf16>, vector<2x512xf32> -> vector<2x512xf32>
    %329 = vector.broadcast %2 : vector<1x512xf32> to vector<2x512xf32>
    %330 = arith.addf %328, %329 : vector<2x512xf32>
    %c0_120 = arith.constant 0 : index
    %c4 = arith.constant 4 : index
    %331 = vector.load %arg0[%c0_120, %c4] : memref<2x8xf32, #tpu.memory_space<vmem>>, vector<2x1xf32>
    %332 = vector.broadcast %331 : vector<2x1xf32> to vector<2x512xf32>
    %333 = vector.broadcast %0 : vector<1x512xf32> to vector<2x512xf32>
    %334 = arith.mulf %332, %333 : vector<2x512xf32>
    %335 = vector.broadcast %1 : vector<1x512xf32> to vector<2x512xf32>
    %336 = arith.addf %334, %335 : vector<2x512xf32>
    %337 = arith.truncf %290 : vector<2x128xf32> to vector<2x128xbf16>
    %c0_121 = arith.constant 0 : index
    %c0_122 = arith.constant 0 : index
    %338 = vector.load %arg3[%c0_121, %c0_122] : memref<128x512xbf16, #tpu.memory_space<vmem>>, vector<128x512xbf16>
    %cst_123 = arith.constant dense<0.000000e+00> : vector<2x512xf32>
    %339 = tpu.matmul %337, %338, %cst_123 {dimension_numbers = #tpu.dot_dimension_numbers<[1], [0], [0], [1], [0, 0, 1, 1], [], []>} : vector<2x128xbf16>, vector<128x512xbf16>, vector<2x512xf32> -> vector<2x512xf32>
    %340 = arith.addf %336, %339 : vector<2x512xf32>
    %341 = vector.extract_strided_slice %340 {offsets = [0, 0], sizes = [2, 128], strides = [1, 1]} : vector<2x512xf32> to vector<2x128xf32>
    %cst_124 = arith.constant 5.000000e-01 : f32
    %342 = vector.broadcast %cst_124 : f32 to vector<2x128xf32>
    %343 = arith.mulf %342, %341 : vector<2x128xf32>
    %344 = math.tanh %343 : vector<2x128xf32>
    %cst_125 = arith.constant 1.000000e+00 : f32
    %345 = vector.broadcast %cst_125 : f32 to vector<2x128xf32>
    %346 = arith.addf %344, %345 : vector<2x128xf32>
    %cst_126 = arith.constant 5.000000e-01 : f32
    %347 = vector.broadcast %cst_126 : f32 to vector<2x128xf32>
    %348 = arith.mulf %347, %346 : vector<2x128xf32>
    %349 = vector.extract_strided_slice %340 {offsets = [0, 128], sizes = [2, 128], strides = [1, 1]} : vector<2x512xf32> to vector<2x128xf32>
    %cst_127 = arith.constant 5.000000e-01 : f32
    %350 = vector.broadcast %cst_127 : f32 to vector<2x128xf32>
    %351 = arith.mulf %350, %349 : vector<2x128xf32>
    %352 = math.tanh %351 : vector<2x128xf32>
    %cst_128 = arith.constant 1.000000e+00 : f32
    %353 = vector.broadcast %cst_128 : f32 to vector<2x128xf32>
    %354 = arith.addf %352, %353 : vector<2x128xf32>
    %cst_129 = arith.constant 5.000000e-01 : f32
    %355 = vector.broadcast %cst_129 : f32 to vector<2x128xf32>
    %356 = arith.mulf %355, %354 : vector<2x128xf32>
    %357 = vector.extract_strided_slice %340 {offsets = [0, 256], sizes = [2, 128], strides = [1, 1]} : vector<2x512xf32> to vector<2x128xf32>
    %358 = math.tanh %357 : vector<2x128xf32>
    %359 = vector.extract_strided_slice %340 {offsets = [0, 384], sizes = [2, 128], strides = [1, 1]} : vector<2x512xf32> to vector<2x128xf32>
    %cst_130 = arith.constant 5.000000e-01 : f32
    %360 = vector.broadcast %cst_130 : f32 to vector<2x128xf32>
    %361 = arith.mulf %360, %359 : vector<2x128xf32>
    %362 = math.tanh %361 : vector<2x128xf32>
    %cst_131 = arith.constant 1.000000e+00 : f32
    %363 = vector.broadcast %cst_131 : f32 to vector<2x128xf32>
    %364 = arith.addf %362, %363 : vector<2x128xf32>
    %cst_132 = arith.constant 5.000000e-01 : f32
    %365 = vector.broadcast %cst_132 : f32 to vector<2x128xf32>
    %366 = arith.mulf %365, %364 : vector<2x128xf32>
    %367 = arith.mulf %356, %288 : vector<2x128xf32>
    %368 = arith.mulf %348, %358 : vector<2x128xf32>
    %369 = arith.addf %367, %368 : vector<2x128xf32>
    %370 = math.tanh %369 : vector<2x128xf32>
    %371 = arith.mulf %366, %370 : vector<2x128xf32>
    %372 = arith.truncf %371 : vector<2x128xf32> to vector<2x128xbf16>
    %c0_133 = arith.constant 0 : index
    %c0_134 = arith.constant 0 : index
    %373 = vector.load %arg4[%c0_133, %c0_134] : memref<128x512xbf16, #tpu.memory_space<vmem>>, vector<128x512xbf16>
    %cst_135 = arith.constant dense<0.000000e+00> : vector<2x512xf32>
    %374 = tpu.matmul %372, %373, %cst_135 {dimension_numbers = #tpu.dot_dimension_numbers<[1], [0], [0], [1], [0, 0, 1, 1], [], []>} : vector<2x128xbf16>, vector<128x512xbf16>, vector<2x512xf32> -> vector<2x512xf32>
    %375 = arith.addf %374, %330 : vector<2x512xf32>
    %376 = vector.extract_strided_slice %375 {offsets = [0, 0], sizes = [2, 128], strides = [1, 1]} : vector<2x512xf32> to vector<2x128xf32>
    %cst_136 = arith.constant 5.000000e-01 : f32
    %377 = vector.broadcast %cst_136 : f32 to vector<2x128xf32>
    %378 = arith.mulf %377, %376 : vector<2x128xf32>
    %379 = math.tanh %378 : vector<2x128xf32>
    %cst_137 = arith.constant 1.000000e+00 : f32
    %380 = vector.broadcast %cst_137 : f32 to vector<2x128xf32>
    %381 = arith.addf %379, %380 : vector<2x128xf32>
    %cst_138 = arith.constant 5.000000e-01 : f32
    %382 = vector.broadcast %cst_138 : f32 to vector<2x128xf32>
    %383 = arith.mulf %382, %381 : vector<2x128xf32>
    %384 = vector.extract_strided_slice %375 {offsets = [0, 128], sizes = [2, 128], strides = [1, 1]} : vector<2x512xf32> to vector<2x128xf32>
    %cst_139 = arith.constant 5.000000e-01 : f32
    %385 = vector.broadcast %cst_139 : f32 to vector<2x128xf32>
    %386 = arith.mulf %385, %384 : vector<2x128xf32>
    %387 = math.tanh %386 : vector<2x128xf32>
    %cst_140 = arith.constant 1.000000e+00 : f32
    %388 = vector.broadcast %cst_140 : f32 to vector<2x128xf32>
    %389 = arith.addf %387, %388 : vector<2x128xf32>
    %cst_141 = arith.constant 5.000000e-01 : f32
    %390 = vector.broadcast %cst_141 : f32 to vector<2x128xf32>
    %391 = arith.mulf %390, %389 : vector<2x128xf32>
    %392 = vector.extract_strided_slice %375 {offsets = [0, 256], sizes = [2, 128], strides = [1, 1]} : vector<2x512xf32> to vector<2x128xf32>
    %393 = math.tanh %392 : vector<2x128xf32>
    %394 = vector.extract_strided_slice %375 {offsets = [0, 384], sizes = [2, 128], strides = [1, 1]} : vector<2x512xf32> to vector<2x128xf32>
    %cst_142 = arith.constant 5.000000e-01 : f32
    %395 = vector.broadcast %cst_142 : f32 to vector<2x128xf32>
    %396 = arith.mulf %395, %394 : vector<2x128xf32>
    %397 = math.tanh %396 : vector<2x128xf32>
    %cst_143 = arith.constant 1.000000e+00 : f32
    %398 = vector.broadcast %cst_143 : f32 to vector<2x128xf32>
    %399 = arith.addf %397, %398 : vector<2x128xf32>
    %cst_144 = arith.constant 5.000000e-01 : f32
    %400 = vector.broadcast %cst_144 : f32 to vector<2x128xf32>
    %401 = arith.mulf %400, %399 : vector<2x128xf32>
    %402 = arith.mulf %391, %323 : vector<2x128xf32>
    %403 = arith.mulf %383, %393 : vector<2x128xf32>
    %404 = arith.addf %402, %403 : vector<2x128xf32>
    %405 = math.tanh %404 : vector<2x128xf32>
    %406 = arith.mulf %401, %405 : vector<2x128xf32>
    %407 = arith.truncf %406 : vector<2x128xf32> to vector<2x128xbf16>
    %c0_145 = arith.constant 0 : index
    %c0_146 = arith.constant 0 : index
    %408 = vector.load %arg5[%c0_145, %c0_146] : memref<128x512xbf16, #tpu.memory_space<vmem>>, vector<128x512xbf16>
    %cst_147 = arith.constant dense<0.000000e+00> : vector<2x512xf32>
    %409 = tpu.matmul %407, %408, %cst_147 {dimension_numbers = #tpu.dot_dimension_numbers<[1], [0], [0], [1], [0, 0, 1, 1], [], []>} : vector<2x128xbf16>, vector<128x512xbf16>, vector<2x512xf32> -> vector<2x512xf32>
    %410 = vector.broadcast %2 : vector<1x512xf32> to vector<2x512xf32>
    %411 = arith.addf %409, %410 : vector<2x512xf32>
    %c0_148 = arith.constant 0 : index
    %c5 = arith.constant 5 : index
    %412 = vector.load %arg0[%c0_148, %c5] : memref<2x8xf32, #tpu.memory_space<vmem>>, vector<2x1xf32>
    %413 = vector.broadcast %412 : vector<2x1xf32> to vector<2x512xf32>
    %414 = vector.broadcast %0 : vector<1x512xf32> to vector<2x512xf32>
    %415 = arith.mulf %413, %414 : vector<2x512xf32>
    %416 = vector.broadcast %1 : vector<1x512xf32> to vector<2x512xf32>
    %417 = arith.addf %415, %416 : vector<2x512xf32>
    %418 = arith.truncf %371 : vector<2x128xf32> to vector<2x128xbf16>
    %c0_149 = arith.constant 0 : index
    %c0_150 = arith.constant 0 : index
    %419 = vector.load %arg3[%c0_149, %c0_150] : memref<128x512xbf16, #tpu.memory_space<vmem>>, vector<128x512xbf16>
    %cst_151 = arith.constant dense<0.000000e+00> : vector<2x512xf32>
    %420 = tpu.matmul %418, %419, %cst_151 {dimension_numbers = #tpu.dot_dimension_numbers<[1], [0], [0], [1], [0, 0, 1, 1], [], []>} : vector<2x128xbf16>, vector<128x512xbf16>, vector<2x512xf32> -> vector<2x512xf32>
    %421 = arith.addf %417, %420 : vector<2x512xf32>
    %422 = vector.extract_strided_slice %421 {offsets = [0, 0], sizes = [2, 128], strides = [1, 1]} : vector<2x512xf32> to vector<2x128xf32>
    %cst_152 = arith.constant 5.000000e-01 : f32
    %423 = vector.broadcast %cst_152 : f32 to vector<2x128xf32>
    %424 = arith.mulf %423, %422 : vector<2x128xf32>
    %425 = math.tanh %424 : vector<2x128xf32>
    %cst_153 = arith.constant 1.000000e+00 : f32
    %426 = vector.broadcast %cst_153 : f32 to vector<2x128xf32>
    %427 = arith.addf %425, %426 : vector<2x128xf32>
    %cst_154 = arith.constant 5.000000e-01 : f32
    %428 = vector.broadcast %cst_154 : f32 to vector<2x128xf32>
    %429 = arith.mulf %428, %427 : vector<2x128xf32>
    %430 = vector.extract_strided_slice %421 {offsets = [0, 128], sizes = [2, 128], strides = [1, 1]} : vector<2x512xf32> to vector<2x128xf32>
    %cst_155 = arith.constant 5.000000e-01 : f32
    %431 = vector.broadcast %cst_155 : f32 to vector<2x128xf32>
    %432 = arith.mulf %431, %430 : vector<2x128xf32>
    %433 = math.tanh %432 : vector<2x128xf32>
    %cst_156 = arith.constant 1.000000e+00 : f32
    %434 = vector.broadcast %cst_156 : f32 to vector<2x128xf32>
    %435 = arith.addf %433, %434 : vector<2x128xf32>
    %cst_157 = arith.constant 5.000000e-01 : f32
    %436 = vector.broadcast %cst_157 : f32 to vector<2x128xf32>
    %437 = arith.mulf %436, %435 : vector<2x128xf32>
    %438 = vector.extract_strided_slice %421 {offsets = [0, 256], sizes = [2, 128], strides = [1, 1]} : vector<2x512xf32> to vector<2x128xf32>
    %439 = math.tanh %438 : vector<2x128xf32>
    %440 = vector.extract_strided_slice %421 {offsets = [0, 384], sizes = [2, 128], strides = [1, 1]} : vector<2x512xf32> to vector<2x128xf32>
    %cst_158 = arith.constant 5.000000e-01 : f32
    %441 = vector.broadcast %cst_158 : f32 to vector<2x128xf32>
    %442 = arith.mulf %441, %440 : vector<2x128xf32>
    %443 = math.tanh %442 : vector<2x128xf32>
    %cst_159 = arith.constant 1.000000e+00 : f32
    %444 = vector.broadcast %cst_159 : f32 to vector<2x128xf32>
    %445 = arith.addf %443, %444 : vector<2x128xf32>
    %cst_160 = arith.constant 5.000000e-01 : f32
    %446 = vector.broadcast %cst_160 : f32 to vector<2x128xf32>
    %447 = arith.mulf %446, %445 : vector<2x128xf32>
    %448 = arith.mulf %437, %369 : vector<2x128xf32>
    %449 = arith.mulf %429, %439 : vector<2x128xf32>
    %450 = arith.addf %448, %449 : vector<2x128xf32>
    %451 = math.tanh %450 : vector<2x128xf32>
    %452 = arith.mulf %447, %451 : vector<2x128xf32>
    %453 = arith.truncf %452 : vector<2x128xf32> to vector<2x128xbf16>
    %c0_161 = arith.constant 0 : index
    %c0_162 = arith.constant 0 : index
    %454 = vector.load %arg4[%c0_161, %c0_162] : memref<128x512xbf16, #tpu.memory_space<vmem>>, vector<128x512xbf16>
    %cst_163 = arith.constant dense<0.000000e+00> : vector<2x512xf32>
    %455 = tpu.matmul %453, %454, %cst_163 {dimension_numbers = #tpu.dot_dimension_numbers<[1], [0], [0], [1], [0, 0, 1, 1], [], []>} : vector<2x128xbf16>, vector<128x512xbf16>, vector<2x512xf32> -> vector<2x512xf32>
    %456 = arith.addf %455, %411 : vector<2x512xf32>
    %457 = vector.extract_strided_slice %456 {offsets = [0, 0], sizes = [2, 128], strides = [1, 1]} : vector<2x512xf32> to vector<2x128xf32>
    %cst_164 = arith.constant 5.000000e-01 : f32
    %458 = vector.broadcast %cst_164 : f32 to vector<2x128xf32>
    %459 = arith.mulf %458, %457 : vector<2x128xf32>
    %460 = math.tanh %459 : vector<2x128xf32>
    %cst_165 = arith.constant 1.000000e+00 : f32
    %461 = vector.broadcast %cst_165 : f32 to vector<2x128xf32>
    %462 = arith.addf %460, %461 : vector<2x128xf32>
    %cst_166 = arith.constant 5.000000e-01 : f32
    %463 = vector.broadcast %cst_166 : f32 to vector<2x128xf32>
    %464 = arith.mulf %463, %462 : vector<2x128xf32>
    %465 = vector.extract_strided_slice %456 {offsets = [0, 128], sizes = [2, 128], strides = [1, 1]} : vector<2x512xf32> to vector<2x128xf32>
    %cst_167 = arith.constant 5.000000e-01 : f32
    %466 = vector.broadcast %cst_167 : f32 to vector<2x128xf32>
    %467 = arith.mulf %466, %465 : vector<2x128xf32>
    %468 = math.tanh %467 : vector<2x128xf32>
    %cst_168 = arith.constant 1.000000e+00 : f32
    %469 = vector.broadcast %cst_168 : f32 to vector<2x128xf32>
    %470 = arith.addf %468, %469 : vector<2x128xf32>
    %cst_169 = arith.constant 5.000000e-01 : f32
    %471 = vector.broadcast %cst_169 : f32 to vector<2x128xf32>
    %472 = arith.mulf %471, %470 : vector<2x128xf32>
    %473 = vector.extract_strided_slice %456 {offsets = [0, 256], sizes = [2, 128], strides = [1, 1]} : vector<2x512xf32> to vector<2x128xf32>
    %474 = math.tanh %473 : vector<2x128xf32>
    %475 = vector.extract_strided_slice %456 {offsets = [0, 384], sizes = [2, 128], strides = [1, 1]} : vector<2x512xf32> to vector<2x128xf32>
    %cst_170 = arith.constant 5.000000e-01 : f32
    %476 = vector.broadcast %cst_170 : f32 to vector<2x128xf32>
    %477 = arith.mulf %476, %475 : vector<2x128xf32>
    %478 = math.tanh %477 : vector<2x128xf32>
    %cst_171 = arith.constant 1.000000e+00 : f32
    %479 = vector.broadcast %cst_171 : f32 to vector<2x128xf32>
    %480 = arith.addf %478, %479 : vector<2x128xf32>
    %cst_172 = arith.constant 5.000000e-01 : f32
    %481 = vector.broadcast %cst_172 : f32 to vector<2x128xf32>
    %482 = arith.mulf %481, %480 : vector<2x128xf32>
    %483 = arith.mulf %472, %404 : vector<2x128xf32>
    %484 = arith.mulf %464, %474 : vector<2x128xf32>
    %485 = arith.addf %483, %484 : vector<2x128xf32>
    %486 = math.tanh %485 : vector<2x128xf32>
    %487 = arith.mulf %482, %486 : vector<2x128xf32>
    %488 = arith.truncf %487 : vector<2x128xf32> to vector<2x128xbf16>
    %c0_173 = arith.constant 0 : index
    %c0_174 = arith.constant 0 : index
    %489 = vector.load %arg5[%c0_173, %c0_174] : memref<128x512xbf16, #tpu.memory_space<vmem>>, vector<128x512xbf16>
    %cst_175 = arith.constant dense<0.000000e+00> : vector<2x512xf32>
    %490 = tpu.matmul %488, %489, %cst_175 {dimension_numbers = #tpu.dot_dimension_numbers<[1], [0], [0], [1], [0, 0, 1, 1], [], []>} : vector<2x128xbf16>, vector<128x512xbf16>, vector<2x512xf32> -> vector<2x512xf32>
    %491 = vector.broadcast %2 : vector<1x512xf32> to vector<2x512xf32>
    %492 = arith.addf %490, %491 : vector<2x512xf32>
    %c0_176 = arith.constant 0 : index
    %c6 = arith.constant 6 : index
    %493 = vector.load %arg0[%c0_176, %c6] : memref<2x8xf32, #tpu.memory_space<vmem>>, vector<2x1xf32>
    %494 = vector.broadcast %493 : vector<2x1xf32> to vector<2x512xf32>
    %495 = vector.broadcast %0 : vector<1x512xf32> to vector<2x512xf32>
    %496 = arith.mulf %494, %495 : vector<2x512xf32>
    %497 = vector.broadcast %1 : vector<1x512xf32> to vector<2x512xf32>
    %498 = arith.addf %496, %497 : vector<2x512xf32>
    %499 = arith.truncf %452 : vector<2x128xf32> to vector<2x128xbf16>
    %c0_177 = arith.constant 0 : index
    %c0_178 = arith.constant 0 : index
    %500 = vector.load %arg3[%c0_177, %c0_178] : memref<128x512xbf16, #tpu.memory_space<vmem>>, vector<128x512xbf16>
    %cst_179 = arith.constant dense<0.000000e+00> : vector<2x512xf32>
    %501 = tpu.matmul %499, %500, %cst_179 {dimension_numbers = #tpu.dot_dimension_numbers<[1], [0], [0], [1], [0, 0, 1, 1], [], []>} : vector<2x128xbf16>, vector<128x512xbf16>, vector<2x512xf32> -> vector<2x512xf32>
    %502 = arith.addf %498, %501 : vector<2x512xf32>
    %503 = vector.extract_strided_slice %502 {offsets = [0, 0], sizes = [2, 128], strides = [1, 1]} : vector<2x512xf32> to vector<2x128xf32>
    %cst_180 = arith.constant 5.000000e-01 : f32
    %504 = vector.broadcast %cst_180 : f32 to vector<2x128xf32>
    %505 = arith.mulf %504, %503 : vector<2x128xf32>
    %506 = math.tanh %505 : vector<2x128xf32>
    %cst_181 = arith.constant 1.000000e+00 : f32
    %507 = vector.broadcast %cst_181 : f32 to vector<2x128xf32>
    %508 = arith.addf %506, %507 : vector<2x128xf32>
    %cst_182 = arith.constant 5.000000e-01 : f32
    %509 = vector.broadcast %cst_182 : f32 to vector<2x128xf32>
    %510 = arith.mulf %509, %508 : vector<2x128xf32>
    %511 = vector.extract_strided_slice %502 {offsets = [0, 128], sizes = [2, 128], strides = [1, 1]} : vector<2x512xf32> to vector<2x128xf32>
    %cst_183 = arith.constant 5.000000e-01 : f32
    %512 = vector.broadcast %cst_183 : f32 to vector<2x128xf32>
    %513 = arith.mulf %512, %511 : vector<2x128xf32>
    %514 = math.tanh %513 : vector<2x128xf32>
    %cst_184 = arith.constant 1.000000e+00 : f32
    %515 = vector.broadcast %cst_184 : f32 to vector<2x128xf32>
    %516 = arith.addf %514, %515 : vector<2x128xf32>
    %cst_185 = arith.constant 5.000000e-01 : f32
    %517 = vector.broadcast %cst_185 : f32 to vector<2x128xf32>
    %518 = arith.mulf %517, %516 : vector<2x128xf32>
    %519 = vector.extract_strided_slice %502 {offsets = [0, 256], sizes = [2, 128], strides = [1, 1]} : vector<2x512xf32> to vector<2x128xf32>
    %520 = math.tanh %519 : vector<2x128xf32>
    %521 = vector.extract_strided_slice %502 {offsets = [0, 384], sizes = [2, 128], strides = [1, 1]} : vector<2x512xf32> to vector<2x128xf32>
    %cst_186 = arith.constant 5.000000e-01 : f32
    %522 = vector.broadcast %cst_186 : f32 to vector<2x128xf32>
    %523 = arith.mulf %522, %521 : vector<2x128xf32>
    %524 = math.tanh %523 : vector<2x128xf32>
    %cst_187 = arith.constant 1.000000e+00 : f32
    %525 = vector.broadcast %cst_187 : f32 to vector<2x128xf32>
    %526 = arith.addf %524, %525 : vector<2x128xf32>
    %cst_188 = arith.constant 5.000000e-01 : f32
    %527 = vector.broadcast %cst_188 : f32 to vector<2x128xf32>
    %528 = arith.mulf %527, %526 : vector<2x128xf32>
    %529 = arith.mulf %518, %450 : vector<2x128xf32>
    %530 = arith.mulf %510, %520 : vector<2x128xf32>
    %531 = arith.addf %529, %530 : vector<2x128xf32>
    %532 = math.tanh %531 : vector<2x128xf32>
    %533 = arith.mulf %528, %532 : vector<2x128xf32>
    %534 = arith.truncf %533 : vector<2x128xf32> to vector<2x128xbf16>
    %c0_189 = arith.constant 0 : index
    %c0_190 = arith.constant 0 : index
    %535 = vector.load %arg4[%c0_189, %c0_190] : memref<128x512xbf16, #tpu.memory_space<vmem>>, vector<128x512xbf16>
    %cst_191 = arith.constant dense<0.000000e+00> : vector<2x512xf32>
    %536 = tpu.matmul %534, %535, %cst_191 {dimension_numbers = #tpu.dot_dimension_numbers<[1], [0], [0], [1], [0, 0, 1, 1], [], []>} : vector<2x128xbf16>, vector<128x512xbf16>, vector<2x512xf32> -> vector<2x512xf32>
    %537 = arith.addf %536, %492 : vector<2x512xf32>
    %538 = vector.extract_strided_slice %537 {offsets = [0, 0], sizes = [2, 128], strides = [1, 1]} : vector<2x512xf32> to vector<2x128xf32>
    %cst_192 = arith.constant 5.000000e-01 : f32
    %539 = vector.broadcast %cst_192 : f32 to vector<2x128xf32>
    %540 = arith.mulf %539, %538 : vector<2x128xf32>
    %541 = math.tanh %540 : vector<2x128xf32>
    %cst_193 = arith.constant 1.000000e+00 : f32
    %542 = vector.broadcast %cst_193 : f32 to vector<2x128xf32>
    %543 = arith.addf %541, %542 : vector<2x128xf32>
    %cst_194 = arith.constant 5.000000e-01 : f32
    %544 = vector.broadcast %cst_194 : f32 to vector<2x128xf32>
    %545 = arith.mulf %544, %543 : vector<2x128xf32>
    %546 = vector.extract_strided_slice %537 {offsets = [0, 128], sizes = [2, 128], strides = [1, 1]} : vector<2x512xf32> to vector<2x128xf32>
    %cst_195 = arith.constant 5.000000e-01 : f32
    %547 = vector.broadcast %cst_195 : f32 to vector<2x128xf32>
    %548 = arith.mulf %547, %546 : vector<2x128xf32>
    %549 = math.tanh %548 : vector<2x128xf32>
    %cst_196 = arith.constant 1.000000e+00 : f32
    %550 = vector.broadcast %cst_196 : f32 to vector<2x128xf32>
    %551 = arith.addf %549, %550 : vector<2x128xf32>
    %cst_197 = arith.constant 5.000000e-01 : f32
    %552 = vector.broadcast %cst_197 : f32 to vector<2x128xf32>
    %553 = arith.mulf %552, %551 : vector<2x128xf32>
    %554 = vector.extract_strided_slice %537 {offsets = [0, 256], sizes = [2, 128], strides = [1, 1]} : vector<2x512xf32> to vector<2x128xf32>
    %555 = math.tanh %554 : vector<2x128xf32>
    %556 = vector.extract_strided_slice %537 {offsets = [0, 384], sizes = [2, 128], strides = [1, 1]} : vector<2x512xf32> to vector<2x128xf32>
    %cst_198 = arith.constant 5.000000e-01 : f32
    %557 = vector.broadcast %cst_198 : f32 to vector<2x128xf32>
    %558 = arith.mulf %557, %556 : vector<2x128xf32>
    %559 = math.tanh %558 : vector<2x128xf32>
    %cst_199 = arith.constant 1.000000e+00 : f32
    %560 = vector.broadcast %cst_199 : f32 to vector<2x128xf32>
    %561 = arith.addf %559, %560 : vector<2x128xf32>
    %cst_200 = arith.constant 5.000000e-01 : f32
    %562 = vector.broadcast %cst_200 : f32 to vector<2x128xf32>
    %563 = arith.mulf %562, %561 : vector<2x128xf32>
    %564 = arith.mulf %553, %485 : vector<2x128xf32>
    %565 = arith.mulf %545, %555 : vector<2x128xf32>
    %566 = arith.addf %564, %565 : vector<2x128xf32>
    %567 = math.tanh %566 : vector<2x128xf32>
    %568 = arith.mulf %563, %567 : vector<2x128xf32>
    %569 = arith.truncf %568 : vector<2x128xf32> to vector<2x128xbf16>
    %c0_201 = arith.constant 0 : index
    %c0_202 = arith.constant 0 : index
    %570 = vector.load %arg5[%c0_201, %c0_202] : memref<128x512xbf16, #tpu.memory_space<vmem>>, vector<128x512xbf16>
    %cst_203 = arith.constant dense<0.000000e+00> : vector<2x512xf32>
    %571 = tpu.matmul %569, %570, %cst_203 {dimension_numbers = #tpu.dot_dimension_numbers<[1], [0], [0], [1], [0, 0, 1, 1], [], []>} : vector<2x128xbf16>, vector<128x512xbf16>, vector<2x512xf32> -> vector<2x512xf32>
    %572 = vector.broadcast %2 : vector<1x512xf32> to vector<2x512xf32>
    %573 = arith.addf %571, %572 : vector<2x512xf32>
    %c0_204 = arith.constant 0 : index
    %c7 = arith.constant 7 : index
    %574 = vector.load %arg0[%c0_204, %c7] : memref<2x8xf32, #tpu.memory_space<vmem>>, vector<2x1xf32>
    %575 = vector.broadcast %574 : vector<2x1xf32> to vector<2x512xf32>
    %576 = vector.broadcast %0 : vector<1x512xf32> to vector<2x512xf32>
    %577 = arith.mulf %575, %576 : vector<2x512xf32>
    %578 = vector.broadcast %1 : vector<1x512xf32> to vector<2x512xf32>
    %579 = arith.addf %577, %578 : vector<2x512xf32>
    %580 = arith.truncf %533 : vector<2x128xf32> to vector<2x128xbf16>
    %c0_205 = arith.constant 0 : index
    %c0_206 = arith.constant 0 : index
    %581 = vector.load %arg3[%c0_205, %c0_206] : memref<128x512xbf16, #tpu.memory_space<vmem>>, vector<128x512xbf16>
    %cst_207 = arith.constant dense<0.000000e+00> : vector<2x512xf32>
    %582 = tpu.matmul %580, %581, %cst_207 {dimension_numbers = #tpu.dot_dimension_numbers<[1], [0], [0], [1], [0, 0, 1, 1], [], []>} : vector<2x128xbf16>, vector<128x512xbf16>, vector<2x512xf32> -> vector<2x512xf32>
    %583 = arith.addf %579, %582 : vector<2x512xf32>
    %584 = vector.extract_strided_slice %583 {offsets = [0, 0], sizes = [2, 128], strides = [1, 1]} : vector<2x512xf32> to vector<2x128xf32>
    %cst_208 = arith.constant 5.000000e-01 : f32
    %585 = vector.broadcast %cst_208 : f32 to vector<2x128xf32>
    %586 = arith.mulf %585, %584 : vector<2x128xf32>
    %587 = math.tanh %586 : vector<2x128xf32>
    %cst_209 = arith.constant 1.000000e+00 : f32
    %588 = vector.broadcast %cst_209 : f32 to vector<2x128xf32>
    %589 = arith.addf %587, %588 : vector<2x128xf32>
    %cst_210 = arith.constant 5.000000e-01 : f32
    %590 = vector.broadcast %cst_210 : f32 to vector<2x128xf32>
    %591 = arith.mulf %590, %589 : vector<2x128xf32>
    %592 = vector.extract_strided_slice %583 {offsets = [0, 128], sizes = [2, 128], strides = [1, 1]} : vector<2x512xf32> to vector<2x128xf32>
    %cst_211 = arith.constant 5.000000e-01 : f32
    %593 = vector.broadcast %cst_211 : f32 to vector<2x128xf32>
    %594 = arith.mulf %593, %592 : vector<2x128xf32>
    %595 = math.tanh %594 : vector<2x128xf32>
    %cst_212 = arith.constant 1.000000e+00 : f32
    %596 = vector.broadcast %cst_212 : f32 to vector<2x128xf32>
    %597 = arith.addf %595, %596 : vector<2x128xf32>
    %cst_213 = arith.constant 5.000000e-01 : f32
    %598 = vector.broadcast %cst_213 : f32 to vector<2x128xf32>
    %599 = arith.mulf %598, %597 : vector<2x128xf32>
    %600 = vector.extract_strided_slice %583 {offsets = [0, 256], sizes = [2, 128], strides = [1, 1]} : vector<2x512xf32> to vector<2x128xf32>
    %601 = math.tanh %600 : vector<2x128xf32>
    %602 = vector.extract_strided_slice %583 {offsets = [0, 384], sizes = [2, 128], strides = [1, 1]} : vector<2x512xf32> to vector<2x128xf32>
    %cst_214 = arith.constant 5.000000e-01 : f32
    %603 = vector.broadcast %cst_214 : f32 to vector<2x128xf32>
    %604 = arith.mulf %603, %602 : vector<2x128xf32>
    %605 = math.tanh %604 : vector<2x128xf32>
    %cst_215 = arith.constant 1.000000e+00 : f32
    %606 = vector.broadcast %cst_215 : f32 to vector<2x128xf32>
    %607 = arith.addf %605, %606 : vector<2x128xf32>
    %cst_216 = arith.constant 5.000000e-01 : f32
    %608 = vector.broadcast %cst_216 : f32 to vector<2x128xf32>
    %609 = arith.mulf %608, %607 : vector<2x128xf32>
    %610 = arith.mulf %599, %531 : vector<2x128xf32>
    %611 = arith.mulf %591, %601 : vector<2x128xf32>
    %612 = arith.addf %610, %611 : vector<2x128xf32>
    %613 = math.tanh %612 : vector<2x128xf32>
    %614 = arith.mulf %609, %613 : vector<2x128xf32>
    %615 = arith.truncf %614 : vector<2x128xf32> to vector<2x128xbf16>
    %c0_217 = arith.constant 0 : index
    %c0_218 = arith.constant 0 : index
    %616 = vector.load %arg4[%c0_217, %c0_218] : memref<128x512xbf16, #tpu.memory_space<vmem>>, vector<128x512xbf16>
    %cst_219 = arith.constant dense<0.000000e+00> : vector<2x512xf32>
    %617 = tpu.matmul %615, %616, %cst_219 {dimension_numbers = #tpu.dot_dimension_numbers<[1], [0], [0], [1], [0, 0, 1, 1], [], []>} : vector<2x128xbf16>, vector<128x512xbf16>, vector<2x512xf32> -> vector<2x512xf32>
    %618 = arith.addf %617, %573 : vector<2x512xf32>
    %619 = vector.extract_strided_slice %618 {offsets = [0, 0], sizes = [2, 128], strides = [1, 1]} : vector<2x512xf32> to vector<2x128xf32>
    %cst_220 = arith.constant 5.000000e-01 : f32
    %620 = vector.broadcast %cst_220 : f32 to vector<2x128xf32>
    %621 = arith.mulf %620, %619 : vector<2x128xf32>
    %622 = math.tanh %621 : vector<2x128xf32>
    %cst_221 = arith.constant 1.000000e+00 : f32
    %623 = vector.broadcast %cst_221 : f32 to vector<2x128xf32>
    %624 = arith.addf %622, %623 : vector<2x128xf32>
    %cst_222 = arith.constant 5.000000e-01 : f32
    %625 = vector.broadcast %cst_222 : f32 to vector<2x128xf32>
    %626 = arith.mulf %625, %624 : vector<2x128xf32>
    %627 = vector.extract_strided_slice %618 {offsets = [0, 128], sizes = [2, 128], strides = [1, 1]} : vector<2x512xf32> to vector<2x128xf32>
    %cst_223 = arith.constant 5.000000e-01 : f32
    %628 = vector.broadcast %cst_223 : f32 to vector<2x128xf32>
    %629 = arith.mulf %628, %627 : vector<2x128xf32>
    %630 = math.tanh %629 : vector<2x128xf32>
    %cst_224 = arith.constant 1.000000e+00 : f32
    %631 = vector.broadcast %cst_224 : f32 to vector<2x128xf32>
    %632 = arith.addf %630, %631 : vector<2x128xf32>
    %cst_225 = arith.constant 5.000000e-01 : f32
    %633 = vector.broadcast %cst_225 : f32 to vector<2x128xf32>
    %634 = arith.mulf %633, %632 : vector<2x128xf32>
    %635 = vector.extract_strided_slice %618 {offsets = [0, 256], sizes = [2, 128], strides = [1, 1]} : vector<2x512xf32> to vector<2x128xf32>
    %636 = math.tanh %635 : vector<2x128xf32>
    %637 = vector.extract_strided_slice %618 {offsets = [0, 384], sizes = [2, 128], strides = [1, 1]} : vector<2x512xf32> to vector<2x128xf32>
    %cst_226 = arith.constant 5.000000e-01 : f32
    %638 = vector.broadcast %cst_226 : f32 to vector<2x128xf32>
    %639 = arith.mulf %638, %637 : vector<2x128xf32>
    %640 = math.tanh %639 : vector<2x128xf32>
    %cst_227 = arith.constant 1.000000e+00 : f32
    %641 = vector.broadcast %cst_227 : f32 to vector<2x128xf32>
    %642 = arith.addf %640, %641 : vector<2x128xf32>
    %cst_228 = arith.constant 5.000000e-01 : f32
    %643 = vector.broadcast %cst_228 : f32 to vector<2x128xf32>
    %644 = arith.mulf %643, %642 : vector<2x128xf32>
    %645 = arith.mulf %634, %566 : vector<2x128xf32>
    %646 = arith.mulf %626, %636 : vector<2x128xf32>
    %647 = arith.addf %645, %646 : vector<2x128xf32>
    %648 = math.tanh %647 : vector<2x128xf32>
    %649 = arith.mulf %644, %648 : vector<2x128xf32>
    %c0_229 = arith.constant 0 : index
    %c0_230 = arith.constant 0 : index
    %650 = vector.load %arg7[%c0_229, %c0_230] : memref<1x128xf32, #tpu.memory_space<vmem>>, vector<1x128xf32>
    %651 = vector.broadcast %650 : vector<1x128xf32> to vector<2x128xf32>
    %652 = arith.mulf %649, %651 : vector<2x128xf32>
    %cst_231 = arith.constant dense<0.000000e+00> : vector<2xf32>
    %653 = vector.multi_reduction <add>, %652, %cst_231 [1] : vector<2x128xf32> to vector<2xf32>
    %654 = vector.shape_cast %653 : vector<2xf32> to vector<2x1xf32>
    %c0_232 = arith.constant 0 : index
    %c0_233 = arith.constant 0 : index
    %655 = vector.load %arg8[%c0_232, %c0_233] : memref<1x1xf32, #tpu.memory_space<vmem>>, vector<1x1xf32>
    %656 = vector.broadcast %655 : vector<1x1xf32> to vector<2x1xf32>
    %657 = arith.addf %654, %656 : vector<2x1xf32>
    %c0_234 = arith.constant 0 : index
    %c0_235 = arith.constant 0 : index
    %658 = vector.load %arg9[%c0_234, %c0_235] : memref<2x1xf32, #tpu.memory_space<vmem>>, vector<2x1xf32>
    tpu.vector_store %arg9[%c0_234, %c0_235], %657 {strides = array<i32>} : memref<2x1xf32, #tpu.memory_space<vmem>>, vector<2x1xf32>,
    return
  }
}

</mosaic_0001>

<bundles_post_ra>
// kernel: lstm_model_forward.1
= control target key start
LH: loop header
LB: loop body
LE: loop exit
PB: predicated region body
PF: predicated region fallthrough
CT: control target
= control target key end

     0   :  { %s5517_s0 = inlined_call_operand.vmem [shape: f32[2,8], index: 0, kind: input, shape index: {}]   ;;  %s5518_s1 = inlined_call_operand.vmem [shape: f32[1,512], index: 1, kind: input, shape index: {}]   ;;  %s5519_s2 = inlined_call_operand.hbm [shape: f32[1,512], index: 2, kind: input, shape index: {}]   ;;  %s5520_s3 = inlined_call_operand.hbm [shape: bf16[128,512], index: 3, kind: input, shape index: {}]   ;;  %s5521_s4 = inlined_call_operand.hbm [shape: bf16[128,512], index: 4, kind: input, shape index: {}]   ;;  %s5522_s5 = inlined_call_operand.hbm [shape: bf16[128,512], index: 5, kind: input, shape index: {}]   ;;  %s5523_s6 = inlined_call_operand.hbm [shape: f32[1,512], index: 6, kind: input, shape index: {}]   ;;  %s5524_s7 = inlined_call_operand.vmem [shape: f32[1,128], index: 7, kind: input, shape index: {}]   ;;  %s5525_s8 = inlined_call_operand.<no memory space> [shape: f32[1,1], index: 8, kind: input, shape index: {}]   ;;  %s5526_s9 = inlined_call_operand.vmem [shape: f32[2,1], index: 9, kind: output, shape index: {}]  }
   0x1   :  { %v14_v0 = vstv %s5525_s8 }
   0x2   :  { %15 = vst [vmem:[#allocation2] sm:$0x1] %v14_v0 }
   0x3   :  { %16 = vsyncpa [#allocation4], 0 }
   0x4   :  { %17 = vsyncpa [#allocation6], 0 }
   0x5   :  { %18 = vsyncpa [#allocation9], 0  ;;  %s3815_s11 = smov [#allocation5]  }
   0x6   :  { %s38_s12 = sshll.u32 %s3815_s11, 4  ;;  %s39_s12 = int_to_ptr.vmem [resolvable:$true] %s38_s12 }
   0x7   :  { %s3717_s13 = scalar_lea.vmem %s39_s12, 4096  ;;  %p3722_p1 = scmp.lt.s32.totalorder %s39_s12, %s39_s12 }
   0x8   :  { %p3718_p0 = scmp.ne.s32.totalorder %s39_s12, %s3717_s13  ;;  %p3723_p2 = scmp.lt.s32.totalorder %s3717_s13, %s3717_s13 }
   0xa   :  { %p3724_p3 = por %p3723_p2, %p3722_p1 }
   0xc   :  { %p3725_p4 = pnand %p3724_p3, %p3718_p0 }
   0xe   :  { %3728 = shalt.err (!%p3725_p4)
}
   0xf   :  { %s3816_s14 = smov 256   ;;  %s3817_s15 = smov 16  }
  0x10   :  { %44 = dma.hbm_to_vmem [thread:$0]  %s5520_s3, 4096, %s39_s12, [#allocation6], %s3816_s14, %s3816_s14, %s3817_s15  }
  0x11   :  { %s3818_s17 = smov [#allocation8]   ;;  %s3819_s19 = smov [#allocation3]  }
  0x12   :  { %s62_s18 = sshll.u32 %s3818_s17, 4  ;;  %s29_s20 = sshll.u32 %s3819_s19, 4  ;;  %s63_s18 = int_to_ptr.vmem [resolvable:$true] %s62_s18  ;;  %s30_s20 = int_to_ptr.vmem [resolvable:$true] %s29_s20 }
  0x13   :  { %s3737_s21 = scalar_lea.vmem %s63_s18, 4096  ;;  %p3742_p6 = scmp.lt.s32.totalorder %s63_s18, %s63_s18 }
  0x14   :  { %p3738_p5 = scmp.ne.s32.totalorder %s63_s18, %s3737_s21  ;;  %p3743_p7 = scmp.lt.s32.totalorder %s3737_s21, %s3737_s21 }
  0x16   :  { %p3744_p8 = por %p3743_p7, %p3742_p6 }
  0x18   :  { %p3745_p9 = pnand %p3744_p8, %p3738_p5 }
  0x1a   :  { %3748 = shalt.err (!%p3745_p9)
}
  0x1b   :  { %68 = dma.hbm_to_vmem [thread:$0]  %s5522_s5, 4096, %s63_s18, [#allocation9], %s3816_s14, %s3816_s14, %s3817_s15  }
  0x1c   :  { %s3757_s3 = scalar_lea.vmem %s30_s20, 64  ;;  %p3762_p11 = scmp.lt.s32.totalorder %s30_s20, %s30_s20 }
  0x1d   :  { %p3758_p10 = scmp.ne.s32.totalorder %s30_s20, %s3757_s3  ;;  %p3763_p12 = scmp.lt.s32.totalorder %s3757_s3, %s3757_s3 }
  0x1f   :  { %p3764_p13 = por %p3763_p12, %p3762_p11 }
  0x21   :  { %p3765_p0 = pnand %p3764_p13, %p3758_p10 }
  0x23   :  { %3768 = shalt.err (!%p3765_p0)
}
  0x24   :  { %32 = dma.hbm_to_vmem [thread:$0]  %s5519_s2, 64, %s30_s20, [#allocation4]  }
  0x25   :  { %s3820_s26 = smov [#allocation7]   ;;  %s3821_s28 = smov [#allocation10]  }
  0x26   :  { %s50_s27 = sshll.u32 %s3820_s26, 4  ;;  %s75_s29 = sshll.u32 %s3821_s28, 4  ;;  %s51_s27 = int_to_ptr.vmem [resolvable:$true] %s50_s27  ;;  %s76_s29 = int_to_ptr.vmem [resolvable:$true] %s75_s29 }
  0x27   :  { %s3777_s30 = scalar_lea.vmem %s51_s27, 4096  ;;  %p3782_p2 = scmp.lt.s32.totalorder %s51_s27, %s51_s27 }
  0x28   :  { %p3778_p1 = scmp.ne.s32.totalorder %s51_s27, %s3777_s30  ;;  %p3783_p3 = scmp.lt.s32.totalorder %s3777_s30, %s3777_s30 }
  0x2a   :  { %p3784_p4 = por %p3783_p3, %p3782_p2 }
  0x2c   :  { %p3785_p5 = pnand %p3784_p4, %p3778_p1 }
  0x2e   :  { %3788 = shalt.err (!%p3785_p5)
}
  0x2f   :  { %56 = dma.hbm_to_vmem [thread:$0]  %s5521_s4, 4096, %s51_s27, [#allocation6], %s3816_s14, %s3816_s14, %s3817_s15  }
  0x30   :  { %s3797_s2 = scalar_lea.vmem %s76_s29, 64  ;;  %p3802_p7 = scmp.lt.s32.totalorder %s76_s29, %s76_s29 }
  0x31   :  { %p3798_p6 = scmp.ne.s32.totalorder %s76_s29, %s3797_s2  ;;  %p3803_p8 = scmp.lt.s32.totalorder %s3797_s2, %s3797_s2 }
  0x33   :  { %p3804_p9 = por %p3803_p8, %p3802_p7 }
  0x35   :  { %p3805_p10 = pnand %p3804_p9, %p3798_p6 }
  0x37   :  { %3808 = shalt.err (!%p3805_p10)
}
  0x38   :  { %78 = dma.hbm_to_vmem [thread:$0]  %s5523_s6, 64, %s76_s29, [#allocation9]  }
  0x39   :  { %3809 = dma.done.wait [#allocation4], 64  }
  0x3a   :  { %3810 = vsyncadd [#allocation4], 4294967232 }
  0x3b   :  { %3811 = dma.done.wait [#allocation6], 8192  }
  0x3c   :  { %3812 = vsyncadd [#allocation6], 4294959104 }
  0x3d   :  { %3813 = dma.done.wait [#allocation9], 4160  }
  0x3e   :  { %3814 = vsyncadd [#allocation9], 4294963136  ;;  %v5527_v1 = vmov 0   ;;  %v3910_v2 = vld [vmem:[#allocation5 + $0xe4] ss:$16 sps:$4 sm:$0xff]   ;;  %vm3068_vm0 = vcmask 1041408  }
  0x3f   :  { %382 = vmatprep.mubr.bf16.mxu0 %v5527_v1  ;;  %423 = vmatprep.mubr.bf16.mxu1 %v5527_v1  ;;  %v3912_v3 = vld [vmem:[#allocation5 + $0xec] ss:$16 sps:$4 sm:$0xff]   ;;  %v3915_v4 = vld [vmem:[#allocation5 + $0xe0] ss:$16 sps:$4 sm:$0xff]   ;;  %v3917_v5 = vld [vmem:[#allocation5 + $0xe8] ss:$16 sps:$4 sm:$0xff]  }
  0x40   :  { %3202 = vset.pattern.permute.xlu0 %v5527_v1  ;;  %350 = vmatprep.subr.bf16.mxu0 %v3910_v2  ;;  %v3920_v6 = vld [vmem:[#allocation5 + $0xc4] ss:$16 sps:$4 sm:$0xff]   ;;  %v3924_v7 = vld [vmem:[#allocation5 + $0xcc] ss:$16 sps:$4 sm:$0xff]   ;;  %v3926_v8 = vld [vmem:[#allocation5 + $0xc0] ss:$16 sps:$4 sm:$0xff]  }
  0x41   :  { %391 = vmatprep.subr.bf16.mxu1 %v3912_v3  ;;  %351 = vmatpush1.bf16.msra.mxu0 %v3915_v4  ;;  %v3929_v9 = vld [vmem:[#allocation5 + $0xc8] ss:$16 sps:$4 sm:$0xff]   ;;  %v3932_v10 = vld [vmem:[#allocation5 + $0xa4] ss:$16 sps:$4 sm:$0xff]   ;;  %v3934_v11 = vld [vmem:[#allocation5 + $0xac] ss:$16 sps:$4 sm:$0xff]  }
  0x42   :  { %392 = vmatpush1.bf16.msra.mxu1 %v3917_v5  ;;  %352 = vmatprep.subr.bf16.mxu0 %v3920_v6  ;;  %v3936_v12 = vld [vmem:[#allocation5 + $0xa0] ss:$16 sps:$4 sm:$0xff]   ;;  %v3938_v13 = vld [vmem:[#allocation5 + $0xa8] ss:$16 sps:$4 sm:$0xff]   ;;  %v3942_v14 = vld [vmem:[#allocation5 + $0x84] ss:$16 sps:$4 sm:$0xff]  }
  0x43   :  { %393 = vmatprep.subr.bf16.mxu1 %v3924_v7  ;;  %v3946_v15 = vld [vmem:[#allocation5 + $0x8c] ss:$16 sps:$4 sm:$0xff]   ;;  %v3948_v16 = vld [vmem:[#allocation5 + $0x80] ss:$16 sps:$4 sm:$0xff]   ;;  %v3952_v17 = vld [vmem:[#allocation5 + $0x88] ss:$16 sps:$4 sm:$0xff]  }
  0x44   :  { %v3954_v18 = vld [vmem:[#allocation5 + $0x64] ss:$16 sps:$4 sm:$0xff]   ;;  %v3958_v19 = vld [vmem:[#allocation5 + $0x6c] ss:$16 sps:$4 sm:$0xff]   ;;  %v3960_v20 = vld [vmem:[#allocation5 + $0x60] ss:$16 sps:$4 sm:$0xff]  }
  0x45   :  { %353 = vmatpush1.bf16.msra.mxu0 %v3926_v8  ;;  %v3962_v21 = vld [vmem:[#allocation5 + $0x68] ss:$16 sps:$4 sm:$0xff]   ;;  %v3966_v22 = vld [vmem:[#allocation5 + $0x44] ss:$16 sps:$4 sm:$0xff]   ;;  %v3970_v23 = vld [vmem:[#allocation5 + $0x4c] ss:$16 sps:$4 sm:$0xff]  }
  0x46   :  { %394 = vmatpush1.bf16.msra.mxu1 %v3929_v9  ;;  %354 = vmatprep.subr.bf16.mxu0 %v3932_v10  ;;  %v3974_v24 = vld [vmem:[#allocation5 + $0x40] ss:$16 sps:$4 sm:$0xff]   ;;  %v3976_v25 = vld [vmem:[#allocation5 + $0x48] ss:$16 sps:$4 sm:$0xff]   ;;  %v3980_v26 = vld [vmem:[#allocation5 + $0x24] ss:$16 sps:$4 sm:$0xff]  }
  0x47   :  { %395 = vmatprep.subr.bf16.mxu1 %v3934_v11  ;;  %v3982_v27 = vld [vmem:[#allocation5 + $0x2c] ss:$16 sps:$4 sm:$0xff]   ;;  %v3989_v29 = vld [vmem:[#allocation5 + $0x20] ss:$16 sps:$4 sm:$0xff]   ;;  %v3991_v30 = vld [vmem:[#allocation5 + $0x28] ss:$16 sps:$4 sm:$0xff]  }
  0x48   :  { %v3987_v28 = vld [vmem:[%s5517_s0] sm:$0x3]  ;;  %v3994_v31 = vld [vmem:[#allocation5 + $0x4] ss:$16 sps:$4 sm:$0xff]   ;;  %v4002_v33 = vld [vmem:[#allocation5] ss:$16 sps:$4 sm:$0xff]  }
  0x49   :  { %355 = vmatpush1.bf16.msra.mxu0 %v3936_v12  ;;  %5862 = vst [vmem:[#allocation14_spill] sm:$0xff] %v3987_v28  ;;  %105 = vperm.xlu0 %3202, %v3987_v28   ;;  %v3996_v32 = vld [vmem:[#allocation5 + $0xc] ss:$16 sps:$4 sm:$0xff]   ;;  %v4004_v34 = vld [vmem:[#allocation5 + $0x8] ss:$16 sps:$4 sm:$0xff]   ;;  %vm3080_vm1 = vcmask 1024  }
  0x4a   :  { %396 = vmatpush1.bf16.msra.mxu1 %v3938_v13  ;;  %356 = vmatprep.subr.bf16.mxu0 %v3942_v14  ;;  %v4016_v35 = vld [vmem:[#allocation7 + $0xe4] ss:$16 sps:$4 sm:$0xff]   ;;  %v4018_v36 = vld [vmem:[#allocation7 + $0xec] ss:$16 sps:$4 sm:$0xff]   ;;  %v4020_v37 = vld [vmem:[#allocation7 + $0xe0] ss:$16 sps:$4 sm:$0xff]  }
  0x4b   :  { %397 = vmatprep.subr.bf16.mxu1 %v3946_v15  ;;  %v4022_v38 = vld [vmem:[#allocation7 + $0xe8] ss:$16 sps:$4 sm:$0xff]   ;;  %v4028_v39 = vld [vmem:[#allocation7 + $0xc4] ss:$16 sps:$4 sm:$0xff]   ;;  %v4030_v40 = vld [vmem:[#allocation7 + $0xcc] ss:$16 sps:$4 sm:$0xff]  }
  0x4c   :  { %5863 = vst [vmem:[#allocation15_spill] sm:$0xff] %v4028_v39  ;;  %5864 = vst [vmem:[#allocation16_spill] sm:$0xff] %v4030_v40  ;;  %v4032_v41 = vld [vmem:[#allocation7 + $0xc0] ss:$16 sps:$4 sm:$0xff]   ;;  %v4034_v42 = vld [vmem:[#allocation7 + $0xc8] ss:$16 sps:$4 sm:$0xff]  }
  0x4d   :  { %357 = vmatpush1.bf16.msra.mxu0 %v3948_v16  ;;  %5865 = vst [vmem:[#allocation17_spill] sm:$0xff] %v4032_v41  ;;  %5866 = vst [vmem:[#allocation18_spill] sm:$0xff] %v4034_v42  ;;  %v4040_v43 = vld [vmem:[#allocation7 + $0xa4] ss:$16 sps:$4 sm:$0xff]   ;;  %v4042_v44 = vld [vmem:[#allocation7 + $0xac] ss:$16 sps:$4 sm:$0xff]  }
  0x4e   :  { %398 = vmatpush1.bf16.msra.mxu1 %v3952_v17  ;;  %358 = vmatprep.subr.bf16.mxu0 %v3954_v18  ;;  %5867 = vst [vmem:[#allocation19_spill] sm:$0xff] %v4040_v43  ;;  %5868 = vst [vmem:[#allocation20_spill] sm:$0xff] %v4042_v44  ;;  %v4044_v45 = vld [vmem:[#allocation7 + $0xa0] ss:$16 sps:$4 sm:$0xff]   ;;  %v4046_v46 = vld [vmem:[#allocation7 + $0xa8] ss:$16 sps:$4 sm:$0xff]  }
  0x4f   :  { %399 = vmatprep.subr.bf16.mxu1 %v3958_v19  ;;  %5869 = vst [vmem:[#allocation21_spill] sm:$0xff] %v4044_v45  ;;  %5870 = vst [vmem:[#allocation22_spill] sm:$0xff] %v4046_v46  ;;  %v4052_v47 = vld [vmem:[#allocation7 + $0x84] ss:$16 sps:$4 sm:$0xff]   ;;  %v4054_v48 = vld [vmem:[#allocation7 + $0x8c] ss:$16 sps:$4 sm:$0xff]  }
  0x50   :  { %5871 = vst [vmem:[#allocation23_spill] sm:$0xff] %v4052_v47  ;;  %5872 = vst [vmem:[#allocation24_spill] sm:$0xff] %v4054_v48  ;;  %v4056_v49 = vld [vmem:[#allocation7 + $0x80] ss:$16 sps:$4 sm:$0xff]   ;;  %v4058_v50 = vld [vmem:[#allocation7 + $0x88] ss:$16 sps:$4 sm:$0xff]  }
  0x51   :  { %359 = vmatpush1.bf16.msra.mxu0 %v3960_v20  ;;  %5873 = vst [vmem:[#allocation25_spill] sm:$0xff] %v4056_v49  ;;  %5874 = vst [vmem:[#allocation26_spill] sm:$0xff] %v4058_v50  ;;  %v4064_v51 = vld [vmem:[#allocation7 + $0x64] ss:$16 sps:$4 sm:$0xff]   ;;  %v4066_v52 = vld [vmem:[#allocation7 + $0x6c] ss:$16 sps:$4 sm:$0xff]  }
  0x52   :  { %400 = vmatpush1.bf16.msra.mxu1 %v3962_v21  ;;  %360 = vmatprep.subr.bf16.mxu0 %v3966_v22  ;;  %5875 = vst [vmem:[#allocation27_spill] sm:$0xff] %v4064_v51  ;;  %5876 = vst [vmem:[#allocation28_spill] sm:$0xff] %v4066_v52  ;;  %v4068_v53 = vld [vmem:[#allocation7 + $0x60] ss:$16 sps:$4 sm:$0xff]   ;;  %v4070_v54 = vld [vmem:[#allocation7 + $0x68] ss:$16 sps:$4 sm:$0xff]  }
  0x53   :  { %401 = vmatprep.subr.bf16.mxu1 %v3970_v23  ;;  %5877 = vst [vmem:[#allocation29_spill] sm:$0xff] %v4068_v53  ;;  %5878 = vst [vmem:[#allocation30_spill] sm:$0xff] %v4070_v54  ;;  %v4076_v55 = vld [vmem:[#allocation7 + $0x44] ss:$16 sps:$4 sm:$0xff]   ;;  %v4078_v56 = vld [vmem:[#allocation7 + $0x4c] ss:$16 sps:$4 sm:$0xff]  }
  0x54   :  { %5879 = vst [vmem:[#allocation31_spill] sm:$0xff] %v4076_v55  ;;  %5880 = vst [vmem:[#allocation32_spill] sm:$0xff] %v4078_v56  ;;  %v4080_v57 = vld [vmem:[#allocation7 + $0x40] ss:$16 sps:$4 sm:$0xff]   ;;  %v4082_v58 = vld [vmem:[#allocation7 + $0x48] ss:$16 sps:$4 sm:$0xff]  }
  0x55   :  { %361 = vmatpush1.bf16.msra.mxu0 %v3974_v24  ;;  %5881 = vst [vmem:[#allocation33_spill] sm:$0xff] %v4080_v57  ;;  %5882 = vst [vmem:[#allocation34_spill] sm:$0xff] %v4082_v58  ;;  %v4088_v59 = vld [vmem:[#allocation7 + $0x24] ss:$16 sps:$4 sm:$0xff]   ;;  %v4090_v60 = vld [vmem:[#allocation7 + $0x2c] ss:$16 sps:$4 sm:$0xff]  }
  0x56   :  { %402 = vmatpush1.bf16.msra.mxu1 %v3976_v25  ;;  %362 = vmatprep.subr.bf16.mxu0 %v3980_v26  ;;  %5883 = vst [vmem:[#allocation35_spill] sm:$0xff] %v4088_v59  ;;  %5884 = vst [vmem:[#allocation36_spill] sm:$0xff] %v4090_v60  ;;  %v4092_v61 = vld [vmem:[#allocation7 + $0x20] ss:$16 sps:$4 sm:$0xff]   ;;  %v4094_v62 = vld [vmem:[#allocation7 + $0x28] ss:$16 sps:$4 sm:$0xff]  }
  0x57   :  { %403 = vmatprep.subr.bf16.mxu1 %v3982_v27  ;;  %5885 = vst [vmem:[#allocation37_spill] sm:$0xff] %v4092_v61  ;;  %5886 = vst [vmem:[#allocation38_spill] sm:$0xff] %v4094_v62  ;;  %v4100_v63 = vld [vmem:[#allocation7 + $0x4] ss:$16 sps:$4 sm:$0xff]   ;;  %v4102_v0 = vld [vmem:[#allocation7 + $0xc] ss:$16 sps:$4 sm:$0xff]  }
  0x58   :  { %5887 = vst [vmem:[#allocation39_spill] sm:$0xff] %v4100_v63  ;;  %5888 = vst [vmem:[#allocation40_spill] sm:$0xff] %v4102_v0 }
  0x59   :  { %363 = vmatpush1.bf16.msra.mxu0 %v3989_v29 }
  0x5a   :  { %404 = vmatpush1.bf16.msra.mxu1 %v3991_v30  ;;  %364 = vmatprep.subr.bf16.mxu0 %v3994_v31 }
  0x5b   :  { %405 = vmatprep.subr.bf16.mxu1 %v3996_v32 }
  0x5d   :  { %365 = vmatpush1.bf16.msra.mxu0 %v4002_v33 }
  0x5e   :  { %406 = vmatpush1.bf16.msra.mxu1 %v4004_v34  ;;  %668 = vmatprep.subr.bf16.mxu0 %v4016_v35 }
  0x5f   :  { %709 = vmatprep.subr.bf16.mxu1 %v4018_v36 }
  0x60   :  { %383 = vmatmul.mubr.bf16.vlgmr.msra.gmra.mxu0 %v5527_v1 }
  0x61   :  { %424 = vmatmul.mubr.bf16.vlgmr.msra.gmra.mxu1 %v5527_v1  ;;  %700 = vmatprep.mubr.bf16.mxu0 %v5527_v1 }
  0x62   :  { %741 = vmatprep.mubr.bf16.mxu1 %v5527_v1  ;;  %669 = vmatpush1.bf16.msra.mxu0 %v4020_v37  ;;  %v4104_v1 = vld [vmem:[#allocation7] ss:$16 sps:$4 sm:$0xff]  }
  0x63   :  { %710 = vmatpush1.bf16.msra.mxu1 %v4022_v38  ;;  %670 = vmatprep.subr.bf16.mxu0 %v4028_v39  ;;  %5889 = vst [vmem:[#allocation41_spill] sm:$0xff] %v4104_v1 }
  0x64   :  { %711 = vmatprep.subr.bf16.mxu1 %v4030_v40 }
  0x66   :  { %671 = vmatpush1.bf16.msra.mxu0 %v4032_v41 }
  0x67   :  { %712 = vmatpush1.bf16.msra.mxu1 %v4034_v42  ;;  %672 = vmatprep.subr.bf16.mxu0 %v4040_v43 }
  0x68   :  { %713 = vmatprep.subr.bf16.mxu1 %v4042_v44 }
  0x6a   :  { %673 = vmatpush1.bf16.msra.mxu0 %v4044_v45 }
  0x6b   :  { %714 = vmatpush1.bf16.msra.mxu1 %v4046_v46  ;;  %674 = vmatprep.subr.bf16.mxu0 %v4052_v47 }
  0x6c   :  { %715 = vmatprep.subr.bf16.mxu1 %v4054_v48 }
  0x6e   :  { %675 = vmatpush1.bf16.msra.mxu0 %v4056_v49 }
  0x6f   :  { %716 = vmatpush1.bf16.msra.mxu1 %v4058_v50  ;;  %676 = vmatprep.subr.bf16.mxu0 %v4064_v51 }
  0x70   :  { %717 = vmatprep.subr.bf16.mxu1 %v4066_v52 }
  0x72   :  { %677 = vmatpush1.bf16.msra.mxu0 %v4068_v53 }
  0x73   :  { %718 = vmatpush1.bf16.msra.mxu1 %v4070_v54  ;;  %678 = vmatprep.subr.bf16.mxu0 %v4076_v55  ;;  %v100_v55 = vld [vmem:[#allocation3] sm:$0xf] }
  0x74   :  { %719 = vmatprep.subr.bf16.mxu1 %v4078_v56 }
  0x76   :  { %679 = vmatpush1.bf16.msra.mxu0 %v4080_v57 }
  0x77   :  { %720 = vmatpush1.bf16.msra.mxu1 %v4082_v58  ;;  %680 = vmatprep.subr.bf16.mxu0 %v4088_v59  ;;  %v4106_v58 = vld [vmem:[#allocation7 + $0x8] ss:$16 sps:$4 sm:$0xff]  }
  0x78   :  { %721 = vmatprep.subr.bf16.mxu1 %v4090_v60  ;;  %5890 = vst [vmem:[#allocation42_spill] sm:$0xff] %v4106_v58  ;;  %v109_v60 = vlaneseq }
  0x7a   :  { %681 = vmatpush1.bf16.msra.mxu0 %v4092_v61  ;;  %v110_v61 = vshrl.u32 %v109_v60, 7 }
  0x7b   :  { %722 = vmatpush1.bf16.msra.mxu1 %v4094_v62  ;;  %682 = vmatprep.subr.bf16.mxu0 %v4100_v63  ;;  %v99_v62 = vld [vmem:[%s5518_s1] sm:$0xf] }
  0x7c   :  { %723 = vmatprep.subr.bf16.mxu1 %v4102_v0  ;;  %v4112_v59 = vsub.s32 0, %v110_v61  ;;  %v4117_v57 = vsub.s32 1, %v110_v61  ;;  %v4122_v0 = vsub.s32 2, %v110_v61  ;;  %v4139_v50 = vsub.s32 3, %v110_v61 }
  0x7e   :  { %683 = vmatpush1.bf16.msra.mxu0 %v4104_v1  ;;  %v4120_v56 = vrot.slane %v99_v62, %v4112_v59  ;;  %v4125_v1 = vrot.slane %v99_v62, %v4117_v57  ;;  %v4132_v54 = vrot.slane %v99_v62, %v4122_v0  ;;  %v4136_v52 = vrot.slane %v100_v55, %v4117_v57 }
  0x7f   :  { %724 = vmatpush1.bf16.msra.mxu1 %v4106_v58  ;;  %v4129_v58 = vrot.slane %v100_v55, %v4112_v59  ;;  %v4143_v48 = vrot.slane %v100_v55, %v4122_v0  ;;  %v4147_v44 = vrot.slane %v99_v62, %v4139_v50 }
  0x80   :  { %5891 = vst [vmem:[#allocation43_spill] sm:$0xff] %v4120_v56  ;;  %5892 = vst [vmem:[#allocation44_spill] sm:$0xff] %v4125_v1 }
  0x81   :  { %5893 = vst [vmem:[#allocation45_spill] sm:$0xff] %v4129_v58  ;;  %5894 = vst [vmem:[#allocation46_spill] sm:$0xff] %v4132_v54 }
  0x82   :  { %5895 = vst [vmem:[#allocation47_spill] sm:$0xff] %v4136_v52  ;;  %5896 = vst [vmem:[#allocation48_spill] sm:$0xff] %v4147_v44 }
  0xc4   :  { %v106_v63 = vpop.permute.xlu0 %105 }
  0xc5   :  { %v129_v60 = vmul.f32 %v4120_v56, %v106_v63  ;;  %v130_v53 = vmul.f32 %v4125_v1, %v106_v63  ;;  %v131_v49 = vmul.f32 %v4132_v54, %v106_v63  ;;  %v132_v40 = vmul.f32 %v4147_v44, %v106_v63 }
  0xc7   :  { %v154_v51 = vadd.f32 %v4129_v58, %v129_v60  ;;  %v155_v56 = vadd.f32 %v4136_v52, %v130_v53  ;;  %v156_v60 = vadd.f32 %v4143_v48, %v131_v49  ;;  %v4152_v53 = vrot.slane %v100_v55, %v4139_v50 }
  0xc9   :  { %v157_v62 = vadd.f32 %v4152_v53, %v132_v40 }
 0x120   :  { %v384_v47 = vpop.f32.mrf.mxu0 }
 0x121   :  { %v425_v46 = vpop.f32.mrf.mxu1  ;;  %v432_v45 = vadd.f32 %v384_v47, %v154_v51 }
 0x122   :  { %v386_v1 = vpop.f32.mrf.mxu0  ;;  %v434_v51 = vadd.f32 %v425_v46, %v156_v60 }
 0x123   :  { %v427_v43 = vpop.f32.mrf.mxu1  ;;  %v436_v42 = vmul.f32 0.5, %v432_v45  ;;  %v433_v61 = vadd.f32 %v386_v1, %v155_v56 }
 0x124   :  { %v388_v58 = vpop.f32.mrf.mxu0  ;;  %v435_v45 = vadd.f32 %v427_v43, %v157_v62  ;;  %v4168_v62 = vld [vmem:[#allocation8 + $0xe0] ss:$16 sps:$4 sm:$0xff]  }
 0x125   :  { %v429_v41 = vpop.f32.mrf.mxu1  ;;  %3355 = vtanh.f32 %v436_v42  ;;  %v440_v54 = vmul.f32 0.5, %v433_v61 }
 0x126   :  { %v389_v52 = vpop.f32.mrf.mxu0  ;;  %v445_v39 = vmul.f32 0.5, %v435_v45  ;;  %v4170_v45 = vld [vmem:[#allocation8 + $0xe8] ss:$16 sps:$4 sm:$0xff]  }
 0x127   :  { %v430_v47 = vpop.f32.mrf.mxu1  ;;  %3357 = vtanh.f32 %v440_v54 }
 0x128   :  { %3359 = vtanh.f32 %v434_v51  ;;  %v4164_v47 = vld [vmem:[#allocation8 + $0xe4] ss:$16 sps:$4 sm:$0xff]   ;;  %v4166_v51 = vld [vmem:[#allocation8 + $0xec] ss:$16 sps:$4 sm:$0xff]  }
 0x129   :  { %3361 = vtanh.f32 %v445_v39  ;;  %v5897_v39 = vmov 0   ;;  %5898 = vst [vmem:[#allocation49_spill] sm:$0xff] %v4164_v47  ;;  %5899 = vst [vmem:[#allocation50_spill] sm:$0xff] %v4166_v51  ;;  %961 = vmatprep.subr.bf16.mxu0 %v4164_v47  ;;  %1002 = vmatprep.subr.bf16.mxu1 %v4166_v51 }
 0x132   :  { %v3356_v49 = vpop.eup %3355 }
 0x133   :  { %v438_v1 = vadd.f32 1.0, %v3356_v49  ;;  %v4176_v49 = vld [vmem:[#allocation8 + $0xc4] ss:$16 sps:$4 sm:$0xff]  }
 0x134   :  { %v3358_v56 = vpop.eup %3357  ;;  %5900 = vst [vmem:[#allocation51_spill] sm:$0xff] %v4176_v49 }
 0x135   :  { %v439_v41 = vmul.f32 0.5, %v438_v1  ;;  %v442_v42 = vadd.f32 1.0, %v3358_v56  ;;  %v3360_v63 = vpop.eup %3359  ;;  %v4178_v1 = vld [vmem:[#allocation8 + $0xcc] ss:$16 sps:$4 sm:$0xff]   ;;  %v4180_v56 = vld [vmem:[#allocation8 + $0xc0] ss:$16 sps:$4 sm:$0xff]  }
 0x136   :  { %v3362_v46 = vpop.eup %3361  ;;  %5901 = vst [vmem:[#allocation52_spill] sm:$0xff] %v4178_v1  ;;  %5902 = vst [vmem:[#allocation53_spill] sm:$0xff] %v4180_v56 }
 0x137   :  { %v443_v58 = vmul.f32 0.5, %v442_v42  ;;  %v450_v55 = vmul.f32 %v3360_v63, %v439_v41  ;;  %v447_v52 = vadd.f32 1.0, %v3362_v46  ;;  %v4182_v41 = vld [vmem:[#allocation8 + $0xc8] ss:$16 sps:$4 sm:$0xff]   ;;  %v4188_v42 = vld [vmem:[#allocation8 + $0xa4] ss:$16 sps:$4 sm:$0xff]  }
 0x138   :  { %5903 = vst [vmem:[#allocation54_spill] sm:$0xff] %v4182_v41  ;;  %5904 = vst [vmem:[#allocation55_spill] sm:$0xff] %v4188_v42  ;;  %v4192_v63 = vld [vmem:[#allocation8 + $0xa0] ss:$16 sps:$4 sm:$0xff]   ;;  %v4202_v46 = vld [vmem:[#allocation8 + $0x8c] ss:$16 sps:$4 sm:$0xff]  }
 0x139   :  { %v449_v61 = vmul.f32 0.0, %v443_v58  ;;  %v448_v40 = vmul.f32 0.5, %v447_v52  ;;  %v4190_v58 = vld [vmem:[#allocation8 + $0xac] ss:$16 sps:$4 sm:$0xff]   ;;  %5906 = vst [vmem:[#allocation57_spill] sm:$0xff] %v4192_v63  ;;  %5909 = vst [vmem:[#allocation60_spill] sm:$0xff] %v4202_v46 }
 0x13a   :  { %5905 = vst [vmem:[#allocation56_spill] sm:$0xff] %v4190_v58  ;;  %v4204_v52 = vld [vmem:[#allocation8 + $0x80] ss:$16 sps:$4 sm:$0xff]  }
 0x13b   :  { %v4155_v44 = vadd.f32 %v450_v55, %v449_v61  ;;  %v4194_v61 = vld [vmem:[#allocation8 + $0xa8] ss:$16 sps:$4 sm:$0xff]   ;;  %v4200_v55 = vld [vmem:[#allocation8 + $0x84] ss:$16 sps:$4 sm:$0xff]   ;;  %5910 = vst [vmem:[#allocation61_spill] sm:$0xff] %v4204_v52 }
 0x13c   :  { %5907 = vst [vmem:[#allocation58_spill] sm:$0xff] %v4194_v61  ;;  %5908 = vst [vmem:[#allocation59_spill] sm:$0xff] %v4200_v55 }
 0x13d   :  { %3363 = vtanh.f32 %v4155_v44 }
 0x14a   :  { %v3364_v54 = vpop.eup %3363 }
 0x14b   :  { %v453_v43 = vmul.f32 %v3364_v54, %v448_v40  ;;  %v4206_v40 = vld [vmem:[#allocation8 + $0x88] ss:$16 sps:$4 sm:$0xff]   ;;  %v4212_v54 = vld [vmem:[#allocation8 + $0x64] ss:$16 sps:$4 sm:$0xff]  }
 0x14c   :  { %5911 = vst [vmem:[#allocation62_spill] sm:$0xff] %v4206_v40  ;;  %5912 = vst [vmem:[#allocation63_spill] sm:$0xff] %v4212_v54 }
 0x14d   :  { %v4158_v60 = vpack.c.bf16 %v453_v43, %v453_v43  ;;  %v4214_v43 = vld [vmem:[#allocation8 + $0x6c] ss:$16 sps:$4 sm:$0xff]  }
 0x14e   :  { %5913 = vst [vmem:[#allocation64_spill] sm:$0xff] %v4214_v43 }
 0x14f   :  { %701 = vmatmul.mubr.bf16.vlgmr.msra.gmra.mxu0 %v4158_v60  ;;  %742 = vmatmul.mubr.bf16.vlgmr.msra.gmra.mxu1 %v4158_v60 }
 0x150   :  { %993 = vmatprep.mubr.bf16.mxu0 %v5897_v39  ;;  %1034 = vmatprep.mubr.bf16.mxu1 %v5897_v39 }
 0x151   :  { %962 = vmatpush1.bf16.msra.mxu0 %v4168_v62  ;;  %1003 = vmatpush1.bf16.msra.mxu1 %v4170_v45 }
 0x152   :  { %963 = vmatprep.subr.bf16.mxu0 %v4176_v49  ;;  %1004 = vmatprep.subr.bf16.mxu1 %v4178_v1 }
 0x155   :  { %964 = vmatpush1.bf16.msra.mxu0 %v4180_v56  ;;  %1005 = vmatpush1.bf16.msra.mxu1 %v4182_v41 }
 0x156   :  { %965 = vmatprep.subr.bf16.mxu0 %v4188_v42  ;;  %1006 = vmatprep.subr.bf16.mxu1 %v4190_v58 }
 0x159   :  { %966 = vmatpush1.bf16.msra.mxu0 %v4192_v63  ;;  %1007 = vmatpush1.bf16.msra.mxu1 %v4194_v61  ;;  %v4216_v61 = vld [vmem:[#allocation8 + $0x60] ss:$16 sps:$4 sm:$0xff]   ;;  %v4218_v63 = vld [vmem:[#allocation8 + $0x68] ss:$16 sps:$4 sm:$0xff]  }
 0x15a   :  { %967 = vmatprep.subr.bf16.mxu0 %v4200_v55  ;;  %1008 = vmatprep.subr.bf16.mxu1 %v4202_v46  ;;  %5914 = vst [vmem:[#allocation65_spill] sm:$0xff] %v4216_v61  ;;  %5915 = vst [vmem:[#allocation66_spill] sm:$0xff] %v4218_v63  ;;  %v4224_v46 = vld [vmem:[#allocation8 + $0x44] ss:$16 sps:$4 sm:$0xff]   ;;  %v4230_v55 = vld [vmem:[#allocation8 + $0x48] ss:$16 sps:$4 sm:$0xff]  }
 0x15b   :  { %5916 = vst [vmem:[#allocation67_spill] sm:$0xff] %v4224_v46  ;;  %5919 = vst [vmem:[#allocation70_spill] sm:$0xff] %v4230_v55 }
 0x15d   :  { %968 = vmatpush1.bf16.msra.mxu0 %v4204_v52  ;;  %1009 = vmatpush1.bf16.msra.mxu1 %v4206_v40  ;;  %v4226_v52 = vld [vmem:[#allocation8 + $0x4c] ss:$16 sps:$4 sm:$0xff]   ;;  %v4228_v40 = vld [vmem:[#allocation8 + $0x40] ss:$16 sps:$4 sm:$0xff]  }
 0x15e   :  { %969 = vmatprep.subr.bf16.mxu0 %v4212_v54  ;;  %1010 = vmatprep.subr.bf16.mxu1 %v4214_v43  ;;  %5917 = vst [vmem:[#allocation68_spill] sm:$0xff] %v4226_v52  ;;  %5918 = vst [vmem:[#allocation69_spill] sm:$0xff] %v4228_v40  ;;  %v4236_v43 = vld [vmem:[#allocation8 + $0x24] ss:$16 sps:$4 sm:$0xff]   ;;  %v4242_v54 = vld [vmem:[#allocation8 + $0x28] ss:$16 sps:$4 sm:$0xff]  }
 0x15f   :  { %5920 = vst [vmem:[#allocation71_spill] sm:$0xff] %v4236_v43  ;;  %5923 = vst [vmem:[#allocation74_spill] sm:$0xff] %v4242_v54 }
 0x161   :  { %970 = vmatpush1.bf16.msra.mxu0 %v4216_v61  ;;  %1011 = vmatpush1.bf16.msra.mxu1 %v4218_v63  ;;  %v4238_v61 = vld [vmem:[#allocation8 + $0x2c] ss:$16 sps:$4 sm:$0xff]   ;;  %v4240_v63 = vld [vmem:[#allocation8 + $0x20] ss:$16 sps:$4 sm:$0xff]  }
 0x162   :  { %971 = vmatprep.subr.bf16.mxu0 %v4224_v46  ;;  %1012 = vmatprep.subr.bf16.mxu1 %v4226_v52  ;;  %5921 = vst [vmem:[#allocation72_spill] sm:$0xff] %v4238_v61  ;;  %5922 = vst [vmem:[#allocation73_spill] sm:$0xff] %v4240_v63  ;;  %v4248_v52 = vld [vmem:[#allocation8 + $0x4] ss:$16 sps:$4 sm:$0xff]   ;;  %v4254_v46 = vld [vmem:[#allocation8 + $0x8] ss:$16 sps:$4 sm:$0xff]  }
 0x163   :  { %5924 = vst [vmem:[#allocation75_spill] sm:$0xff] %v4248_v52  ;;  %5927 = vst [vmem:[#allocation78_spill] sm:$0xff] %v4254_v46 }
 0x165   :  { %972 = vmatpush1.bf16.msra.mxu0 %v4228_v40  ;;  %1013 = vmatpush1.bf16.msra.mxu1 %v4230_v55  ;;  %v4250_v40 = vld [vmem:[#allocation8 + $0xc] ss:$16 sps:$4 sm:$0xff]   ;;  %v4252_v55 = vld [vmem:[#allocation8] ss:$16 sps:$4 sm:$0xff]  }
 0x166   :  { %973 = vmatprep.subr.bf16.mxu0 %v4236_v43  ;;  %1014 = vmatprep.subr.bf16.mxu1 %v4238_v61  ;;  %5925 = vst [vmem:[#allocation76_spill] sm:$0xff] %v4250_v40  ;;  %5926 = vst [vmem:[#allocation77_spill] sm:$0xff] %v4252_v55 }
 0x169   :  { %974 = vmatpush1.bf16.msra.mxu0 %v4240_v63  ;;  %1015 = vmatpush1.bf16.msra.mxu1 %v4242_v54  ;;  %v3823_v54 = vmov 1   ;;  %v101_v63 = vld [vmem:[#allocation10] sm:$0xf] }
 0x16a   :  { %975 = vmatprep.subr.bf16.mxu0 %v4248_v52  ;;  %1016 = vmatprep.subr.bf16.mxu1 %v4250_v40  ;;  %v4264_v61 = vrot.slane %v101_v63, %v4112_v59  ;;  %v4267_v52 = vrot.slane %v101_v63, %v4117_v57  ;;  %v4276_v1 = vrot.slane %v101_v63, %v4139_v50 }
 0x16b   :  { %3203 = vset.pattern.permute.xlu0 %v3823_v54 }
 0x16c   :  { %1044 = vperm.xlu0 %3203, %v3987_v28   ;;  %5928 = vst [vmem:[#allocation79_spill] sm:$0xff] %v4264_v61  ;;  %5929 = vst [vmem:[#allocation80_spill] sm:$0xff] %v4267_v52 }
 0x16d   :  { %976 = vmatpush1.bf16.msra.mxu0 %v4252_v55  ;;  %1017 = vmatpush1.bf16.msra.mxu1 %v4254_v46 }
 0x16e   :  { %1055 = vmatprep.subr.bf16.mxu0 %v3910_v2  ;;  %1096 = vmatprep.subr.bf16.mxu1 %v3912_v3  ;;  %v4271_v3 = vrot.slane %v101_v63, %v4122_v0 }
 0x20f   :  { %v702_v40 = vpop.f32.mrf.mxu0  ;;  %v743_v43 = vpop.f32.mrf.mxu1 }
 0x210   :  { %v703_v55 = vadd.f32 %v702_v40, %v4264_v61  ;;  %v744_v57 = vadd.f32 %v743_v43, %v4271_v3 }
 0x211   :  { %v704_v46 = vpop.f32.mrf.mxu0  ;;  %v745_v58 = vpop.f32.mrf.mxu1 }
 0x212   :  { %v750_v2 = vmul.f32 0.5, %v703_v55  ;;  %v705_v54 = vadd.f32 %v704_v46, %v4267_v52  ;;  %v746_v55 = vadd.f32 %v745_v58, %v4276_v1 }
 0x213   :  { %v706_v28 = vpop.f32.mrf.mxu0  ;;  %v747_v42 = vpop.f32.mrf.mxu1 }
 0x214   :  { %3365 = vtanh.f32 %v750_v2  ;;  %v754_v59 = vmul.f32 0.5, %v705_v54  ;;  %v759_v40 = vmul.f32 0.5, %v746_v55 }
 0x215   :  { %v707_v41 = vpop.f32.mrf.mxu0  ;;  %v748_v56 = vpop.f32.mrf.mxu1 }
 0x216   :  { %3367 = vtanh.f32 %v754_v59 }
 0x217   :  { %3369 = vtanh.f32 %v744_v57 }
 0x218   :  { %3371 = vtanh.f32 %v759_v40 }
 0x221   :  { %v3366_v0 = vpop.eup %3365 }
 0x222   :  { %v752_v61 = vadd.f32 1.0, %v3366_v0 }
 0x223   :  { %v3368_v49 = vpop.eup %3367 }
 0x224   :  { %v753_v46 = vmul.f32 0.5, %v752_v61  ;;  %v756_v28 = vadd.f32 1.0, %v3368_v49  ;;  %v3370_v2 = vpop.eup %3369 }
 0x225   :  { %v3372_v50 = vpop.eup %3371 }
 0x226   :  { %v757_v42 = vmul.f32 0.5, %v756_v28  ;;  %v764_v56 = vmul.f32 %v3370_v2, %v753_v46  ;;  %v761_v63 = vadd.f32 1.0, %v3372_v50  ;;  %v1045_v46 = vpop.permute.xlu0 %1044  ;;  %v5958_v28 = vld [vmem:[#allocation43_spill] sm:$0xff]  ;;  %v5959_v2 = vld [vmem:[#allocation44_spill] sm:$0xff] }
 0x228   :  { %v763_v41 = vmul.f32 0.0, %v757_v42  ;;  %v762_v43 = vmul.f32 0.5, %v761_v63  ;;  %v1047_v42 = vmul.f32 %v1045_v46, %v5958_v28  ;;  %v5961_v63 = vld [vmem:[#allocation46_spill] sm:$0xff] }
 0x22a   :  { %v4279_v54 = vadd.f32 %v764_v56, %v763_v41  ;;  %v1048_v41 = vmul.f32 %v1045_v46, %v5959_v2  ;;  %v5960_v56 = vld [vmem:[#allocation45_spill] sm:$0xff]  ;;  %v5963_v2 = vld [vmem:[#allocation48_spill] sm:$0xff] }
 0x22b   :  { %v1051_v50 = vadd.f32 %v1047_v42, %v5960_v56 }
 0x22c   :  { %3373 = vtanh.f32 %v4279_v54 }
 0x239   :  { %v3374_v59 = vpop.eup %3373 }
 0x23a   :  { %v767_v58 = vmul.f32 %v3374_v59, %v762_v43  ;;  %v1049_v43 = vmul.f32 %v1045_v46, %v5961_v63  ;;  %v5962_v59 = vld [vmem:[#allocation47_spill] sm:$0xff] }
 0x23c   :  { %v768_v57 = vpack.c.bf16 %v767_v58, %v767_v58  ;;  %v1052_v58 = vadd.f32 %v1048_v41, %v5962_v59 }
 0x23e   :  { %994 = vmatmul.mubr.bf16.vlgmr.msra.gmra.mxu0 %v768_v57  ;;  %1035 = vmatmul.mubr.bf16.vlgmr.msra.gmra.mxu1 %v768_v57 }
 0x23f   :  { %1056 = vmatpush1.bf16.msra.mxu0 %v3915_v4  ;;  %1097 = vmatpush1.bf16.msra.mxu1 %v3917_v5  ;;  %v5930_v4 = vld [vmem:[#allocation15_spill] sm:$0xff]  ;;  %v5931_v5 = vld [vmem:[#allocation16_spill] sm:$0xff] }
 0x240   :  { %1057 = vmatprep.subr.bf16.mxu0 %v3920_v6  ;;  %1098 = vmatprep.subr.bf16.mxu1 %v3924_v7  ;;  %v5932_v6 = vld [vmem:[#allocation17_spill] sm:$0xff]  ;;  %v5933_v7 = vld [vmem:[#allocation18_spill] sm:$0xff] }
 0x241   :  { %1087 = vmatprep.mubr.bf16.mxu0 %v5897_v39  ;;  %1128 = vmatprep.mubr.bf16.mxu1 %v5897_v39 }
 0x243   :  { %1058 = vmatpush1.bf16.msra.mxu0 %v3926_v8  ;;  %1099 = vmatpush1.bf16.msra.mxu1 %v3929_v9  ;;  %v5934_v8 = vld [vmem:[#allocation19_spill] sm:$0xff]  ;;  %v5935_v9 = vld [vmem:[#allocation20_spill] sm:$0xff] }
 0x244   :  { %1059 = vmatprep.subr.bf16.mxu0 %v3932_v10  ;;  %1100 = vmatprep.subr.bf16.mxu1 %v3934_v11  ;;  %v5936_v10 = vld [vmem:[#allocation21_spill] sm:$0xff]  ;;  %v5937_v11 = vld [vmem:[#allocation22_spill] sm:$0xff] }
 0x247   :  { %1060 = vmatpush1.bf16.msra.mxu0 %v3936_v12  ;;  %1101 = vmatpush1.bf16.msra.mxu1 %v3938_v13  ;;  %v5938_v12 = vld [vmem:[#allocation23_spill] sm:$0xff]  ;;  %v5939_v13 = vld [vmem:[#allocation24_spill] sm:$0xff] }
 0x248   :  { %1061 = vmatprep.subr.bf16.mxu0 %v3942_v14  ;;  %1102 = vmatprep.subr.bf16.mxu1 %v3946_v15  ;;  %v5940_v14 = vld [vmem:[#allocation25_spill] sm:$0xff]  ;;  %v5941_v15 = vld [vmem:[#allocation26_spill] sm:$0xff] }
 0x24b   :  { %1062 = vmatpush1.bf16.msra.mxu0 %v3948_v16  ;;  %1103 = vmatpush1.bf16.msra.mxu1 %v3952_v17  ;;  %v5942_v16 = vld [vmem:[#allocation27_spill] sm:$0xff]  ;;  %v5943_v17 = vld [vmem:[#allocation28_spill] sm:$0xff] }
 0x24c   :  { %1063 = vmatprep.subr.bf16.mxu0 %v3954_v18  ;;  %1104 = vmatprep.subr.bf16.mxu1 %v3958_v19  ;;  %v5944_v18 = vld [vmem:[#allocation29_spill] sm:$0xff]  ;;  %v5945_v19 = vld [vmem:[#allocation30_spill] sm:$0xff] }
 0x24f   :  { %1064 = vmatpush1.bf16.msra.mxu0 %v3960_v20  ;;  %1105 = vmatpush1.bf16.msra.mxu1 %v3962_v21  ;;  %v5946_v20 = vld [vmem:[#allocation31_spill] sm:$0xff]  ;;  %v5947_v21 = vld [vmem:[#allocation32_spill] sm:$0xff] }
 0x250   :  { %1065 = vmatprep.subr.bf16.mxu0 %v3966_v22  ;;  %1106 = vmatprep.subr.bf16.mxu1 %v3970_v23  ;;  %v5948_v22 = vld [vmem:[#allocation33_spill] sm:$0xff]  ;;  %v5949_v23 = vld [vmem:[#allocation34_spill] sm:$0xff] }
 0x253   :  { %1066 = vmatpush1.bf16.msra.mxu0 %v3974_v24  ;;  %1107 = vmatpush1.bf16.msra.mxu1 %v3976_v25  ;;  %v5950_v24 = vld [vmem:[#allocation35_spill] sm:$0xff]  ;;  %v5951_v25 = vld [vmem:[#allocation36_spill] sm:$0xff] }
 0x254   :  { %1067 = vmatprep.subr.bf16.mxu0 %v3980_v26  ;;  %1108 = vmatprep.subr.bf16.mxu1 %v3982_v27  ;;  %v5952_v26 = vld [vmem:[#allocation37_spill] sm:$0xff]  ;;  %v5953_v27 = vld [vmem:[#allocation38_spill] sm:$0xff] }
 0x257   :  { %1068 = vmatpush1.bf16.msra.mxu0 %v3989_v29  ;;  %1109 = vmatpush1.bf16.msra.mxu1 %v3991_v30  ;;  %v5954_v29 = vld [vmem:[#allocation39_spill] sm:$0xff]  ;;  %v5955_v30 = vld [vmem:[#allocation40_spill] sm:$0xff] }
 0x258   :  { %1069 = vmatprep.subr.bf16.mxu0 %v3994_v31  ;;  %1110 = vmatprep.subr.bf16.mxu1 %v3996_v32  ;;  %v5956_v31 = vld [vmem:[#allocation41_spill] sm:$0xff]  ;;  %v5957_v32 = vld [vmem:[#allocation42_spill] sm:$0xff] }
 0x25b   :  { %1070 = vmatpush1.bf16.msra.mxu0 %v4002_v33  ;;  %1111 = vmatpush1.bf16.msra.mxu1 %v4004_v34 }
 0x25c   :  { %1160 = vmatprep.subr.bf16.mxu0 %v4016_v35  ;;  %1201 = vmatprep.subr.bf16.mxu1 %v4018_v36 }
 0x25e   :  { %1088 = vmatmul.mubr.bf16.vlgmr.msra.gmra.mxu0 %v4158_v60  ;;  %1129 = vmatmul.mubr.bf16.vlgmr.msra.gmra.mxu1 %v4158_v60 }
 0x25f   :  { %1161 = vmatpush1.bf16.msra.mxu0 %v4020_v37  ;;  %1202 = vmatpush1.bf16.msra.mxu1 %v4022_v38 }
 0x260   :  { %1162 = vmatprep.subr.bf16.mxu0 %v5930_v4  ;;  %1203 = vmatprep.subr.bf16.mxu1 %v5931_v5 }
 0x261   :  { %1192 = vmatprep.mubr.bf16.mxu0 %v5897_v39  ;;  %1233 = vmatprep.mubr.bf16.mxu1 %v5897_v39 }
 0x263   :  { %1163 = vmatpush1.bf16.msra.mxu0 %v5932_v6  ;;  %1204 = vmatpush1.bf16.msra.mxu1 %v5933_v7 }
 0x264   :  { %1164 = vmatprep.subr.bf16.mxu0 %v5934_v8  ;;  %1205 = vmatprep.subr.bf16.mxu1 %v5935_v9 }
 0x267   :  { %1165 = vmatpush1.bf16.msra.mxu0 %v5936_v10  ;;  %1206 = vmatpush1.bf16.msra.mxu1 %v5937_v11 }
 0x268   :  { %1166 = vmatprep.subr.bf16.mxu0 %v5938_v12  ;;  %1207 = vmatprep.subr.bf16.mxu1 %v5939_v13 }
 0x26b   :  { %1167 = vmatpush1.bf16.msra.mxu0 %v5940_v14  ;;  %1208 = vmatpush1.bf16.msra.mxu1 %v5941_v15 }
 0x26c   :  { %1168 = vmatprep.subr.bf16.mxu0 %v5942_v16  ;;  %1209 = vmatprep.subr.bf16.mxu1 %v5943_v17 }
 0x26f   :  { %1169 = vmatpush1.bf16.msra.mxu0 %v5944_v18  ;;  %1210 = vmatpush1.bf16.msra.mxu1 %v5945_v19 }
 0x270   :  { %1170 = vmatprep.subr.bf16.mxu0 %v5946_v20  ;;  %1211 = vmatprep.subr.bf16.mxu1 %v5947_v21 }
 0x273   :  { %1171 = vmatpush1.bf16.msra.mxu0 %v5948_v22  ;;  %1212 = vmatpush1.bf16.msra.mxu1 %v5949_v23 }
 0x274   :  { %1172 = vmatprep.subr.bf16.mxu0 %v5950_v24  ;;  %1213 = vmatprep.subr.bf16.mxu1 %v5951_v25 }
 0x277   :  { %1173 = vmatpush1.bf16.msra.mxu0 %v5952_v26  ;;  %1214 = vmatpush1.bf16.msra.mxu1 %v5953_v27 }
 0x278   :  { %1174 = vmatprep.subr.bf16.mxu0 %v5954_v29  ;;  %1215 = vmatprep.subr.bf16.mxu1 %v5955_v30  ;;  %v1050_v29 = vmul.f32 %v1045_v46, %v5963_v2 }
 0x27a   :  { %v1054_v41 = vadd.f32 %v1050_v29, %v4152_v53 }
 0x27b   :  { %1175 = vmatpush1.bf16.msra.mxu0 %v5956_v31  ;;  %1216 = vmatpush1.bf16.msra.mxu1 %v5957_v32 }
 0x27c   :  { %1261 = vmatprep.subr.bf16.mxu0 %v4164_v47  ;;  %1302 = vmatprep.subr.bf16.mxu1 %v4166_v51 }
 0x2fe   :  { %v4352_v33 = vpop.f32.mrf.mxu0  ;;  %v4354_v34 = vpop.f32.mrf.mxu1 }
 0x300   :  { %v4356_v60 = vpop.f32.mrf.mxu0  ;;  %v4358_v49 = vpop.f32.mrf.mxu1 }
 0x302   :  { %v999_v61 = vpop.f32.mrf.mxu0  ;;  %v1040_v55 = vpop.f32.mrf.mxu1 }
 0x303   :  { %v1053_v55 = vadd.f32 %v1049_v43, %v4143_v48 }
 0x304   :  { %v1000_v40 = vpop.f32.mrf.mxu0  ;;  %v1041_v0 = vpop.f32.mrf.mxu1 }
 0x31e   :  { %v1089_v57 = vpop.f32.mrf.mxu0  ;;  %v1130_v51 = vpop.f32.mrf.mxu1 }
 0x31f   :  { %v1137_v47 = vadd.f32 %v1089_v57, %v1051_v50  ;;  %v1139_v63 = vadd.f32 %v1130_v51, %v1053_v55  ;;  %v5967_v55 = vld [vmem:[#allocation54_spill] sm:$0xff] }
 0x320   :  { %v1091_v32 = vpop.f32.mrf.mxu0  ;;  %v1132_v31 = vpop.f32.mrf.mxu1 }
 0x321   :  { %v1141_v61 = vmul.f32 0.5, %v1137_v47  ;;  %v1138_v40 = vadd.f32 %v1091_v32, %v1052_v58  ;;  %v1140_v50 = vadd.f32 %v1132_v31, %v1054_v41  ;;  %v5970_v41 = vld [vmem:[#allocation57_spill] sm:$0xff] }
 0x322   :  { %v1093_v0 = vpop.f32.mrf.mxu0  ;;  %v1134_v30 = vpop.f32.mrf.mxu1 }
 0x323   :  { %3375 = vtanh.f32 %v1141_v61  ;;  %v1145_v28 = vmul.f32 0.5, %v1138_v40  ;;  %v1150_v57 = vmul.f32 0.5, %v1140_v50  ;;  %v5968_v0 = vld [vmem:[#allocation55_spill] sm:$0xff]  ;;  %v5971_v50 = vld [vmem:[#allocation58_spill] sm:$0xff] }
 0x324   :  { %v1094_v42 = vpop.f32.mrf.mxu0  ;;  %v1135_v56 = vpop.f32.mrf.mxu1 }
 0x325   :  { %3377 = vtanh.f32 %v1145_v28  ;;  %v5969_v42 = vld [vmem:[#allocation56_spill] sm:$0xff] }
 0x326   :  { %3379 = vtanh.f32 %v1139_v63 }
 0x327   :  { %3381 = vtanh.f32 %v1150_v57  ;;  %v5972_v57 = vld [vmem:[#allocation59_spill] sm:$0xff] }
 0x330   :  { %v3376_v59 = vpop.eup %3375 }
 0x331   :  { %v1143_v47 = vadd.f32 1.0, %v3376_v59  ;;  %v5966_v59 = vld [vmem:[#allocation53_spill] sm:$0xff] }
 0x332   :  { %v3378_v27 = vpop.eup %3377 }
 0x333   :  { %v1144_v43 = vmul.f32 0.5, %v1143_v47  ;;  %v1147_v32 = vadd.f32 1.0, %v3378_v27  ;;  %v3380_v58 = vpop.eup %3379  ;;  %v5965_v27 = vld [vmem:[#allocation52_spill] sm:$0xff] }
 0x334   :  { %v3382_v51 = vpop.eup %3381  ;;  %v5973_v47 = vld [vmem:[#allocation60_spill] sm:$0xff] }
 0x335   :  { %v1148_v30 = vmul.f32 0.5, %v1147_v32  ;;  %v1155_v46 = vmul.f32 %v3380_v58, %v1144_v43  ;;  %v1152_v29 = vadd.f32 1.0, %v3382_v51  ;;  %v5974_v43 = vld [vmem:[#allocation61_spill] sm:$0xff]  ;;  %v5975_v32 = vld [vmem:[#allocation62_spill] sm:$0xff]  ;;  %v5977_v58 = vld [vmem:[#allocation64_spill] sm:$0xff] }
 0x336   :  { %v5980_v51 = vld [vmem:[#allocation67_spill] sm:$0xff] }
 0x337   :  { %v1154_v61 = vmul.f32 %v1148_v30, %v4155_v44  ;;  %v1153_v28 = vmul.f32 0.5, %v1152_v29  ;;  %v5964_v44 = vld [vmem:[#allocation51_spill] sm:$0xff]  ;;  %v5981_v29 = vld [vmem:[#allocation68_spill] sm:$0xff] }
 0x338   :  { %v5976_v30 = vld [vmem:[#allocation63_spill] sm:$0xff] }
 0x339   :  { %v4369_v40 = vadd.f32 %v1155_v46, %v1154_v61  ;;  %v5978_v61 = vld [vmem:[#allocation65_spill] sm:$0xff]  ;;  %v5979_v46 = vld [vmem:[#allocation66_spill] sm:$0xff] }
 0x33b   :  { %3383 = vtanh.f32 %v4369_v40 }
 0x348   :  { %v3384_v31 = vpop.eup %3383 }
 0x349   :  { %v1158_v56 = vmul.f32 %v3384_v31, %v1153_v28  ;;  %v5982_v28 = vld [vmem:[#allocation69_spill] sm:$0xff]  ;;  %v5983_v31 = vld [vmem:[#allocation70_spill] sm:$0xff] }
 0x34b   :  { %v4372_v63 = vpack.c.bf16 %v1158_v56, %v1158_v56  ;;  %v5984_v56 = vld [vmem:[#allocation71_spill] sm:$0xff] }
 0x34d   :  { %1193 = vmatmul.mubr.bf16.vlgmr.msra.gmra.mxu0 %v4372_v63  ;;  %1234 = vmatmul.mubr.bf16.vlgmr.msra.gmra.mxu1 %v4372_v63 }
 0x34e   :  { %1262 = vmatpush1.bf16.msra.mxu0 %v4168_v62  ;;  %1303 = vmatpush1.bf16.msra.mxu1 %v4170_v45 }
 0x34f   :  { %1263 = vmatprep.subr.bf16.mxu0 %v5964_v44  ;;  %1304 = vmatprep.subr.bf16.mxu1 %v5965_v27 }
 0x350   :  { %1293 = vmatprep.mubr.bf16.mxu0 %v5897_v39  ;;  %1334 = vmatprep.mubr.bf16.mxu1 %v5897_v39 }
 0x352   :  { %1264 = vmatpush1.bf16.msra.mxu0 %v5966_v59  ;;  %1305 = vmatpush1.bf16.msra.mxu1 %v5967_v55 }
 0x353   :  { %1265 = vmatprep.subr.bf16.mxu0 %v5968_v0  ;;  %1306 = vmatprep.subr.bf16.mxu1 %v5969_v42 }
 0x356   :  { %1266 = vmatpush1.bf16.msra.mxu0 %v5970_v41  ;;  %1307 = vmatpush1.bf16.msra.mxu1 %v5971_v50 }
 0x357   :  { %1267 = vmatprep.subr.bf16.mxu0 %v5972_v57  ;;  %1308 = vmatprep.subr.bf16.mxu1 %v5973_v47 }
 0x35a   :  { %1268 = vmatpush1.bf16.msra.mxu0 %v5974_v43  ;;  %1309 = vmatpush1.bf16.msra.mxu1 %v5975_v32  ;;  %v5985_v43 = vld [vmem:[#allocation72_spill] sm:$0xff]  ;;  %v5986_v32 = vld [vmem:[#allocation73_spill] sm:$0xff] }
 0x35b   :  { %1269 = vmatprep.subr.bf16.mxu0 %v5976_v30  ;;  %1310 = vmatprep.subr.bf16.mxu1 %v5977_v58  ;;  %v5987_v30 = vld [vmem:[#allocation74_spill] sm:$0xff]  ;;  %v5988_v58 = vld [vmem:[#allocation75_spill] sm:$0xff] }
 0x35e   :  { %1270 = vmatpush1.bf16.msra.mxu0 %v5978_v61  ;;  %1311 = vmatpush1.bf16.msra.mxu1 %v5979_v46  ;;  %v5989_v61 = vld [vmem:[#allocation76_spill] sm:$0xff]  ;;  %v5990_v46 = vld [vmem:[#allocation77_spill] sm:$0xff] }
 0x35f   :  { %1271 = vmatprep.subr.bf16.mxu0 %v5980_v51  ;;  %1312 = vmatprep.subr.bf16.mxu1 %v5981_v29  ;;  %v5991_v51 = vld [vmem:[#allocation78_spill] sm:$0xff] }
 0x360   :  { %v4408_v29 = vld [vmem:[#allocation5 + $0xe4] ss:$16 sps:$4 sm:$0xff]  }
 0x361   :  { %5992 = vst [vmem:[#allocation15_spill] sm:$0xff] %v4408_v29 }
 0x362   :  { %1272 = vmatpush1.bf16.msra.mxu0 %v5982_v28  ;;  %1313 = vmatpush1.bf16.msra.mxu1 %v5983_v31  ;;  %v4411_v31 = vld [vmem:[#allocation5 + $0xec] ss:$16 sps:$4 sm:$0xff]  }
 0x363   :  { %1273 = vmatprep.subr.bf16.mxu0 %v5984_v56  ;;  %1314 = vmatprep.subr.bf16.mxu1 %v5985_v43  ;;  %5993 = vst [vmem:[#allocation16_spill] sm:$0xff] %v4411_v31  ;;  %v3824_v43 = vmov 2  }
 0x364   :  { %3204 = vset.pattern.permute.xlu1 %v3824_v43 }
 0x366   :  { %1274 = vmatpush1.bf16.msra.mxu0 %v5986_v32  ;;  %1315 = vmatpush1.bf16.msra.mxu1 %v5987_v30  ;;  %v5994_v32 = vld [vmem:[#allocation14_spill] sm:$0xff]  ;;  %v5995_v30 = vld [vmem:[#allocation79_spill] sm:$0xff] }
 0x367   :  { %1275 = vmatprep.subr.bf16.mxu0 %v5988_v58  ;;  %1316 = vmatprep.subr.bf16.mxu1 %v5989_v61  ;;  %v996_v58 = vadd.f32 %v4352_v33, %v5995_v30 }
 0x368   :  { %1344 = vperm.xlu1 %3204, %v5994_v32  }
 0x36a   :  { %1276 = vmatpush1.bf16.msra.mxu0 %v5990_v46  ;;  %1317 = vmatpush1.bf16.msra.mxu1 %v5991_v51  ;;  %v998_v51 = vadd.f32 %v4356_v60, %v4267_v52  ;;  %v1039_v60 = vadd.f32 %v4358_v49, %v4276_v1 }
 0x36b   :  { %1355 = vmatprep.subr.bf16.mxu0 %v4408_v29  ;;  %1396 = vmatprep.subr.bf16.mxu1 %v4411_v31  ;;  %v1037_v29 = vadd.f32 %v4354_v34, %v4271_v3 }
 0x40d   :  { %v1194_v61 = vpop.f32.mrf.mxu0  ;;  %v1235_v56 = vpop.f32.mrf.mxu1 }
 0x40e   :  { %v1195_v46 = vadd.f32 %v1194_v61, %v996_v58  ;;  %v1236_v32 = vadd.f32 %v1235_v56, %v1037_v29 }
 0x40f   :  { %v1196_v28 = vpop.f32.mrf.mxu0  ;;  %v1237_v47 = vpop.f32.mrf.mxu1 }
 0x410   :  { %v1242_v57 = vmul.f32 0.5, %v1195_v46  ;;  %v1197_v31 = vadd.f32 %v1196_v28, %v998_v51  ;;  %v1238_v58 = vadd.f32 %v1237_v47, %v1039_v60  ;;  %v4450_v60 = vld [vmem:[#allocation5 + $0xac] ss:$16 sps:$4 sm:$0xff]  }
 0x411   :  { %v1198_v50 = vpop.f32.mrf.mxu0  ;;  %v1239_v43 = vpop.f32.mrf.mxu1 }
 0x412   :  { %3385 = vtanh.f32 %v1242_v57  ;;  %v1246_v41 = vmul.f32 0.5, %v1197_v31  ;;  %v1251_v61 = vmul.f32 0.5, %v1238_v58  ;;  %v4441_v43 = vld [vmem:[#allocation5 + $0xc0] ss:$16 sps:$4 sm:$0xff]  }
 0x413   :  { %v1199_v42 = vpop.f32.mrf.mxu0  ;;  %v1240_v33 = vpop.f32.mrf.mxu1  ;;  %v4453_v58 = vld [vmem:[#allocation5 + $0xa0] ss:$16 sps:$4 sm:$0xff]  }
 0x414   :  { %3387 = vtanh.f32 %v1246_v41  ;;  %v4447_v33 = vld [vmem:[#allocation5 + $0xa4] ss:$16 sps:$4 sm:$0xff]  }
 0x415   :  { %3389 = vtanh.f32 %v1236_v32  ;;  %v4444_v32 = vld [vmem:[#allocation5 + $0xc8] ss:$16 sps:$4 sm:$0xff]  }
 0x416   :  { %3391 = vtanh.f32 %v1251_v61  ;;  %v4456_v61 = vld [vmem:[#allocation5 + $0xa8] ss:$16 sps:$4 sm:$0xff]  }
 0x41f   :  { %v3386_v52 = vpop.eup %3385 }
 0x420   :  { %v1244_v30 = vadd.f32 1.0, %v3386_v52  ;;  %v4427_v52 = vld [vmem:[#allocation5 + $0xe0] ss:$16 sps:$4 sm:$0xff]  }
 0x421   :  { %v3388_v0 = vpop.eup %3387 }
 0x422   :  { %v1245_v34 = vmul.f32 0.5, %v1244_v30  ;;  %v1248_v46 = vadd.f32 1.0, %v3388_v0  ;;  %v3390_v50 = vpop.eup %3389  ;;  %v4430_v0 = vld [vmem:[#allocation5 + $0xe8] ss:$16 sps:$4 sm:$0xff]   ;;  %v4436_v30 = vld [vmem:[#allocation5 + $0xcc] ss:$16 sps:$4 sm:$0xff]  }
 0x423   :  { %v3392_v41 = vpop.eup %3391 }
 0x424   :  { %v1249_v51 = vmul.f32 0.5, %v1248_v46  ;;  %v1256_v57 = vmul.f32 %v3390_v50, %v1245_v34  ;;  %v1253_v28 = vadd.f32 1.0, %v3392_v41  ;;  %v4459_v34 = vld [vmem:[#allocation5 + $0x84] ss:$16 sps:$4 sm:$0xff]   ;;  %v4462_v46 = vld [vmem:[#allocation5 + $0x8c] ss:$16 sps:$4 sm:$0xff]  }
 0x425   :  { %v4465_v50 = vld [vmem:[#allocation5 + $0x80] ss:$16 sps:$4 sm:$0xff]  }
 0x426   :  { %v1255_v29 = vmul.f32 %v1249_v51, %v4279_v54  ;;  %v1254_v49 = vmul.f32 0.5, %v1253_v28  ;;  %v4433_v54 = vld [vmem:[#allocation5 + $0xc4] ss:$16 sps:$4 sm:$0xff]   ;;  %v4468_v51 = vld [vmem:[#allocation5 + $0x88] ss:$16 sps:$4 sm:$0xff]  }
 0x427   :  { %v4477_v41 = vld [vmem:[#allocation5 + $0x60] ss:$16 sps:$4 sm:$0xff]   ;;  %v4480_v28 = vld [vmem:[#allocation5 + $0x68] ss:$16 sps:$4 sm:$0xff]  }
 0x428   :  { %v4424_v42 = vadd.f32 %v1256_v57, %v1255_v29  ;;  %v4471_v57 = vld [vmem:[#allocation5 + $0x64] ss:$16 sps:$4 sm:$0xff]   ;;  %v4474_v29 = vld [vmem:[#allocation5 + $0x6c] ss:$16 sps:$4 sm:$0xff]   ;;  %5996 = vst [vmem:[#allocation17_spill] sm:$0xff] %v4477_v41  ;;  %5997 = vst [vmem:[#allocation18_spill] sm:$0xff] %v4480_v28 }
 0x42a   :  { %3393 = vtanh.f32 %v4424_v42 }
 0x437   :  { %v3394_v47 = vpop.eup %3393 }
 0x438   :  { %v1259_v31 = vmul.f32 %v3394_v47, %v1254_v49  ;;  %v4483_v49 = vld [vmem:[#allocation5 + $0x44] ss:$16 sps:$4 sm:$0xff]   ;;  %v4486_v47 = vld [vmem:[#allocation5 + $0x4c] ss:$16 sps:$4 sm:$0xff]  }
 0x439   :  { %5998 = vst [vmem:[#allocation19_spill] sm:$0xff] %v4483_v49  ;;  %5999 = vst [vmem:[#allocation20_spill] sm:$0xff] %v4486_v47 }
 0x43a   :  { %v1260_v56 = vpack.c.bf16 %v1259_v31, %v1259_v31  ;;  %v4489_v31 = vld [vmem:[#allocation5 + $0x40] ss:$16 sps:$4 sm:$0xff]  }
 0x43b   :  { %6000 = vst [vmem:[#allocation21_spill] sm:$0xff] %v4489_v31 }
 0x43c   :  { %1294 = vmatmul.mubr.bf16.vlgmr.msra.gmra.mxu0 %v1260_v56  ;;  %1335 = vmatmul.mubr.bf16.vlgmr.msra.gmra.mxu1 %v1260_v56  ;;  %v4492_v56 = vld [vmem:[#allocation5 + $0x48] ss:$16 sps:$4 sm:$0xff]  }
 0x43d   :  { %1356 = vmatpush1.bf16.msra.mxu0 %v4427_v52  ;;  %1397 = vmatpush1.bf16.msra.mxu1 %v4430_v0  ;;  %6001 = vst [vmem:[#allocation22_spill] sm:$0xff] %v4492_v56 }
 0x43e   :  { %1357 = vmatprep.subr.bf16.mxu0 %v4433_v54  ;;  %1398 = vmatprep.subr.bf16.mxu1 %v4436_v30 }
 0x43f   :  { %1387 = vmatprep.mubr.bf16.mxu0 %v5897_v39  ;;  %1428 = vmatprep.mubr.bf16.mxu1 %v5897_v39 }
 0x441   :  { %1358 = vmatpush1.bf16.msra.mxu0 %v4441_v43  ;;  %1399 = vmatpush1.bf16.msra.mxu1 %v4444_v32 }
 0x442   :  { %1359 = vmatprep.subr.bf16.mxu0 %v4447_v33  ;;  %1400 = vmatprep.subr.bf16.mxu1 %v4450_v60 }
 0x445   :  { %1360 = vmatpush1.bf16.msra.mxu0 %v4453_v58  ;;  %1401 = vmatpush1.bf16.msra.mxu1 %v4456_v61 }
 0x446   :  { %1361 = vmatprep.subr.bf16.mxu0 %v4459_v34  ;;  %1402 = vmatprep.subr.bf16.mxu1 %v4462_v46 }
 0x449   :  { %1362 = vmatpush1.bf16.msra.mxu0 %v4465_v50  ;;  %1403 = vmatpush1.bf16.msra.mxu1 %v4468_v51 }
 0x44a   :  { %1363 = vmatprep.subr.bf16.mxu0 %v4471_v57  ;;  %1404 = vmatprep.subr.bf16.mxu1 %v4474_v29 }
 0x44d   :  { %1364 = vmatpush1.bf16.msra.mxu0 %v4477_v41  ;;  %1405 = vmatpush1.bf16.msra.mxu1 %v4480_v28  ;;  %v4495_v41 = vld [vmem:[#allocation5 + $0x24] ss:$16 sps:$4 sm:$0xff]   ;;  %v4498_v28 = vld [vmem:[#allocation5 + $0x2c] ss:$16 sps:$4 sm:$0xff]  }
 0x44e   :  { %1365 = vmatprep.subr.bf16.mxu0 %v4483_v49  ;;  %1406 = vmatprep.subr.bf16.mxu1 %v4486_v47  ;;  %6002 = vst [vmem:[#allocation23_spill] sm:$0xff] %v4495_v41  ;;  %6003 = vst [vmem:[#allocation24_spill] sm:$0xff] %v4498_v28  ;;  %v4501_v49 = vld [vmem:[#allocation5 + $0x20] ss:$16 sps:$4 sm:$0xff]   ;;  %v4504_v47 = vld [vmem:[#allocation5 + $0x28] ss:$16 sps:$4 sm:$0xff]  }
 0x44f   :  { %6004 = vst [vmem:[#allocation25_spill] sm:$0xff] %v4504_v47 }
 0x451   :  { %1366 = vmatpush1.bf16.msra.mxu0 %v4489_v31  ;;  %1407 = vmatpush1.bf16.msra.mxu1 %v4492_v56  ;;  %v4507_v31 = vld [vmem:[#allocation5 + $0x4] ss:$16 sps:$4 sm:$0xff]   ;;  %v4510_v56 = vld [vmem:[#allocation5 + $0xc] ss:$16 sps:$4 sm:$0xff]  }
 0x452   :  { %1367 = vmatprep.subr.bf16.mxu0 %v4495_v41  ;;  %1408 = vmatprep.subr.bf16.mxu1 %v4498_v28  ;;  %6005 = vst [vmem:[#allocation26_spill] sm:$0xff] %v4507_v31  ;;  %6006 = vst [vmem:[#allocation27_spill] sm:$0xff] %v4510_v56  ;;  %v4513_v41 = vld [vmem:[#allocation5] ss:$16 sps:$4 sm:$0xff]   ;;  %v4516_v28 = vld [vmem:[#allocation5 + $0x8] ss:$16 sps:$4 sm:$0xff]  }
 0x453   :  { %6007 = vst [vmem:[#allocation28_spill] sm:$0xff] %v4513_v41  ;;  %6008 = vst [vmem:[#allocation29_spill] sm:$0xff] %v4516_v28 }
 0x455   :  { %1368 = vmatpush1.bf16.msra.mxu0 %v4501_v49  ;;  %1409 = vmatpush1.bf16.msra.mxu1 %v4504_v47 }
 0x456   :  { %1369 = vmatprep.subr.bf16.mxu0 %v4507_v31  ;;  %1410 = vmatprep.subr.bf16.mxu1 %v4510_v56 }
 0x459   :  { %1370 = vmatpush1.bf16.msra.mxu0 %v4513_v41  ;;  %1411 = vmatpush1.bf16.msra.mxu1 %v4516_v28 }
 0x45a   :  { %1460 = vmatprep.subr.bf16.mxu0 %v4016_v35  ;;  %1501 = vmatprep.subr.bf16.mxu1 %v4018_v36  ;;  %v6009_v35 = vld [vmem:[#allocation38_spill] sm:$0xff]  ;;  %v6010_v36 = vld [vmem:[#allocation39_spill] sm:$0xff] }
 0x45c   :  { %1388 = vmatmul.mubr.bf16.vlgmr.msra.gmra.mxu0 %v4372_v63  ;;  %1429 = vmatmul.mubr.bf16.vlgmr.msra.gmra.mxu1 %v4372_v63 }
 0x45d   :  { %1461 = vmatpush1.bf16.msra.mxu0 %v4020_v37  ;;  %1502 = vmatpush1.bf16.msra.mxu1 %v4022_v38  ;;  %v6011_v37 = vld [vmem:[#allocation40_spill] sm:$0xff]  ;;  %v6012_v38 = vld [vmem:[#allocation41_spill] sm:$0xff] }
 0x45e   :  { %1462 = vmatprep.subr.bf16.mxu0 %v5930_v4  ;;  %1503 = vmatprep.subr.bf16.mxu1 %v5931_v5  ;;  %v6013_v4 = vld [vmem:[#allocation42_spill] sm:$0xff]  ;;  %v6014_v5 = vld [vmem:[#allocation49_spill] sm:$0xff] }
 0x45f   :  { %1492 = vmatprep.mubr.bf16.mxu0 %v5897_v39  ;;  %1533 = vmatprep.mubr.bf16.mxu1 %v5897_v39 }
 0x461   :  { %1463 = vmatpush1.bf16.msra.mxu0 %v5932_v6  ;;  %1504 = vmatpush1.bf16.msra.mxu1 %v5933_v7  ;;  %v6015_v6 = vld [vmem:[#allocation50_spill] sm:$0xff] }
 0x462   :  { %1464 = vmatprep.subr.bf16.mxu0 %v5934_v8  ;;  %1505 = vmatprep.subr.bf16.mxu1 %v5935_v9 }
 0x465   :  { %1465 = vmatpush1.bf16.msra.mxu0 %v5936_v10  ;;  %1506 = vmatpush1.bf16.msra.mxu1 %v5937_v11 }
 0x466   :  { %1466 = vmatprep.subr.bf16.mxu0 %v5938_v12  ;;  %1507 = vmatprep.subr.bf16.mxu1 %v5939_v13 }
 0x469   :  { %1467 = vmatpush1.bf16.msra.mxu0 %v5940_v14  ;;  %1508 = vmatpush1.bf16.msra.mxu1 %v5941_v15  ;;  %v1345_v15 = vpop.permute.xlu1 %1344 }
 0x46a   :  { %1468 = vmatprep.subr.bf16.mxu0 %v5942_v16  ;;  %1509 = vmatprep.subr.bf16.mxu1 %v5943_v17  ;;  %v6016_v16 = vld [vmem:[#allocation43_spill] sm:$0xff] }
 0x46b   :  { %v1347_v17 = vmul.f32 %v1345_v15, %v6016_v16 }
 0x46d   :  { %1469 = vmatpush1.bf16.msra.mxu0 %v5944_v18  ;;  %1510 = vmatpush1.bf16.msra.mxu1 %v5945_v19  ;;  %v6017_v18 = vld [vmem:[#allocation44_spill] sm:$0xff] }
 0x46e   :  { %1470 = vmatprep.subr.bf16.mxu0 %v5946_v20  ;;  %1511 = vmatprep.subr.bf16.mxu1 %v5947_v21  ;;  %v1348_v19 = vmul.f32 %v1345_v15, %v6017_v18  ;;  %v6018_v20 = vld [vmem:[#allocation45_spill] sm:$0xff] }
 0x46f   :  { %v1351_v21 = vadd.f32 %v1347_v17, %v6018_v20 }
 0x471   :  { %1471 = vmatpush1.bf16.msra.mxu0 %v5948_v22  ;;  %1512 = vmatpush1.bf16.msra.mxu1 %v5949_v23  ;;  %v6019_v22 = vld [vmem:[#allocation46_spill] sm:$0xff] }
 0x472   :  { %1472 = vmatprep.subr.bf16.mxu0 %v5950_v24  ;;  %1513 = vmatprep.subr.bf16.mxu1 %v5951_v25  ;;  %v1349_v23 = vmul.f32 %v1345_v15, %v6019_v22  ;;  %v6020_v24 = vld [vmem:[#allocation47_spill] sm:$0xff] }
 0x473   :  { %v1352_v25 = vadd.f32 %v1348_v19, %v6020_v24 }
 0x475   :  { %1473 = vmatpush1.bf16.msra.mxu0 %v5952_v26  ;;  %1514 = vmatpush1.bf16.msra.mxu1 %v6009_v35 }
 0x476   :  { %1474 = vmatprep.subr.bf16.mxu0 %v6010_v36  ;;  %1515 = vmatprep.subr.bf16.mxu1 %v6011_v37 }
 0x479   :  { %1475 = vmatpush1.bf16.msra.mxu0 %v6012_v38  ;;  %1516 = vmatpush1.bf16.msra.mxu1 %v6013_v4  ;;  %v1353_v4 = vadd.f32 %v1349_v23, %v4143_v48 }
 0x47a   :  { %1561 = vmatprep.subr.bf16.mxu0 %v6014_v5  ;;  %1602 = vmatprep.subr.bf16.mxu1 %v6015_v6 }
 0x4fc   :  { %v4557_v7 = vpop.f32.mrf.mxu0  ;;  %v4559_v8 = vpop.f32.mrf.mxu1 }
 0x4fe   :  { %v4561_v9 = vpop.f32.mrf.mxu0  ;;  %v4563_v10 = vpop.f32.mrf.mxu1 }
 0x500   :  { %v1299_v11 = vpop.f32.mrf.mxu0  ;;  %v1340_v12 = vpop.f32.mrf.mxu1 }
 0x502   :  { %v1300_v13 = vpop.f32.mrf.mxu0  ;;  %v1341_v14 = vpop.f32.mrf.mxu1 }
 0x503   :  { %v1350_v13 = vmul.f32 %v1345_v15, %v5963_v2 }
 0x505   :  { %v1354_v19 = vadd.f32 %v1350_v13, %v4152_v53  ;;  %v6028_v13 = vld [vmem:[#allocation62_spill] sm:$0xff] }
 0x51c   :  { %v1389_v26 = vpop.f32.mrf.mxu0  ;;  %v1430_v63 = vpop.f32.mrf.mxu1 }
 0x51d   :  { %v1437_v35 = vadd.f32 %v1389_v26, %v1351_v21  ;;  %v1439_v22 = vadd.f32 %v1430_v63, %v1353_v4 }
 0x51e   :  { %v1391_v36 = vpop.f32.mrf.mxu0  ;;  %v1432_v37 = vpop.f32.mrf.mxu1 }
 0x51f   :  { %v1441_v38 = vmul.f32 0.5, %v1437_v35  ;;  %v1438_v5 = vadd.f32 %v1391_v36, %v1352_v25  ;;  %v1440_v21 = vadd.f32 %v1432_v37, %v1354_v19  ;;  %v6033_v19 = vld [vmem:[#allocation67_spill] sm:$0xff] }
 0x520   :  { %v1393_v6 = vpop.f32.mrf.mxu0  ;;  %v1434_v11 = vpop.f32.mrf.mxu1 }
 0x521   :  { %3395 = vtanh.f32 %v1441_v38  ;;  %v1445_v12 = vmul.f32 0.5, %v1438_v5  ;;  %v1450_v26 = vmul.f32 0.5, %v1440_v21  ;;  %v6034_v21 = vld [vmem:[#allocation68_spill] sm:$0xff] }
 0x522   :  { %v1394_v14 = vpop.f32.mrf.mxu0  ;;  %v1435_v17 = vpop.f32.mrf.mxu1 }
 0x523   :  { %3397 = vtanh.f32 %v1445_v12  ;;  %v6029_v14 = vld [vmem:[#allocation63_spill] sm:$0xff]  ;;  %v6032_v17 = vld [vmem:[#allocation66_spill] sm:$0xff] }
 0x524   :  { %3399 = vtanh.f32 %v1439_v22 }
 0x525   :  { %3401 = vtanh.f32 %v1450_v26  ;;  %v6035_v26 = vld [vmem:[#allocation69_spill] sm:$0xff] }
 0x52e   :  { %v3396_v24 = vpop.eup %3395 }
 0x52f   :  { %v1443_v35 = vadd.f32 1.0, %v3396_v24  ;;  %v6023_v24 = vld [vmem:[#allocation57_spill] sm:$0xff] }
 0x530   :  { %v3398_v20 = vpop.eup %3397 }
 0x531   :  { %v1444_v23 = vmul.f32 0.5, %v1443_v35  ;;  %v1447_v25 = vadd.f32 1.0, %v3398_v20  ;;  %v3400_v38 = vpop.eup %3399  ;;  %v6022_v20 = vld [vmem:[#allocation56_spill] sm:$0xff]  ;;  %v6036_v35 = vld [vmem:[#allocation70_spill] sm:$0xff] }
 0x532   :  { %v3402_v63 = vpop.eup %3401 }
 0x533   :  { %v1448_v36 = vmul.f32 0.5, %v1447_v25  ;;  %v1455_v15 = vmul.f32 %v3400_v38, %v1444_v23  ;;  %v1452_v4 = vadd.f32 1.0, %v3402_v63  ;;  %v6037_v23 = vld [vmem:[#allocation71_spill] sm:$0xff]  ;;  %v6038_v25 = vld [vmem:[#allocation72_spill] sm:$0xff]  ;;  %v6040_v38 = vld [vmem:[#allocation74_spill] sm:$0xff] }
 0x534   :  { %v6043_v63 = vld [vmem:[#allocation77_spill] sm:$0xff] }
 0x535   :  { %v1454_v5 = vmul.f32 %v1448_v36, %v4369_v40  ;;  %v1453_v22 = vmul.f32 0.5, %v1452_v4  ;;  %v6021_v40 = vld [vmem:[#allocation55_spill] sm:$0xff]  ;;  %v6039_v36 = vld [vmem:[#allocation73_spill] sm:$0xff]  ;;  %v6044_v4 = vld [vmem:[#allocation78_spill] sm:$0xff] }
 0x537   :  { %v4574_v6 = vadd.f32 %v1455_v15, %v1454_v5  ;;  %v6041_v5 = vld [vmem:[#allocation75_spill] sm:$0xff]  ;;  %v6042_v15 = vld [vmem:[#allocation76_spill] sm:$0xff] }
 0x539   :  { %3403 = vtanh.f32 %v4574_v6 }
 0x546   :  { %v3404_v37 = vpop.eup %3403 }
 0x547   :  { %v1458_v11 = vmul.f32 %v3404_v37, %v1453_v22  ;;  %v6045_v22 = vld [vmem:[#allocation15_spill] sm:$0xff]  ;;  %v6046_v37 = vld [vmem:[#allocation16_spill] sm:$0xff] }
 0x549   :  { %v4577_v12 = vpack.c.bf16 %v1458_v11, %v1458_v11  ;;  %v3825_v11 = vmov 3  }
 0x54a   :  { %3205 = vset.pattern.permute.xlu1 %v3825_v11 }
 0x54b   :  { %1493 = vmatmul.mubr.bf16.vlgmr.msra.gmra.mxu0 %v4577_v12  ;;  %1534 = vmatmul.mubr.bf16.vlgmr.msra.gmra.mxu1 %v4577_v12 }
 0x54c   :  { %1562 = vmatpush1.bf16.msra.mxu0 %v4168_v62  ;;  %1603 = vmatpush1.bf16.msra.mxu1 %v4170_v45  ;;  %v6024_v62 = vld [vmem:[#allocation58_spill] sm:$0xff]  ;;  %v6025_v45 = vld [vmem:[#allocation59_spill] sm:$0xff] }
 0x54d   :  { %1563 = vmatprep.subr.bf16.mxu0 %v5964_v44  ;;  %1604 = vmatprep.subr.bf16.mxu1 %v5965_v27  ;;  %v6026_v44 = vld [vmem:[#allocation60_spill] sm:$0xff]  ;;  %v6027_v27 = vld [vmem:[#allocation61_spill] sm:$0xff] }
 0x54e   :  { %1593 = vmatprep.mubr.bf16.mxu0 %v5897_v39  ;;  %1634 = vmatprep.mubr.bf16.mxu1 %v5897_v39 }
 0x550   :  { %1564 = vmatpush1.bf16.msra.mxu0 %v5966_v59  ;;  %1605 = vmatpush1.bf16.msra.mxu1 %v5967_v55  ;;  %v6030_v59 = vld [vmem:[#allocation64_spill] sm:$0xff]  ;;  %v6031_v55 = vld [vmem:[#allocation65_spill] sm:$0xff] }
 0x551   :  { %1565 = vmatprep.subr.bf16.mxu0 %v6021_v40  ;;  %1606 = vmatprep.subr.bf16.mxu1 %v6022_v20  ;;  %v4618_v40 = vld [vmem:[%s5517_s0] sm:$0x3]  ;;  %v6048_v20 = vld [vmem:[#allocation79_spill] sm:$0xff] }
 0x552   :  { %6047 = vst [vmem:[#allocation30_spill] sm:$0xff] %v4618_v40  ;;  %1644 = vperm.xlu1 %3205, %v4618_v40  }
 0x554   :  { %1566 = vmatpush1.bf16.msra.mxu0 %v6023_v24  ;;  %1607 = vmatpush1.bf16.msra.mxu1 %v6024_v62  ;;  %v1296_v24 = vadd.f32 %v4557_v7, %v6048_v20 }
 0x555   :  { %1567 = vmatprep.subr.bf16.mxu0 %v6025_v45  ;;  %1608 = vmatprep.subr.bf16.mxu1 %v6026_v44  ;;  %v6049_v44 = vld [vmem:[#allocation80_spill] sm:$0xff] }
 0x558   :  { %1568 = vmatpush1.bf16.msra.mxu0 %v6027_v27  ;;  %1609 = vmatpush1.bf16.msra.mxu1 %v6028_v13  ;;  %v1298_v27 = vadd.f32 %v4561_v9, %v6049_v44  ;;  %v1339_v9 = vadd.f32 %v4563_v10, %v4276_v1 }
 0x559   :  { %1569 = vmatprep.subr.bf16.mxu0 %v6029_v14  ;;  %1610 = vmatprep.subr.bf16.mxu1 %v6030_v59 }
 0x55c   :  { %1570 = vmatpush1.bf16.msra.mxu0 %v6031_v55  ;;  %1611 = vmatpush1.bf16.msra.mxu1 %v6032_v17  ;;  %v1337_v55 = vadd.f32 %v4559_v8, %v4271_v3 }
 0x55d   :  { %1571 = vmatprep.subr.bf16.mxu0 %v6033_v19  ;;  %1612 = vmatprep.subr.bf16.mxu1 %v6034_v21 }
 0x560   :  { %1572 = vmatpush1.bf16.msra.mxu0 %v6035_v26  ;;  %1613 = vmatpush1.bf16.msra.mxu1 %v6036_v35 }
 0x561   :  { %1573 = vmatprep.subr.bf16.mxu0 %v6037_v23  ;;  %1614 = vmatprep.subr.bf16.mxu1 %v6038_v25 }
 0x564   :  { %1574 = vmatpush1.bf16.msra.mxu0 %v6039_v36  ;;  %1615 = vmatpush1.bf16.msra.mxu1 %v6040_v38 }
 0x565   :  { %1575 = vmatprep.subr.bf16.mxu0 %v6041_v5  ;;  %1616 = vmatprep.subr.bf16.mxu1 %v6042_v15 }
 0x568   :  { %1576 = vmatpush1.bf16.msra.mxu0 %v6043_v63  ;;  %1617 = vmatpush1.bf16.msra.mxu1 %v6044_v4 }
 0x569   :  { %1655 = vmatprep.subr.bf16.mxu0 %v6045_v22  ;;  %1696 = vmatprep.subr.bf16.mxu1 %v6046_v37 }
 0x60b   :  { %v1494_v62 = vpop.f32.mrf.mxu0  ;;  %v1535_v45 = vpop.f32.mrf.mxu1 }
 0x60c   :  { %v1495_v13 = vadd.f32 %v1494_v62, %v1296_v24  ;;  %v1536_v35 = vadd.f32 %v1535_v45, %v1337_v55 }
 0x60d   :  { %v1496_v14 = vpop.f32.mrf.mxu0  ;;  %v1537_v59 = vpop.f32.mrf.mxu1 }
 0x60e   :  { %v1542_v17 = vmul.f32 0.5, %v1495_v13  ;;  %v1497_v19 = vadd.f32 %v1496_v14, %v1298_v27  ;;  %v1538_v36 = vadd.f32 %v1537_v59, %v1339_v9  ;;  %v4665_v9 = vld [vmem:[#allocation7 + $0xe4] ss:$16 sps:$4 sm:$0xff]  }
 0x60f   :  { %v1498_v21 = vpop.f32.mrf.mxu0  ;;  %v1539_v26 = vpop.f32.mrf.mxu1  ;;  %6058 = vst [vmem:[#allocation31_spill] sm:$0xff] %v4665_v9 }
 0x610   :  { %3405 = vtanh.f32 %v1542_v17  ;;  %v1546_v23 = vmul.f32 0.5, %v1497_v19  ;;  %v1551_v38 = vmul.f32 0.5, %v1538_v36  ;;  %v6051_v19 = vld [vmem:[#allocation18_spill] sm:$0xff]  ;;  %v6052_v21 = vld [vmem:[#allocation19_spill] sm:$0xff]  ;;  %v6053_v26 = vld [vmem:[#allocation20_spill] sm:$0xff] }
 0x611   :  { %v1499_v25 = vpop.f32.mrf.mxu0  ;;  %v1540_v7 = vpop.f32.mrf.mxu1  ;;  %v4668_v36 = vld [vmem:[#allocation7 + $0xec] ss:$16 sps:$4 sm:$0xff]  }
 0x612   :  { %3407 = vtanh.f32 %v1546_v23  ;;  %v6055_v23 = vld [vmem:[#allocation22_spill] sm:$0xff]  ;;  %v6056_v25 = vld [vmem:[#allocation23_spill] sm:$0xff]  ;;  %v6057_v7 = vld [vmem:[#allocation24_spill] sm:$0xff]  ;;  %6059 = vst [vmem:[#allocation32_spill] sm:$0xff] %v4668_v36 }
 0x613   :  { %3409 = vtanh.f32 %v1536_v35  ;;  %v6054_v35 = vld [vmem:[#allocation21_spill] sm:$0xff] }
 0x614   :  { %3411 = vtanh.f32 %v1551_v38  ;;  %v4673_v38 = vld [vmem:[#allocation7 + $0xe0] ss:$16 sps:$4 sm:$0xff]  }
 0x615   :  { %6060 = vst [vmem:[#allocation33_spill] sm:$0xff] %v4673_v38 }
 0x61d   :  { %v3406_v5 = vpop.eup %3405 }
 0x61e   :  { %v1544_v15 = vadd.f32 1.0, %v3406_v5  ;;  %v4676_v5 = vld [vmem:[#allocation7 + $0xe8] ss:$16 sps:$4 sm:$0xff]  }
 0x61f   :  { %v3408_v63 = vpop.eup %3407  ;;  %6061 = vst [vmem:[#allocation34_spill] sm:$0xff] %v4676_v5 }
 0x620   :  { %v1545_v8 = vmul.f32 0.5, %v1544_v15  ;;  %v1548_v4 = vadd.f32 1.0, %v3408_v63  ;;  %v3410_v11 = vpop.eup %3409  ;;  %v4679_v15 = vld [vmem:[#allocation7 + $0xc4] ss:$16 sps:$4 sm:$0xff]   ;;  %v4682_v63 = vld [vmem:[#allocation7 + $0xcc] ss:$16 sps:$4 sm:$0xff]  }
 0x621   :  { %v3412_v13 = vpop.eup %3411  ;;  %6062 = vst [vmem:[#allocation35_spill] sm:$0xff] %v4679_v15  ;;  %6063 = vst [vmem:[#allocation36_spill] sm:$0xff] %v4682_v63 }
 0x622   :  { %v1549_v24 = vmul.f32 0.5, %v1548_v4  ;;  %v1556_v62 = vmul.f32 %v3410_v11, %v1545_v8  ;;  %v1553_v14 = vadd.f32 1.0, %v3412_v13  ;;  %v4690_v8 = vld [vmem:[#allocation7 + $0xc8] ss:$16 sps:$4 sm:$0xff]   ;;  %v4693_v4 = vld [vmem:[#allocation7 + $0xa4] ss:$16 sps:$4 sm:$0xff]  }
 0x623   :  { %6065 = vst [vmem:[#allocation48_spill] sm:$0xff] %v4690_v8  ;;  %6066 = vst [vmem:[#allocation51_spill] sm:$0xff] %v4693_v4  ;;  %v4696_v11 = vld [vmem:[#allocation7 + $0xac] ss:$16 sps:$4 sm:$0xff]  }
 0x624   :  { %v1555_v45 = vmul.f32 %v1549_v24, %v4424_v42  ;;  %v1554_v10 = vmul.f32 0.5, %v1553_v14  ;;  %v6050_v42 = vld [vmem:[#allocation17_spill] sm:$0xff]  ;;  %6067 = vst [vmem:[#allocation52_spill] sm:$0xff] %v4696_v11 }
 0x625   :  { %v4699_v24 = vld [vmem:[#allocation7 + $0xa0] ss:$16 sps:$4 sm:$0xff]   ;;  %v4708_v13 = vld [vmem:[#allocation7 + $0x8c] ss:$16 sps:$4 sm:$0xff]  }
 0x626   :  { %v4630_v27 = vadd.f32 %v1556_v62, %v1555_v45  ;;  %6068 = vst [vmem:[#allocation53_spill] sm:$0xff] %v4699_v24  ;;  %v4702_v62 = vld [vmem:[#allocation7 + $0xa8] ss:$16 sps:$4 sm:$0xff]   ;;  %v4705_v45 = vld [vmem:[#allocation7 + $0x84] ss:$16 sps:$4 sm:$0xff]   ;;  %6071 = vst [vmem:[#allocation38_spill] sm:$0xff] %v4708_v13 }
 0x627   :  { %6069 = vst [vmem:[#allocation54_spill] sm:$0xff] %v4702_v62  ;;  %6070 = vst [vmem:[#allocation14_spill] sm:$0xff] %v4705_v45  ;;  %v4711_v14 = vld [vmem:[#allocation7 + $0x80] ss:$16 sps:$4 sm:$0xff]  }
 0x628   :  { %3413 = vtanh.f32 %v4630_v27  ;;  %6072 = vst [vmem:[#allocation39_spill] sm:$0xff] %v4711_v14 }
 0x635   :  { %v3414_v59 = vpop.eup %3413 }
 0x636   :  { %v1559_v55 = vmul.f32 %v3414_v59, %v1554_v10  ;;  %v4714_v10 = vld [vmem:[#allocation7 + $0x88] ss:$16 sps:$4 sm:$0xff]   ;;  %v4717_v59 = vld [vmem:[#allocation7 + $0x64] ss:$16 sps:$4 sm:$0xff]  }
 0x637   :  { %6073 = vst [vmem:[#allocation40_spill] sm:$0xff] %v4714_v10  ;;  %6074 = vst [vmem:[#allocation41_spill] sm:$0xff] %v4717_v59 }
 0x638   :  { %v1560_v17 = vpack.c.bf16 %v1559_v55, %v1559_v55  ;;  %v4720_v55 = vld [vmem:[#allocation7 + $0x6c] ss:$16 sps:$4 sm:$0xff]  }
 0x639   :  { %6075 = vst [vmem:[#allocation42_spill] sm:$0xff] %v4720_v55 }
 0x63a   :  { %1594 = vmatmul.mubr.bf16.vlgmr.msra.gmra.mxu0 %v1560_v17  ;;  %1635 = vmatmul.mubr.bf16.vlgmr.msra.gmra.mxu1 %v1560_v17  ;;  %v4723_v17 = vld [vmem:[#allocation7 + $0x60] ss:$16 sps:$4 sm:$0xff]  }
 0x63b   :  { %1656 = vmatpush1.bf16.msra.mxu0 %v4427_v52  ;;  %1697 = vmatpush1.bf16.msra.mxu1 %v4430_v0  ;;  %6076 = vst [vmem:[#allocation49_spill] sm:$0xff] %v4723_v17 }
 0x63c   :  { %1657 = vmatprep.subr.bf16.mxu0 %v4433_v54  ;;  %1698 = vmatprep.subr.bf16.mxu1 %v4436_v30 }
 0x63d   :  { %1687 = vmatprep.mubr.bf16.mxu0 %v5897_v39  ;;  %1728 = vmatprep.mubr.bf16.mxu1 %v5897_v39 }
 0x63f   :  { %1658 = vmatpush1.bf16.msra.mxu0 %v4441_v43  ;;  %1699 = vmatpush1.bf16.msra.mxu1 %v4444_v32 }
 0x640   :  { %1659 = vmatprep.subr.bf16.mxu0 %v4447_v33  ;;  %1700 = vmatprep.subr.bf16.mxu1 %v4450_v60 }
 0x643   :  { %1660 = vmatpush1.bf16.msra.mxu0 %v4453_v58  ;;  %1701 = vmatpush1.bf16.msra.mxu1 %v4456_v61 }
 0x644   :  { %1661 = vmatprep.subr.bf16.mxu0 %v4459_v34  ;;  %1702 = vmatprep.subr.bf16.mxu1 %v4462_v46 }
 0x647   :  { %1662 = vmatpush1.bf16.msra.mxu0 %v4465_v50  ;;  %1703 = vmatpush1.bf16.msra.mxu1 %v4468_v51 }
 0x648   :  { %1663 = vmatprep.subr.bf16.mxu0 %v4471_v57  ;;  %1704 = vmatprep.subr.bf16.mxu1 %v4474_v29 }
 0x64b   :  { %1664 = vmatpush1.bf16.msra.mxu0 %v6050_v42  ;;  %1705 = vmatpush1.bf16.msra.mxu1 %v6051_v19 }
 0x64c   :  { %1665 = vmatprep.subr.bf16.mxu0 %v6052_v21  ;;  %1706 = vmatprep.subr.bf16.mxu1 %v6053_v26 }
 0x64f   :  { %1666 = vmatpush1.bf16.msra.mxu0 %v6054_v35  ;;  %1707 = vmatpush1.bf16.msra.mxu1 %v6055_v23 }
 0x650   :  { %1667 = vmatprep.subr.bf16.mxu0 %v6056_v25  ;;  %1708 = vmatprep.subr.bf16.mxu1 %v6057_v7 }
 0x653   :  { %1668 = vmatpush1.bf16.msra.mxu0 %v4501_v49  ;;  %1709 = vmatpush1.bf16.msra.mxu1 %v4504_v47 }
 0x654   :  { %1669 = vmatprep.subr.bf16.mxu0 %v4507_v31  ;;  %1710 = vmatprep.subr.bf16.mxu1 %v4510_v56 }
 0x657   :  { %1670 = vmatpush1.bf16.msra.mxu0 %v4513_v41  ;;  %1711 = vmatpush1.bf16.msra.mxu1 %v4516_v28 }
 0x658   :  { %1760 = vmatprep.subr.bf16.mxu0 %v4665_v9  ;;  %1801 = vmatprep.subr.bf16.mxu1 %v4668_v36 }
 0x65a   :  { %1688 = vmatmul.mubr.bf16.vlgmr.msra.gmra.mxu0 %v4577_v12  ;;  %1729 = vmatmul.mubr.bf16.vlgmr.msra.gmra.mxu1 %v4577_v12  ;;  %v4687_v12 = vld [vmem:[#allocation7 + $0xc0] ss:$16 sps:$4 sm:$0xff]  }
 0x65b   :  { %1761 = vmatpush1.bf16.msra.mxu0 %v4673_v38  ;;  %1802 = vmatpush1.bf16.msra.mxu1 %v4676_v5  ;;  %6064 = vst [vmem:[#allocation37_spill] sm:$0xff] %v4687_v12  ;;  %v6094_v5 = vld [vmem:[#allocation47_spill] sm:$0xff] }
 0x65c   :  { %1762 = vmatprep.subr.bf16.mxu0 %v4679_v15  ;;  %1803 = vmatprep.subr.bf16.mxu1 %v4682_v63 }
 0x65d   :  { %1792 = vmatprep.mubr.bf16.mxu0 %v5897_v39  ;;  %1833 = vmatprep.mubr.bf16.mxu1 %v5897_v39 }
 0x65f   :  { %1763 = vmatpush1.bf16.msra.mxu0 %v4687_v12  ;;  %1804 = vmatpush1.bf16.msra.mxu1 %v4690_v8  ;;  %v6092_v12 = vld [vmem:[#allocation45_spill] sm:$0xff] }
 0x660   :  { %1764 = vmatprep.subr.bf16.mxu0 %v4693_v4  ;;  %1805 = vmatprep.subr.bf16.mxu1 %v4696_v11  ;;  %v1645_v4 = vpop.permute.xlu1 %1644 }
 0x661   :  { %v1647_v8 = vmul.f32 %v1645_v4, %v6016_v16 }
 0x663   :  { %1765 = vmatpush1.bf16.msra.mxu0 %v4699_v24  ;;  %1806 = vmatpush1.bf16.msra.mxu1 %v4702_v62  ;;  %v1651_v63 = vadd.f32 %v1647_v8, %v6092_v12 }
 0x664   :  { %1766 = vmatprep.subr.bf16.mxu0 %v4705_v45  ;;  %1807 = vmatprep.subr.bf16.mxu1 %v4708_v13  ;;  %v4726_v13 = vld [vmem:[#allocation7 + $0x68] ss:$16 sps:$4 sm:$0xff]  }
 0x665   :  { %6077 = vst [vmem:[#allocation50_spill] sm:$0xff] %v4726_v13 }
 0x667   :  { %1767 = vmatpush1.bf16.msra.mxu0 %v4711_v14  ;;  %1808 = vmatpush1.bf16.msra.mxu1 %v4714_v10  ;;  %v4729_v14 = vld [vmem:[#allocation7 + $0x44] ss:$16 sps:$4 sm:$0xff]   ;;  %v4732_v10 = vld [vmem:[#allocation7 + $0x4c] ss:$16 sps:$4 sm:$0xff]  }
 0x668   :  { %1768 = vmatprep.subr.bf16.mxu0 %v4717_v59  ;;  %1809 = vmatprep.subr.bf16.mxu1 %v4720_v55  ;;  %6078 = vst [vmem:[#allocation55_spill] sm:$0xff] %v4729_v14  ;;  %6079 = vst [vmem:[#allocation56_spill] sm:$0xff] %v4732_v10  ;;  %v4735_v59 = vld [vmem:[#allocation7 + $0x40] ss:$16 sps:$4 sm:$0xff]   ;;  %v4738_v55 = vld [vmem:[#allocation7 + $0x48] ss:$16 sps:$4 sm:$0xff]  }
 0x669   :  { %6080 = vst [vmem:[#allocation57_spill] sm:$0xff] %v4735_v59  ;;  %6081 = vst [vmem:[#allocation58_spill] sm:$0xff] %v4738_v55 }
 0x66b   :  { %1769 = vmatpush1.bf16.msra.mxu0 %v4723_v17  ;;  %1810 = vmatpush1.bf16.msra.mxu1 %v4726_v13  ;;  %v4741_v17 = vld [vmem:[#allocation7 + $0x24] ss:$16 sps:$4 sm:$0xff]   ;;  %v4744_v13 = vld [vmem:[#allocation7 + $0x2c] ss:$16 sps:$4 sm:$0xff]  }
 0x66c   :  { %1770 = vmatprep.subr.bf16.mxu0 %v4729_v14  ;;  %1811 = vmatprep.subr.bf16.mxu1 %v4732_v10  ;;  %6082 = vst [vmem:[#allocation59_spill] sm:$0xff] %v4741_v17  ;;  %6083 = vst [vmem:[#allocation60_spill] sm:$0xff] %v4744_v13  ;;  %v4747_v14 = vld [vmem:[#allocation7 + $0x20] ss:$16 sps:$4 sm:$0xff]   ;;  %v4750_v10 = vld [vmem:[#allocation7 + $0x28] ss:$16 sps:$4 sm:$0xff]  }
 0x66d   :  { %6084 = vst [vmem:[#allocation61_spill] sm:$0xff] %v4747_v14  ;;  %6085 = vst [vmem:[#allocation62_spill] sm:$0xff] %v4750_v10 }
 0x66f   :  { %1771 = vmatpush1.bf16.msra.mxu0 %v4735_v59  ;;  %1812 = vmatpush1.bf16.msra.mxu1 %v4738_v55  ;;  %v4753_v59 = vld [vmem:[#allocation7 + $0x4] ss:$16 sps:$4 sm:$0xff]   ;;  %v4756_v55 = vld [vmem:[#allocation7 + $0xc] ss:$16 sps:$4 sm:$0xff]  }
 0x670   :  { %1772 = vmatprep.subr.bf16.mxu0 %v4741_v17  ;;  %1813 = vmatprep.subr.bf16.mxu1 %v4744_v13  ;;  %6086 = vst [vmem:[#allocation63_spill] sm:$0xff] %v4753_v59  ;;  %6087 = vst [vmem:[#allocation64_spill] sm:$0xff] %v4756_v55  ;;  %v4759_v17 = vld [vmem:[#allocation7] ss:$16 sps:$4 sm:$0xff]   ;;  %v4762_v13 = vld [vmem:[#allocation7 + $0x8] ss:$16 sps:$4 sm:$0xff]  }
 0x671   :  { %6088 = vst [vmem:[#allocation65_spill] sm:$0xff] %v4759_v17  ;;  %6089 = vst [vmem:[#allocation66_spill] sm:$0xff] %v4762_v13 }
 0x673   :  { %1773 = vmatpush1.bf16.msra.mxu0 %v4747_v14  ;;  %1814 = vmatpush1.bf16.msra.mxu1 %v4750_v10  ;;  %v4765_v14 = vld [vmem:[#allocation8 + $0xe4] ss:$16 sps:$4 sm:$0xff]   ;;  %v4768_v10 = vld [vmem:[#allocation8 + $0xec] ss:$16 sps:$4 sm:$0xff]  }
 0x674   :  { %1774 = vmatprep.subr.bf16.mxu0 %v4753_v59  ;;  %1815 = vmatprep.subr.bf16.mxu1 %v4756_v55  ;;  %6090 = vst [vmem:[#allocation67_spill] sm:$0xff] %v4765_v14  ;;  %6091 = vst [vmem:[#allocation68_spill] sm:$0xff] %v4768_v10 }
 0x677   :  { %1775 = vmatpush1.bf16.msra.mxu0 %v4759_v17  ;;  %1816 = vmatpush1.bf16.msra.mxu1 %v4762_v13 }
 0x678   :  { %1861 = vmatprep.subr.bf16.mxu0 %v4765_v14  ;;  %1902 = vmatprep.subr.bf16.mxu1 %v4768_v10  ;;  %v1648_v14 = vmul.f32 %v1645_v4, %v6017_v18  ;;  %v6093_v10 = vld [vmem:[#allocation46_spill] sm:$0xff]  ;;  %v1650_v18 = vmul.f32 %v1645_v4, %v5963_v2 }
 0x679   :  { %v1649_v15 = vmul.f32 %v1645_v4, %v6093_v10 }
 0x67a   :  { %v1652_v38 = vadd.f32 %v1648_v14, %v6094_v5  ;;  %v1654_v14 = vadd.f32 %v1650_v18, %v4152_v53 }
 0x6fa   :  { %v4771_v59 = vpop.f32.mrf.mxu0  ;;  %v4773_v45 = vpop.f32.mrf.mxu1 }
 0x6fc   :  { %v4775_v55 = vpop.f32.mrf.mxu0  ;;  %v4777_v62 = vpop.f32.mrf.mxu1 }
 0x6fe   :  { %v1599_v17 = vpop.f32.mrf.mxu0  ;;  %v1640_v24 = vpop.f32.mrf.mxu1 }
 0x700   :  { %v1600_v11 = vpop.f32.mrf.mxu0  ;;  %v1641_v13 = vpop.f32.mrf.mxu1 }
 0x701   :  { %v1653_v11 = vadd.f32 %v1649_v15, %v4143_v48 }
 0x71a   :  { %v1689_v36 = vpop.f32.mrf.mxu0  ;;  %v1730_v9 = vpop.f32.mrf.mxu1 }
 0x71b   :  { %v1737_v28 = vadd.f32 %v1689_v36, %v1651_v63  ;;  %v1739_v10 = vadd.f32 %v1730_v9, %v1653_v11  ;;  %v4804_v11 = vld [vmem:[#allocation8 + $0xcc] ss:$16 sps:$4 sm:$0xff]  }
 0x71c   :  { %v1691_v41 = vpop.f32.mrf.mxu0  ;;  %v1732_v56 = vpop.f32.mrf.mxu1 }
 0x71d   :  { %v1741_v17 = vmul.f32 0.5, %v1737_v28  ;;  %v1738_v24 = vadd.f32 %v1691_v41, %v1652_v38  ;;  %v1740_v36 = vadd.f32 %v1732_v56, %v1654_v14  ;;  %v4815_v14 = vld [vmem:[#allocation8 + $0xa4] ss:$16 sps:$4 sm:$0xff]  }
 0x71e   :  { %v1693_v13 = vpop.f32.mrf.mxu0  ;;  %v1734_v31 = vpop.f32.mrf.mxu1 }
 0x71f   :  { %3415 = vtanh.f32 %v1741_v17  ;;  %v1745_v16 = vmul.f32 0.5, %v1738_v24  ;;  %v1750_v63 = vmul.f32 0.5, %v1740_v36  ;;  %v4809_v13 = vld [vmem:[#allocation8 + $0xc0] ss:$16 sps:$4 sm:$0xff]   ;;  %v4818_v36 = vld [vmem:[#allocation8 + $0xac] ss:$16 sps:$4 sm:$0xff]  }
 0x720   :  { %v1694_v8 = vpop.f32.mrf.mxu0  ;;  %v1735_v12 = vpop.f32.mrf.mxu1 }
 0x721   :  { %3417 = vtanh.f32 %v1745_v16  ;;  %v4812_v8 = vld [vmem:[#allocation8 + $0xc8] ss:$16 sps:$4 sm:$0xff]  }
 0x722   :  { %3419 = vtanh.f32 %v1739_v10 }
 0x723   :  { %3421 = vtanh.f32 %v1750_v63  ;;  %v4821_v63 = vld [vmem:[#allocation8 + $0xa0] ss:$16 sps:$4 sm:$0xff]  }
 0x724   :  { %6095 = vst [vmem:[#allocation69_spill] sm:$0xff] %v4821_v63 }
 0x72c   :  { %v3416_v5 = vpop.eup %3415 }
 0x72d   :  { %v1743_v28 = vadd.f32 1.0, %v3416_v5  ;;  %v4801_v5 = vld [vmem:[#allocation8 + $0xc4] ss:$16 sps:$4 sm:$0xff]  }
 0x72e   :  { %v3418_v47 = vpop.eup %3417 }
 0x72f   :  { %v1744_v15 = vmul.f32 0.5, %v1743_v28  ;;  %v1747_v41 = vadd.f32 1.0, %v3418_v47  ;;  %v3420_v38 = vpop.eup %3419  ;;  %v4795_v47 = vld [vmem:[#allocation8 + $0xe0] ss:$16 sps:$4 sm:$0xff]   ;;  %v4824_v28 = vld [vmem:[#allocation8 + $0xa8] ss:$16 sps:$4 sm:$0xff]  }
 0x730   :  { %v3422_v16 = vpop.eup %3421  ;;  %6096 = vst [vmem:[#allocation70_spill] sm:$0xff] %v4824_v28 }
 0x731   :  { %v1748_v31 = vmul.f32 0.5, %v1747_v41  ;;  %v1755_v4 = vmul.f32 %v3420_v38, %v1744_v15  ;;  %v1752_v18 = vadd.f32 1.0, %v3422_v16  ;;  %v4827_v15 = vld [vmem:[#allocation8 + $0x84] ss:$16 sps:$4 sm:$0xff]   ;;  %v4830_v41 = vld [vmem:[#allocation8 + $0x8c] ss:$16 sps:$4 sm:$0xff]  }
 0x732   :  { %6097 = vst [vmem:[#allocation71_spill] sm:$0xff] %v4827_v15  ;;  %6098 = vst [vmem:[#allocation72_spill] sm:$0xff] %v4830_v41  ;;  %v4836_v38 = vld [vmem:[#allocation8 + $0x88] ss:$16 sps:$4 sm:$0xff]   ;;  %v4845_v16 = vld [vmem:[#allocation8 + $0x60] ss:$16 sps:$4 sm:$0xff]  }
 0x733   :  { %v1754_v17 = vmul.f32 %v1748_v31, %v4574_v6  ;;  %v1753_v9 = vmul.f32 0.5, %v1752_v18  ;;  %v4798_v6 = vld [vmem:[#allocation8 + $0xe8] ss:$16 sps:$4 sm:$0xff]   ;;  %v4833_v31 = vld [vmem:[#allocation8 + $0x80] ss:$16 sps:$4 sm:$0xff]   ;;  %6100 = vst [vmem:[#allocation74_spill] sm:$0xff] %v4836_v38 }
 0x734   :  { %6099 = vst [vmem:[#allocation73_spill] sm:$0xff] %v4833_v31  ;;  %6103 = vst [vmem:[#allocation77_spill] sm:$0xff] %v4845_v16  ;;  %v4848_v18 = vld [vmem:[#allocation8 + $0x68] ss:$16 sps:$4 sm:$0xff]  }
 0x735   :  { %v4788_v24 = vadd.f32 %v1755_v4, %v1754_v17  ;;  %v4839_v17 = vld [vmem:[#allocation8 + $0x64] ss:$16 sps:$4 sm:$0xff]   ;;  %v4842_v4 = vld [vmem:[#allocation8 + $0x6c] ss:$16 sps:$4 sm:$0xff]   ;;  %6104 = vst [vmem:[#allocation78_spill] sm:$0xff] %v4848_v18 }
 0x736   :  { %6101 = vst [vmem:[#allocation75_spill] sm:$0xff] %v4839_v17  ;;  %6102 = vst [vmem:[#allocation76_spill] sm:$0xff] %v4842_v4 }
 0x737   :  { %3423 = vtanh.f32 %v4788_v24 }
 0x744   :  { %v3424_v56 = vpop.eup %3423 }
 0x745   :  { %v1758_v12 = vmul.f32 %v3424_v56, %v1753_v9  ;;  %v4851_v9 = vld [vmem:[#allocation8 + $0x44] ss:$16 sps:$4 sm:$0xff]   ;;  %v4854_v56 = vld [vmem:[#allocation8 + $0x4c] ss:$16 sps:$4 sm:$0xff]  }
 0x746   :  { %6105 = vst [vmem:[#allocation15_spill] sm:$0xff] %v4851_v9  ;;  %6106 = vst [vmem:[#allocation16_spill] sm:$0xff] %v4854_v56 }
 0x747   :  { %v4791_v10 = vpack.c.bf16 %v1758_v12, %v1758_v12  ;;  %v4857_v12 = vld [vmem:[#allocation8 + $0x40] ss:$16 sps:$4 sm:$0xff]  }
 0x748   :  { %6107 = vst [vmem:[#allocation17_spill] sm:$0xff] %v4857_v12 }
 0x749   :  { %1793 = vmatmul.mubr.bf16.vlgmr.msra.gmra.mxu0 %v4791_v10  ;;  %1834 = vmatmul.mubr.bf16.vlgmr.msra.gmra.mxu1 %v4791_v10 }
 0x74a   :  { %1862 = vmatpush1.bf16.msra.mxu0 %v4795_v47  ;;  %1903 = vmatpush1.bf16.msra.mxu1 %v4798_v6 }
 0x74b   :  { %1863 = vmatprep.subr.bf16.mxu0 %v4801_v5  ;;  %1904 = vmatprep.subr.bf16.mxu1 %v4804_v11 }
 0x74c   :  { %1893 = vmatprep.mubr.bf16.mxu0 %v5897_v39  ;;  %1934 = vmatprep.mubr.bf16.mxu1 %v5897_v39 }
 0x74e   :  { %1864 = vmatpush1.bf16.msra.mxu0 %v4809_v13  ;;  %1905 = vmatpush1.bf16.msra.mxu1 %v4812_v8 }
 0x74f   :  { %1865 = vmatprep.subr.bf16.mxu0 %v4815_v14  ;;  %1906 = vmatprep.subr.bf16.mxu1 %v4818_v36 }
 0x752   :  { %1866 = vmatpush1.bf16.msra.mxu0 %v4821_v63  ;;  %1907 = vmatpush1.bf16.msra.mxu1 %v4824_v28 }
 0x753   :  { %1867 = vmatprep.subr.bf16.mxu0 %v4827_v15  ;;  %1908 = vmatprep.subr.bf16.mxu1 %v4830_v41 }
 0x756   :  { %1868 = vmatpush1.bf16.msra.mxu0 %v4833_v31  ;;  %1909 = vmatpush1.bf16.msra.mxu1 %v4836_v38 }
 0x757   :  { %1869 = vmatprep.subr.bf16.mxu0 %v4839_v17  ;;  %1910 = vmatprep.subr.bf16.mxu1 %v4842_v4  ;;  %v4860_v4 = vld [vmem:[#allocation8 + $0x48] ss:$16 sps:$4 sm:$0xff]  }
 0x758   :  { %6108 = vst [vmem:[#allocation18_spill] sm:$0xff] %v4860_v4 }
 0x75a   :  { %1870 = vmatpush1.bf16.msra.mxu0 %v4845_v16  ;;  %1911 = vmatpush1.bf16.msra.mxu1 %v4848_v18  ;;  %v4863_v16 = vld [vmem:[#allocation8 + $0x24] ss:$16 sps:$4 sm:$0xff]   ;;  %v4866_v18 = vld [vmem:[#allocation8 + $0x2c] ss:$16 sps:$4 sm:$0xff]  }
 0x75b   :  { %1871 = vmatprep.subr.bf16.mxu0 %v4851_v9  ;;  %1912 = vmatprep.subr.bf16.mxu1 %v4854_v56  ;;  %6109 = vst [vmem:[#allocation19_spill] sm:$0xff] %v4863_v16  ;;  %6110 = vst [vmem:[#allocation20_spill] sm:$0xff] %v4866_v18  ;;  %v4869_v9 = vld [vmem:[#allocation8 + $0x20] ss:$16 sps:$4 sm:$0xff]   ;;  %v4872_v56 = vld [vmem:[#allocation8 + $0x28] ss:$16 sps:$4 sm:$0xff]  }
 0x75c   :  { %6111 = vst [vmem:[#allocation21_spill] sm:$0xff] %v4869_v9  ;;  %6112 = vst [vmem:[#allocation22_spill] sm:$0xff] %v4872_v56 }
 0x75e   :  { %1872 = vmatpush1.bf16.msra.mxu0 %v4857_v12  ;;  %1913 = vmatpush1.bf16.msra.mxu1 %v4860_v4  ;;  %v4875_v12 = vld [vmem:[#allocation8 + $0x4] ss:$16 sps:$4 sm:$0xff]   ;;  %v4878_v4 = vld [vmem:[#allocation8 + $0xc] ss:$16 sps:$4 sm:$0xff]  }
 0x75f   :  { %1873 = vmatprep.subr.bf16.mxu0 %v4863_v16  ;;  %1914 = vmatprep.subr.bf16.mxu1 %v4866_v18  ;;  %6113 = vst [vmem:[#allocation23_spill] sm:$0xff] %v4875_v12  ;;  %6114 = vst [vmem:[#allocation24_spill] sm:$0xff] %v4878_v4  ;;  %v4881_v16 = vld [vmem:[#allocation8] ss:$16 sps:$4 sm:$0xff]   ;;  %v4884_v18 = vld [vmem:[#allocation8 + $0x8] ss:$16 sps:$4 sm:$0xff]  }
 0x760   :  { %6115 = vst [vmem:[#allocation81_spill] sm:$0xff] %v4881_v16  ;;  %6116 = vst [vmem:[#allocation82_spill] sm:$0xff] %v4884_v18 }
 0x762   :  { %1874 = vmatpush1.bf16.msra.mxu0 %v4869_v9  ;;  %1915 = vmatpush1.bf16.msra.mxu1 %v4872_v56  ;;  %v3826_v56 = vmov 4  }
 0x763   :  { %1875 = vmatprep.subr.bf16.mxu0 %v4875_v12  ;;  %1916 = vmatprep.subr.bf16.mxu1 %v4878_v4  ;;  %v1596_v12 = vadd.f32 %v4771_v59, %v6048_v20 }
 0x764   :  { %3206 = vset.pattern.permute.xlu1 %v3826_v56 }
 0x765   :  { %1944 = vperm.xlu1 %3206, %v4618_v40  }
 0x766   :  { %1876 = vmatpush1.bf16.msra.mxu0 %v4881_v16  ;;  %1917 = vmatpush1.bf16.msra.mxu1 %v4884_v18  ;;  %v1598_v16 = vadd.f32 %v4775_v55, %v6049_v44  ;;  %v1639_v55 = vadd.f32 %v4777_v62, %v4276_v1 }
 0x767   :  { %1955 = vmatprep.subr.bf16.mxu0 %v6045_v22  ;;  %1996 = vmatprep.subr.bf16.mxu1 %v6046_v37  ;;  %v1637_v22 = vadd.f32 %v4773_v45, %v4271_v3 }
 0x809   :  { %v1794_v4 = vpop.f32.mrf.mxu0  ;;  %v1835_v9 = vpop.f32.mrf.mxu1 }
 0x80a   :  { %v1795_v17 = vadd.f32 %v1794_v4, %v1596_v12  ;;  %v1836_v40 = vadd.f32 %v1835_v9, %v1637_v22 }
 0x80b   :  { %v1796_v38 = vpop.f32.mrf.mxu0  ;;  %v1837_v31 = vpop.f32.mrf.mxu1 }
 0x80c   :  { %v1842_v18 = vmul.f32 0.5, %v1795_v17  ;;  %v1797_v37 = vadd.f32 %v1796_v38, %v1598_v16  ;;  %v1838_v4 = vadd.f32 %v1837_v31, %v1639_v55  ;;  %v6150_v55 = vld [vmem:[#allocation63_spill] sm:$0xff] }
 0x80d   :  { %v1798_v41 = vpop.f32.mrf.mxu0  ;;  %v1839_v56 = vpop.f32.mrf.mxu1 }
 0x80e   :  { %3425 = vtanh.f32 %v1842_v18  ;;  %v1846_v15 = vmul.f32 0.5, %v1797_v37  ;;  %v1851_v12 = vmul.f32 0.5, %v1838_v4  ;;  %v6147_v37 = vld [vmem:[#allocation60_spill] sm:$0xff]  ;;  %v6148_v56 = vld [vmem:[#allocation61_spill] sm:$0xff] }
 0x80f   :  { %v1799_v28 = vpop.f32.mrf.mxu0  ;;  %v1840_v59 = vpop.f32.mrf.mxu1  ;;  %v6151_v4 = vld [vmem:[#allocation64_spill] sm:$0xff] }
 0x810   :  { %3427 = vtanh.f32 %v1846_v15  ;;  %v6149_v59 = vld [vmem:[#allocation62_spill] sm:$0xff] }
 0x811   :  { %3429 = vtanh.f32 %v1836_v40 }
 0x812   :  { %3431 = vtanh.f32 %v1851_v12  ;;  %v6152_v12 = vld [vmem:[#allocation65_spill] sm:$0xff] }
 0x81b   :  { %v3426_v44 = vpop.eup %3425 }
 0x81c   :  { %v1844_v20 = vadd.f32 1.0, %v3426_v44  ;;  %v6135_v44 = vld [vmem:[#allocation38_spill] sm:$0xff] }
 0x81d   :  { %v3428_v63 = vpop.eup %3427 }
 0x81e   :  { %v1845_v45 = vmul.f32 0.5, %v1844_v20  ;;  %v1848_v17 = vadd.f32 1.0, %v3428_v63  ;;  %v3430_v41 = vpop.eup %3429  ;;  %v6134_v20 = vld [vmem:[#allocation14_spill] sm:$0xff]  ;;  %v6146_v63 = vld [vmem:[#allocation59_spill] sm:$0xff] }
 0x81f   :  { %v3432_v40 = vpop.eup %3431 }
 0x820   :  { %v1849_v38 = vmul.f32 0.5, %v1848_v17  ;;  %v1856_v16 = vmul.f32 %v3430_v41, %v1845_v45  ;;  %v1853_v15 = vadd.f32 1.0, %v3432_v40  ;;  %v6153_v45 = vld [vmem:[#allocation66_spill] sm:$0xff]  ;;  %v6154_v17 = vld [vmem:[#allocation67_spill] sm:$0xff]  ;;  %v6155_v41 = vld [vmem:[#allocation68_spill] sm:$0xff] }
 0x822   :  { %v1855_v18 = vmul.f32 %v1849_v38, %v4630_v27  ;;  %v1854_v62 = vmul.f32 0.5, %v1853_v15  ;;  %v6136_v27 = vld [vmem:[#allocation39_spill] sm:$0xff] }
 0x824   :  { %v4899_v28 = vadd.f32 %v1856_v16, %v1855_v18 }
 0x826   :  { %3433 = vtanh.f32 %v4899_v28 }
 0x833   :  { %v3434_v31 = vpop.eup %3433 }
 0x834   :  { %v1859_v9 = vmul.f32 %v3434_v31, %v1854_v62 }
 0x836   :  { %v1860_v22 = vpack.c.bf16 %v1859_v9, %v1859_v9 }
 0x838   :  { %1894 = vmatmul.mubr.bf16.vlgmr.msra.gmra.mxu0 %v1860_v22  ;;  %1935 = vmatmul.mubr.bf16.vlgmr.msra.gmra.mxu1 %v1860_v22  ;;  %v1945_v22 = vpop.permute.xlu1 %1944 }
 0x839   :  { %1956 = vmatpush1.bf16.msra.mxu0 %v4427_v52  ;;  %1997 = vmatpush1.bf16.msra.mxu1 %v4430_v0  ;;  %v6117_v52 = vld [vmem:[#allocation25_spill] sm:$0xff]  ;;  %v6118_v0 = vld [vmem:[#allocation26_spill] sm:$0xff] }
 0x83a   :  { %1957 = vmatprep.subr.bf16.mxu0 %v4433_v54  ;;  %1998 = vmatprep.subr.bf16.mxu1 %v4436_v30  ;;  %v6119_v54 = vld [vmem:[#allocation27_spill] sm:$0xff]  ;;  %v6120_v30 = vld [vmem:[#allocation28_spill] sm:$0xff] }
 0x83b   :  { %1987 = vmatprep.mubr.bf16.mxu0 %v5897_v39  ;;  %2028 = vmatprep.mubr.bf16.mxu1 %v5897_v39 }
 0x83d   :  { %1958 = vmatpush1.bf16.msra.mxu0 %v4441_v43  ;;  %1999 = vmatpush1.bf16.msra.mxu1 %v4444_v32  ;;  %v6121_v43 = vld [vmem:[#allocation29_spill] sm:$0xff]  ;;  %v6122_v32 = vld [vmem:[#allocation31_spill] sm:$0xff] }
 0x83e   :  { %1959 = vmatprep.subr.bf16.mxu0 %v4447_v33  ;;  %2000 = vmatprep.subr.bf16.mxu1 %v4450_v60  ;;  %v6123_v33 = vld [vmem:[#allocation32_spill] sm:$0xff]  ;;  %v6124_v60 = vld [vmem:[#allocation33_spill] sm:$0xff] }
 0x841   :  { %1960 = vmatpush1.bf16.msra.mxu0 %v4453_v58  ;;  %2001 = vmatpush1.bf16.msra.mxu1 %v4456_v61  ;;  %v6125_v58 = vld [vmem:[#allocation34_spill] sm:$0xff]  ;;  %v6126_v61 = vld [vmem:[#allocation35_spill] sm:$0xff] }
 0x842   :  { %1961 = vmatprep.subr.bf16.mxu0 %v4459_v34  ;;  %2002 = vmatprep.subr.bf16.mxu1 %v4462_v46  ;;  %v6127_v34 = vld [vmem:[#allocation36_spill] sm:$0xff]  ;;  %v6128_v46 = vld [vmem:[#allocation37_spill] sm:$0xff] }
 0x845   :  { %1962 = vmatpush1.bf16.msra.mxu0 %v4465_v50  ;;  %2003 = vmatpush1.bf16.msra.mxu1 %v4468_v51  ;;  %v6129_v50 = vld [vmem:[#allocation48_spill] sm:$0xff]  ;;  %v6130_v51 = vld [vmem:[#allocation51_spill] sm:$0xff] }
 0x846   :  { %1963 = vmatprep.subr.bf16.mxu0 %v4471_v57  ;;  %2004 = vmatprep.subr.bf16.mxu1 %v4474_v29  ;;  %v6131_v57 = vld [vmem:[#allocation52_spill] sm:$0xff]  ;;  %v6132_v29 = vld [vmem:[#allocation53_spill] sm:$0xff] }
 0x849   :  { %1964 = vmatpush1.bf16.msra.mxu0 %v6050_v42  ;;  %2005 = vmatpush1.bf16.msra.mxu1 %v6051_v19  ;;  %v6137_v42 = vld [vmem:[#allocation40_spill] sm:$0xff]  ;;  %v6138_v19 = vld [vmem:[#allocation41_spill] sm:$0xff] }
 0x84a   :  { %1965 = vmatprep.subr.bf16.mxu0 %v6052_v21  ;;  %2006 = vmatprep.subr.bf16.mxu1 %v6053_v26  ;;  %v6139_v21 = vld [vmem:[#allocation42_spill] sm:$0xff]  ;;  %v6140_v26 = vld [vmem:[#allocation49_spill] sm:$0xff] }
 0x84d   :  { %1966 = vmatpush1.bf16.msra.mxu0 %v6054_v35  ;;  %2007 = vmatpush1.bf16.msra.mxu1 %v6055_v23  ;;  %v6141_v35 = vld [vmem:[#allocation50_spill] sm:$0xff]  ;;  %v6142_v23 = vld [vmem:[#allocation55_spill] sm:$0xff] }
 0x84e   :  { %1967 = vmatprep.subr.bf16.mxu0 %v6056_v25  ;;  %2008 = vmatprep.subr.bf16.mxu1 %v6057_v7  ;;  %v6143_v25 = vld [vmem:[#allocation56_spill] sm:$0xff]  ;;  %v6144_v7 = vld [vmem:[#allocation57_spill] sm:$0xff] }
 0x851   :  { %1968 = vmatpush1.bf16.msra.mxu0 %v4501_v49  ;;  %2009 = vmatpush1.bf16.msra.mxu1 %v6117_v52  ;;  %v6133_v49 = vld [vmem:[#allocation54_spill] sm:$0xff]  ;;  %v6156_v52 = vld [vmem:[#allocation43_spill] sm:$0xff] }
 0x852   :  { %1969 = vmatprep.subr.bf16.mxu0 %v6118_v0  ;;  %2010 = vmatprep.subr.bf16.mxu1 %v6119_v54  ;;  %v1947_v0 = vmul.f32 %v1945_v22, %v6156_v52  ;;  %v6157_v54 = vld [vmem:[#allocation44_spill] sm:$0xff] }
 0x855   :  { %1970 = vmatpush1.bf16.msra.mxu0 %v6120_v30  ;;  %2011 = vmatpush1.bf16.msra.mxu1 %v6121_v43  ;;  %v1948_v30 = vmul.f32 %v1945_v22, %v6157_v54  ;;  %v6158_v43 = vld [vmem:[#allocation45_spill] sm:$0xff]  ;;  %v1950_v54 = vmul.f32 %v1945_v22, %v5963_v2 }
 0x856   :  { %2060 = vmatprep.subr.bf16.mxu0 %v6122_v32  ;;  %2101 = vmatprep.subr.bf16.mxu1 %v6123_v33 }
 0x858   :  { %1988 = vmatmul.mubr.bf16.vlgmr.msra.gmra.mxu0 %v4791_v10  ;;  %2029 = vmatmul.mubr.bf16.vlgmr.msra.gmra.mxu1 %v4791_v10  ;;  %v6145_v10 = vld [vmem:[#allocation58_spill] sm:$0xff] }
 0x859   :  { %2061 = vmatpush1.bf16.msra.mxu0 %v6124_v60  ;;  %2102 = vmatpush1.bf16.msra.mxu1 %v6125_v58 }
 0x85a   :  { %2062 = vmatprep.subr.bf16.mxu0 %v6126_v61  ;;  %2103 = vmatprep.subr.bf16.mxu1 %v6127_v34 }
 0x85b   :  { %2092 = vmatprep.mubr.bf16.mxu0 %v5897_v39  ;;  %2133 = vmatprep.mubr.bf16.mxu1 %v5897_v39 }
 0x85d   :  { %2063 = vmatpush1.bf16.msra.mxu0 %v6128_v46  ;;  %2104 = vmatpush1.bf16.msra.mxu1 %v6129_v50 }
 0x85e   :  { %2064 = vmatprep.subr.bf16.mxu0 %v6130_v51  ;;  %2105 = vmatprep.subr.bf16.mxu1 %v6131_v57 }
 0x861   :  { %2065 = vmatpush1.bf16.msra.mxu0 %v6132_v29  ;;  %2106 = vmatpush1.bf16.msra.mxu1 %v6133_v49 }
 0x862   :  { %2066 = vmatprep.subr.bf16.mxu0 %v6134_v20  ;;  %2107 = vmatprep.subr.bf16.mxu1 %v6135_v44 }
 0x865   :  { %2067 = vmatpush1.bf16.msra.mxu0 %v6136_v27  ;;  %2108 = vmatpush1.bf16.msra.mxu1 %v6137_v42 }
 0x866   :  { %2068 = vmatprep.subr.bf16.mxu0 %v6138_v19  ;;  %2109 = vmatprep.subr.bf16.mxu1 %v6139_v21 }
 0x869   :  { %2069 = vmatpush1.bf16.msra.mxu0 %v6140_v26  ;;  %2110 = vmatpush1.bf16.msra.mxu1 %v6141_v35 }
 0x86a   :  { %2070 = vmatprep.subr.bf16.mxu0 %v6142_v23  ;;  %2111 = vmatprep.subr.bf16.mxu1 %v6143_v25 }
 0x86d   :  { %2071 = vmatpush1.bf16.msra.mxu0 %v6144_v7  ;;  %2112 = vmatpush1.bf16.msra.mxu1 %v6145_v10 }
 0x86e   :  { %2072 = vmatprep.subr.bf16.mxu0 %v6146_v63  ;;  %2113 = vmatprep.subr.bf16.mxu1 %v6147_v37 }
 0x871   :  { %2073 = vmatpush1.bf16.msra.mxu0 %v6148_v56  ;;  %2114 = vmatpush1.bf16.msra.mxu1 %v6149_v59 }
 0x872   :  { %2074 = vmatprep.subr.bf16.mxu0 %v6150_v55  ;;  %2115 = vmatprep.subr.bf16.mxu1 %v6151_v4 }
 0x875   :  { %2075 = vmatpush1.bf16.msra.mxu0 %v6152_v12  ;;  %2116 = vmatpush1.bf16.msra.mxu1 %v6153_v45  ;;  %v6160_v12 = vld [vmem:[#allocation47_spill] sm:$0xff] }
 0x876   :  { %2161 = vmatprep.subr.bf16.mxu0 %v6154_v17  ;;  %2202 = vmatprep.subr.bf16.mxu1 %v6155_v41  ;;  %v1951_v17 = vadd.f32 %v1947_v0, %v6158_v43  ;;  %v6159_v41 = vld [vmem:[#allocation46_spill] sm:$0xff]  ;;  %v1952_v4 = vadd.f32 %v1948_v30, %v6160_v12  ;;  %v1954_v30 = vadd.f32 %v1950_v54, %v4152_v53 }
 0x877   :  { %v1949_v45 = vmul.f32 %v1945_v22, %v6159_v41 }
 0x8f8   :  { %v4972_v38 = vpop.f32.mrf.mxu0  ;;  %v4974_v16 = vpop.f32.mrf.mxu1 }
 0x8fa   :  { %v4976_v18 = vpop.f32.mrf.mxu0  ;;  %v4978_v40 = vpop.f32.mrf.mxu1 }
 0x8fc   :  { %v1899_v15 = vpop.f32.mrf.mxu0  ;;  %v1940_v62 = vpop.f32.mrf.mxu1 }
 0x8fd   :  { %v1953_v62 = vadd.f32 %v1949_v45, %v4143_v48 }
 0x8fe   :  { %v1900_v31 = vpop.f32.mrf.mxu0  ;;  %v1941_v9 = vpop.f32.mrf.mxu1 }
 0x918   :  { %v1989_v55 = vpop.f32.mrf.mxu0  ;;  %v2030_v59 = vpop.f32.mrf.mxu1 }
 0x919   :  { %v2037_v56 = vadd.f32 %v1989_v55, %v1951_v17  ;;  %v2039_v41 = vadd.f32 %v2030_v59, %v1953_v62  ;;  %v6164_v62 = vld [vmem:[#allocation72_spill] sm:$0xff] }
 0x91a   :  { %v1991_v37 = vpop.f32.mrf.mxu0  ;;  %v2032_v63 = vpop.f32.mrf.mxu1 }
 0x91b   :  { %v2041_v15 = vmul.f32 0.5, %v2037_v56  ;;  %v2038_v31 = vadd.f32 %v1991_v37, %v1952_v4  ;;  %v2040_v55 = vadd.f32 %v2032_v63, %v1954_v30  ;;  %v6167_v30 = vld [vmem:[#allocation75_spill] sm:$0xff] }
 0x91c   :  { %v1993_v9 = vpop.f32.mrf.mxu0  ;;  %v2034_v10 = vpop.f32.mrf.mxu1 }
 0x91d   :  { %3435 = vtanh.f32 %v2041_v15  ;;  %v2045_v52 = vmul.f32 0.5, %v2038_v31  ;;  %v2050_v17 = vmul.f32 0.5, %v2040_v55  ;;  %v6165_v9 = vld [vmem:[#allocation73_spill] sm:$0xff]  ;;  %v6168_v55 = vld [vmem:[#allocation76_spill] sm:$0xff] }
 0x91e   :  { %v1994_v0 = vpop.f32.mrf.mxu0  ;;  %v2035_v43 = vpop.f32.mrf.mxu1 }
 0x91f   :  { %3437 = vtanh.f32 %v2045_v52  ;;  %v6166_v0 = vld [vmem:[#allocation74_spill] sm:$0xff] }
 0x920   :  { %3439 = vtanh.f32 %v2039_v41 }
 0x921   :  { %3441 = vtanh.f32 %v2050_v17  ;;  %v6169_v17 = vld [vmem:[#allocation77_spill] sm:$0xff] }
 0x92a   :  { %v3436_v12 = vpop.eup %3435 }
 0x92b   :  { %v2043_v56 = vadd.f32 1.0, %v3436_v12  ;;  %v6163_v12 = vld [vmem:[#allocation71_spill] sm:$0xff] }
 0x92c   :  { %v3438_v7 = vpop.eup %3437 }
 0x92d   :  { %v2044_v45 = vmul.f32 0.5, %v2043_v56  ;;  %v2047_v37 = vadd.f32 1.0, %v3438_v7  ;;  %v3440_v4 = vpop.eup %3439  ;;  %v6162_v7 = vld [vmem:[#allocation70_spill] sm:$0xff] }
 0x92e   :  { %v3442_v59 = vpop.eup %3441  ;;  %v6170_v56 = vld [vmem:[#allocation78_spill] sm:$0xff] }
 0x92f   :  { %v2048_v10 = vmul.f32 0.5, %v2047_v37  ;;  %v2055_v22 = vmul.f32 %v3440_v4, %v2044_v45  ;;  %v2052_v52 = vadd.f32 1.0, %v3442_v59  ;;  %v6171_v45 = vld [vmem:[#allocation15_spill] sm:$0xff]  ;;  %v6172_v37 = vld [vmem:[#allocation16_spill] sm:$0xff]  ;;  %v6174_v4 = vld [vmem:[#allocation18_spill] sm:$0xff] }
 0x930   :  { %v6177_v59 = vld [vmem:[#allocation21_spill] sm:$0xff] }
 0x931   :  { %v2054_v15 = vmul.f32 %v2048_v10, %v4788_v24  ;;  %v2053_v41 = vmul.f32 0.5, %v2052_v52  ;;  %v6161_v24 = vld [vmem:[#allocation69_spill] sm:$0xff]  ;;  %v6178_v52 = vld [vmem:[#allocation22_spill] sm:$0xff] }
 0x932   :  { %v6173_v10 = vld [vmem:[#allocation17_spill] sm:$0xff] }
 0x933   :  { %v4989_v31 = vadd.f32 %v2055_v22, %v2054_v15  ;;  %v6175_v15 = vld [vmem:[#allocation19_spill] sm:$0xff]  ;;  %v6176_v22 = vld [vmem:[#allocation20_spill] sm:$0xff] }
 0x935   :  { %3443 = vtanh.f32 %v4989_v31 }
 0x942   :  { %v3444_v63 = vpop.eup %3443 }
 0x943   :  { %v2058_v54 = vmul.f32 %v3444_v63, %v2053_v41  ;;  %v6179_v41 = vld [vmem:[#allocation23_spill] sm:$0xff]  ;;  %v6180_v63 = vld [vmem:[#allocation24_spill] sm:$0xff] }
 0x945   :  { %v4992_v43 = vpack.c.bf16 %v2058_v54, %v2058_v54  ;;  %v6181_v54 = vld [vmem:[#allocation81_spill] sm:$0xff] }
 0x947   :  { %2093 = vmatmul.mubr.bf16.vlgmr.msra.gmra.mxu0 %v4992_v43  ;;  %2134 = vmatmul.mubr.bf16.vlgmr.msra.gmra.mxu1 %v4992_v43 }
 0x948   :  { %2162 = vmatpush1.bf16.msra.mxu0 %v4795_v47  ;;  %2203 = vmatpush1.bf16.msra.mxu1 %v4798_v6 }
 0x949   :  { %2163 = vmatprep.subr.bf16.mxu0 %v4801_v5  ;;  %2204 = vmatprep.subr.bf16.mxu1 %v4804_v11 }
 0x94a   :  { %2193 = vmatprep.mubr.bf16.mxu0 %v5897_v39  ;;  %2234 = vmatprep.mubr.bf16.mxu1 %v5897_v39 }
 0x94c   :  { %2164 = vmatpush1.bf16.msra.mxu0 %v4809_v13  ;;  %2205 = vmatpush1.bf16.msra.mxu1 %v4812_v8 }
 0x94d   :  { %2165 = vmatprep.subr.bf16.mxu0 %v4815_v14  ;;  %2206 = vmatprep.subr.bf16.mxu1 %v4818_v36 }
 0x950   :  { %2166 = vmatpush1.bf16.msra.mxu0 %v6161_v24  ;;  %2207 = vmatpush1.bf16.msra.mxu1 %v6162_v7 }
 0x951   :  { %2167 = vmatprep.subr.bf16.mxu0 %v6163_v12  ;;  %2208 = vmatprep.subr.bf16.mxu1 %v6164_v62 }
 0x954   :  { %2168 = vmatpush1.bf16.msra.mxu0 %v6165_v9  ;;  %2209 = vmatpush1.bf16.msra.mxu1 %v6166_v0 }
 0x955   :  { %2169 = vmatprep.subr.bf16.mxu0 %v6167_v30  ;;  %2210 = vmatprep.subr.bf16.mxu1 %v6168_v55 }
 0x958   :  { %2170 = vmatpush1.bf16.msra.mxu0 %v6169_v17  ;;  %2211 = vmatpush1.bf16.msra.mxu1 %v6170_v56 }
 0x959   :  { %2171 = vmatprep.subr.bf16.mxu0 %v6171_v45  ;;  %2212 = vmatprep.subr.bf16.mxu1 %v6172_v37  ;;  %v6182_v45 = vld [vmem:[#allocation82_spill] sm:$0xff] }
 0x95a   :  { %v5028_v37 = vld [vmem:[#allocation5 + $0xe4] ss:$16 sps:$4 sm:$0xff]  }
 0x95b   :  { %6183 = vst [vmem:[#allocation25_spill] sm:$0xff] %v5028_v37 }
 0x95c   :  { %2172 = vmatpush1.bf16.msra.mxu0 %v6173_v10  ;;  %2213 = vmatpush1.bf16.msra.mxu1 %v6174_v4  ;;  %v5031_v4 = vld [vmem:[#allocation5 + $0xec] ss:$16 sps:$4 sm:$0xff]  }
 0x95d   :  { %2173 = vmatprep.subr.bf16.mxu0 %v6175_v15  ;;  %2214 = vmatprep.subr.bf16.mxu1 %v6176_v22  ;;  %6184 = vst [vmem:[#allocation26_spill] sm:$0xff] %v5031_v4  ;;  %v3827_v22 = vmov 5  }
 0x95e   :  { %3207 = vset.pattern.permute.xlu0 %v3827_v22 }
 0x960   :  { %2174 = vmatpush1.bf16.msra.mxu0 %v6177_v59  ;;  %2215 = vmatpush1.bf16.msra.mxu1 %v6178_v52  ;;  %v6185_v59 = vld [vmem:[#allocation30_spill] sm:$0xff]  ;;  %v6186_v52 = vld [vmem:[#allocation79_spill] sm:$0xff] }
 0x961   :  { %2175 = vmatprep.subr.bf16.mxu0 %v6179_v41  ;;  %2216 = vmatprep.subr.bf16.mxu1 %v6180_v63  ;;  %v1896_v41 = vadd.f32 %v4972_v38, %v6186_v52 }
 0x962   :  { %2244 = vperm.xlu0 %3207, %v6185_v59  }
 0x964   :  { %2176 = vmatpush1.bf16.msra.mxu0 %v6181_v54  ;;  %2217 = vmatpush1.bf16.msra.mxu1 %v6182_v45  ;;  %v6187_v54 = vld [vmem:[#allocation80_spill] sm:$0xff] }
 0x965   :  { %2255 = vmatprep.subr.bf16.mxu0 %v5028_v37  ;;  %2296 = vmatprep.subr.bf16.mxu1 %v5031_v4  ;;  %v1898_v45 = vadd.f32 %v4976_v18, %v6187_v54  ;;  %v1937_v37 = vadd.f32 %v4974_v16, %v4271_v3  ;;  %v1939_v18 = vadd.f32 %v4978_v40, %v4276_v1 }
 0xa07   :  { %v2094_v63 = vpop.f32.mrf.mxu0  ;;  %v2135_v15 = vpop.f32.mrf.mxu1 }
 0xa08   :  { %v2095_v10 = vadd.f32 %v2094_v63, %v1896_v41  ;;  %v2136_v59 = vadd.f32 %v2135_v15, %v1937_v37 }
 0xa09   :  { %v2096_v56 = vpop.f32.mrf.mxu0  ;;  %v2137_v17 = vpop.f32.mrf.mxu1 }
 0xa0a   :  { %v2142_v55 = vmul.f32 0.5, %v2095_v10  ;;  %v2097_v4 = vadd.f32 %v2096_v56, %v1898_v45  ;;  %v2138_v41 = vadd.f32 %v2137_v17, %v1939_v18  ;;  %v5070_v18 = vld [vmem:[#allocation5 + $0xac] ss:$16 sps:$4 sm:$0xff]  }
 0xa0b   :  { %v2098_v30 = vpop.f32.mrf.mxu0  ;;  %v2139_v22 = vpop.f32.mrf.mxu1 }
 0xa0c   :  { %3445 = vtanh.f32 %v2142_v55  ;;  %v2146_v0 = vmul.f32 0.5, %v2097_v4  ;;  %v2151_v63 = vmul.f32 0.5, %v2138_v41  ;;  %v5061_v22 = vld [vmem:[#allocation5 + $0xc0] ss:$16 sps:$4 sm:$0xff]  }
 0xa0d   :  { %v2099_v9 = vpop.f32.mrf.mxu0  ;;  %v2140_v38 = vpop.f32.mrf.mxu1  ;;  %v5073_v41 = vld [vmem:[#allocation5 + $0xa0] ss:$16 sps:$4 sm:$0xff]  }
 0xa0e   :  { %3447 = vtanh.f32 %v2146_v0  ;;  %v5067_v38 = vld [vmem:[#allocation5 + $0xa4] ss:$16 sps:$4 sm:$0xff]  }
 0xa0f   :  { %3449 = vtanh.f32 %v2136_v59  ;;  %v5064_v59 = vld [vmem:[#allocation5 + $0xc8] ss:$16 sps:$4 sm:$0xff]  }
 0xa10   :  { %3451 = vtanh.f32 %v2151_v63  ;;  %v5076_v63 = vld [vmem:[#allocation5 + $0xa8] ss:$16 sps:$4 sm:$0xff]  }
 0xa19   :  { %v3446_v54 = vpop.eup %3445 }
 0xa1a   :  { %v2144_v52 = vadd.f32 1.0, %v3446_v54  ;;  %v5056_v54 = vld [vmem:[#allocation5 + $0xcc] ss:$16 sps:$4 sm:$0xff]  }
 0xa1b   :  { %v3448_v62 = vpop.eup %3447 }
 0xa1c   :  { %v2145_v16 = vmul.f32 0.5, %v2144_v52  ;;  %v2148_v10 = vadd.f32 1.0, %v3448_v62  ;;  %v3450_v30 = vpop.eup %3449  ;;  %v5047_v52 = vld [vmem:[#allocation5 + $0xe0] ss:$16 sps:$4 sm:$0xff]   ;;  %v5050_v62 = vld [vmem:[#allocation5 + $0xe8] ss:$16 sps:$4 sm:$0xff]  }
 0xa1d   :  { %v3452_v0 = vpop.eup %3451 }
 0xa1e   :  { %v2149_v56 = vmul.f32 0.5, %v2148_v10  ;;  %v2156_v55 = vmul.f32 %v3450_v30, %v2145_v16  ;;  %v2153_v37 = vadd.f32 1.0, %v3452_v0  ;;  %v5079_v16 = vld [vmem:[#allocation5 + $0x84] ss:$16 sps:$4 sm:$0xff]   ;;  %v5082_v10 = vld [vmem:[#allocation5 + $0x8c] ss:$16 sps:$4 sm:$0xff]  }
 0xa1f   :  { %v5085_v30 = vld [vmem:[#allocation5 + $0x80] ss:$16 sps:$4 sm:$0xff]  }
 0xa20   :  { %v2155_v45 = vmul.f32 %v2149_v56, %v4899_v28  ;;  %v2154_v40 = vmul.f32 0.5, %v2153_v37  ;;  %v5053_v28 = vld [vmem:[#allocation5 + $0xc4] ss:$16 sps:$4 sm:$0xff]   ;;  %v5088_v56 = vld [vmem:[#allocation5 + $0x88] ss:$16 sps:$4 sm:$0xff]  }
 0xa21   :  { %v5097_v0 = vld [vmem:[#allocation5 + $0x60] ss:$16 sps:$4 sm:$0xff]   ;;  %v5100_v37 = vld [vmem:[#allocation5 + $0x68] ss:$16 sps:$4 sm:$0xff]  }
 0xa22   :  { %v5044_v9 = vadd.f32 %v2156_v55, %v2155_v45  ;;  %v5091_v55 = vld [vmem:[#allocation5 + $0x64] ss:$16 sps:$4 sm:$0xff]   ;;  %v5094_v45 = vld [vmem:[#allocation5 + $0x6c] ss:$16 sps:$4 sm:$0xff]   ;;  %6188 = vst [vmem:[#allocation27_spill] sm:$0xff] %v5097_v0  ;;  %6189 = vst [vmem:[#allocation28_spill] sm:$0xff] %v5100_v37 }
 0xa24   :  { %3453 = vtanh.f32 %v5044_v9 }
 0xa31   :  { %v3454_v17 = vpop.eup %3453 }
 0xa32   :  { %v2159_v4 = vmul.f32 %v3454_v17, %v2154_v40  ;;  %v5103_v40 = vld [vmem:[#allocation5 + $0x44] ss:$16 sps:$4 sm:$0xff]   ;;  %v5106_v17 = vld [vmem:[#allocation5 + $0x4c] ss:$16 sps:$4 sm:$0xff]  }
 0xa33   :  { %6190 = vst [vmem:[#allocation29_spill] sm:$0xff] %v5103_v40  ;;  %6191 = vst [vmem:[#allocation31_spill] sm:$0xff] %v5106_v17 }
 0xa34   :  { %v2160_v15 = vpack.c.bf16 %v2159_v4, %v2159_v4  ;;  %v5109_v4 = vld [vmem:[#allocation5 + $0x40] ss:$16 sps:$4 sm:$0xff]  }
 0xa35   :  { %6192 = vst [vmem:[#allocation32_spill] sm:$0xff] %v5109_v4 }
 0xa36   :  { %2194 = vmatmul.mubr.bf16.vlgmr.msra.gmra.mxu0 %v2160_v15  ;;  %2235 = vmatmul.mubr.bf16.vlgmr.msra.gmra.mxu1 %v2160_v15  ;;  %v5112_v15 = vld [vmem:[#allocation5 + $0x48] ss:$16 sps:$4 sm:$0xff]  }
 0xa37   :  { %2256 = vmatpush1.bf16.msra.mxu0 %v5047_v52  ;;  %2297 = vmatpush1.bf16.msra.mxu1 %v5050_v62  ;;  %6193 = vst [vmem:[#allocation33_spill] sm:$0xff] %v5112_v15 }
 0xa38   :  { %2257 = vmatprep.subr.bf16.mxu0 %v5053_v28  ;;  %2298 = vmatprep.subr.bf16.mxu1 %v5056_v54 }
 0xa39   :  { %2287 = vmatprep.mubr.bf16.mxu0 %v5897_v39  ;;  %2328 = vmatprep.mubr.bf16.mxu1 %v5897_v39 }
 0xa3b   :  { %2258 = vmatpush1.bf16.msra.mxu0 %v5061_v22  ;;  %2299 = vmatpush1.bf16.msra.mxu1 %v5064_v59 }
 0xa3c   :  { %2259 = vmatprep.subr.bf16.mxu0 %v5067_v38  ;;  %2300 = vmatprep.subr.bf16.mxu1 %v5070_v18 }
 0xa3f   :  { %2260 = vmatpush1.bf16.msra.mxu0 %v5073_v41  ;;  %2301 = vmatpush1.bf16.msra.mxu1 %v5076_v63 }
 0xa40   :  { %2261 = vmatprep.subr.bf16.mxu0 %v5079_v16  ;;  %2302 = vmatprep.subr.bf16.mxu1 %v5082_v10 }
 0xa43   :  { %2262 = vmatpush1.bf16.msra.mxu0 %v5085_v30  ;;  %2303 = vmatpush1.bf16.msra.mxu1 %v5088_v56 }
 0xa44   :  { %2263 = vmatprep.subr.bf16.mxu0 %v5091_v55  ;;  %2304 = vmatprep.subr.bf16.mxu1 %v5094_v45 }
 0xa47   :  { %2264 = vmatpush1.bf16.msra.mxu0 %v5097_v0  ;;  %2305 = vmatpush1.bf16.msra.mxu1 %v5100_v37  ;;  %v5115_v0 = vld [vmem:[#allocation5 + $0x24] ss:$16 sps:$4 sm:$0xff]   ;;  %v5118_v37 = vld [vmem:[#allocation5 + $0x2c] ss:$16 sps:$4 sm:$0xff]  }
 0xa48   :  { %2265 = vmatprep.subr.bf16.mxu0 %v5103_v40  ;;  %2306 = vmatprep.subr.bf16.mxu1 %v5106_v17  ;;  %6194 = vst [vmem:[#allocation34_spill] sm:$0xff] %v5115_v0  ;;  %6195 = vst [vmem:[#allocation35_spill] sm:$0xff] %v5118_v37  ;;  %v5121_v40 = vld [vmem:[#allocation5 + $0x20] ss:$16 sps:$4 sm:$0xff]   ;;  %v5124_v17 = vld [vmem:[#allocation5 + $0x28] ss:$16 sps:$4 sm:$0xff]  }
 0xa49   :  { %6196 = vst [vmem:[#allocation36_spill] sm:$0xff] %v5124_v17 }
 0xa4b   :  { %2266 = vmatpush1.bf16.msra.mxu0 %v5109_v4  ;;  %2307 = vmatpush1.bf16.msra.mxu1 %v5112_v15  ;;  %v5127_v4 = vld [vmem:[#allocation5 + $0x4] ss:$16 sps:$4 sm:$0xff]   ;;  %v5130_v15 = vld [vmem:[#allocation5 + $0xc] ss:$16 sps:$4 sm:$0xff]  }
 0xa4c   :  { %2267 = vmatprep.subr.bf16.mxu0 %v5115_v0  ;;  %2308 = vmatprep.subr.bf16.mxu1 %v5118_v37  ;;  %6197 = vst [vmem:[#allocation37_spill] sm:$0xff] %v5127_v4  ;;  %6198 = vst [vmem:[#allocation48_spill] sm:$0xff] %v5130_v15  ;;  %v5133_v0 = vld [vmem:[#allocation5] ss:$16 sps:$4 sm:$0xff]   ;;  %v5136_v37 = vld [vmem:[#allocation5 + $0x8] ss:$16 sps:$4 sm:$0xff]  }
 0xa4d   :  { %6199 = vst [vmem:[#allocation51_spill] sm:$0xff] %v5133_v0  ;;  %6200 = vst [vmem:[#allocation52_spill] sm:$0xff] %v5136_v37 }
 0xa4f   :  { %2268 = vmatpush1.bf16.msra.mxu0 %v5121_v40  ;;  %2309 = vmatpush1.bf16.msra.mxu1 %v5124_v17 }
 0xa50   :  { %2269 = vmatprep.subr.bf16.mxu0 %v5127_v4  ;;  %2310 = vmatprep.subr.bf16.mxu1 %v5130_v15 }
 0xa53   :  { %2270 = vmatpush1.bf16.msra.mxu0 %v5133_v0  ;;  %2311 = vmatpush1.bf16.msra.mxu1 %v5136_v37 }
 0xa54   :  { %2360 = vmatprep.subr.bf16.mxu0 %v6122_v32  ;;  %2401 = vmatprep.subr.bf16.mxu1 %v6123_v33  ;;  %v6201_v32 = vld [vmem:[#allocation57_spill] sm:$0xff]  ;;  %v6202_v33 = vld [vmem:[#allocation58_spill] sm:$0xff] }
 0xa56   :  { %2288 = vmatmul.mubr.bf16.vlgmr.msra.gmra.mxu0 %v4992_v43  ;;  %2329 = vmatmul.mubr.bf16.vlgmr.msra.gmra.mxu1 %v4992_v43 }
 0xa57   :  { %2361 = vmatpush1.bf16.msra.mxu0 %v6124_v60  ;;  %2402 = vmatpush1.bf16.msra.mxu1 %v6125_v58  ;;  %v6203_v60 = vld [vmem:[#allocation59_spill] sm:$0xff]  ;;  %v6204_v58 = vld [vmem:[#allocation60_spill] sm:$0xff] }
 0xa58   :  { %2362 = vmatprep.subr.bf16.mxu0 %v6126_v61  ;;  %2403 = vmatprep.subr.bf16.mxu1 %v6127_v34  ;;  %v6205_v61 = vld [vmem:[#allocation61_spill] sm:$0xff]  ;;  %v6206_v34 = vld [vmem:[#allocation62_spill] sm:$0xff] }
 0xa59   :  { %2392 = vmatprep.mubr.bf16.mxu0 %v5897_v39  ;;  %2433 = vmatprep.mubr.bf16.mxu1 %v5897_v39 }
 0xa5b   :  { %2363 = vmatpush1.bf16.msra.mxu0 %v6128_v46  ;;  %2404 = vmatpush1.bf16.msra.mxu1 %v6129_v50  ;;  %v6207_v46 = vld [vmem:[#allocation63_spill] sm:$0xff]  ;;  %v6208_v50 = vld [vmem:[#allocation64_spill] sm:$0xff] }
 0xa5c   :  { %2364 = vmatprep.subr.bf16.mxu0 %v6130_v51  ;;  %2405 = vmatprep.subr.bf16.mxu1 %v6131_v57  ;;  %v6209_v51 = vld [vmem:[#allocation65_spill] sm:$0xff]  ;;  %v6210_v57 = vld [vmem:[#allocation66_spill] sm:$0xff] }
 0xa5f   :  { %2365 = vmatpush1.bf16.msra.mxu0 %v6132_v29  ;;  %2406 = vmatpush1.bf16.msra.mxu1 %v6133_v49  ;;  %v6211_v29 = vld [vmem:[#allocation67_spill] sm:$0xff]  ;;  %v6212_v49 = vld [vmem:[#allocation68_spill] sm:$0xff] }
 0xa60   :  { %2366 = vmatprep.subr.bf16.mxu0 %v6134_v20  ;;  %2407 = vmatprep.subr.bf16.mxu1 %v6135_v44 }
 0xa63   :  { %2367 = vmatpush1.bf16.msra.mxu0 %v6136_v27  ;;  %2408 = vmatpush1.bf16.msra.mxu1 %v6137_v42 }
 0xa64   :  { %2368 = vmatprep.subr.bf16.mxu0 %v6138_v19  ;;  %2409 = vmatprep.subr.bf16.mxu1 %v6139_v21 }
 0xa67   :  { %2369 = vmatpush1.bf16.msra.mxu0 %v6140_v26  ;;  %2410 = vmatpush1.bf16.msra.mxu1 %v6141_v35 }
 0xa68   :  { %2370 = vmatprep.subr.bf16.mxu0 %v6142_v23  ;;  %2411 = vmatprep.subr.bf16.mxu1 %v6143_v25  ;;  %v2245_v23 = vpop.permute.xlu0 %2244  ;;  %v6213_v25 = vld [vmem:[#allocation43_spill] sm:$0xff] }
 0xa69   :  { %v2247_v43 = vmul.f32 %v2245_v23, %v6213_v25 }
 0xa6b   :  { %2371 = vmatpush1.bf16.msra.mxu0 %v6201_v32  ;;  %2412 = vmatpush1.bf16.msra.mxu1 %v6202_v33  ;;  %v6214_v32 = vld [vmem:[#allocation44_spill] sm:$0xff] }
 0xa6c   :  { %2372 = vmatprep.subr.bf16.mxu0 %v6203_v60  ;;  %2413 = vmatprep.subr.bf16.mxu1 %v6204_v58  ;;  %v2248_v33 = vmul.f32 %v2245_v23, %v6214_v32  ;;  %v6215_v60 = vld [vmem:[#allocation45_spill] sm:$0xff]  ;;  %v2250_v32 = vmul.f32 %v2245_v23, %v5963_v2 }
 0xa6d   :  { %v2251_v58 = vadd.f32 %v2247_v43, %v6215_v60 }
 0xa6f   :  { %2373 = vmatpush1.bf16.msra.mxu0 %v6205_v61  ;;  %2414 = vmatpush1.bf16.msra.mxu1 %v6206_v34  ;;  %v6216_v61 = vld [vmem:[#allocation46_spill] sm:$0xff] }
 0xa70   :  { %2374 = vmatprep.subr.bf16.mxu0 %v6207_v46  ;;  %2415 = vmatprep.subr.bf16.mxu1 %v6208_v50  ;;  %v2249_v34 = vmul.f32 %v2245_v23, %v6216_v61  ;;  %v6217_v46 = vld [vmem:[#allocation47_spill] sm:$0xff] }
 0xa71   :  { %v2252_v50 = vadd.f32 %v2248_v33, %v6217_v46  ;;  %v2254_v33 = vadd.f32 %v2250_v32, %v4152_v53 }
 0xa73   :  { %2375 = vmatpush1.bf16.msra.mxu0 %v6209_v51  ;;  %2416 = vmatpush1.bf16.msra.mxu1 %v6210_v57 }
 0xa74   :  { %2461 = vmatprep.subr.bf16.mxu0 %v6211_v29  ;;  %2502 = vmatprep.subr.bf16.mxu1 %v6212_v49 }
 0xaf6   :  { %v5177_v20 = vpop.f32.mrf.mxu0  ;;  %v5179_v44 = vpop.f32.mrf.mxu1 }
 0xaf8   :  { %v5181_v27 = vpop.f32.mrf.mxu0  ;;  %v5183_v42 = vpop.f32.mrf.mxu1 }
 0xafa   :  { %v2199_v19 = vpop.f32.mrf.mxu0  ;;  %v2240_v21 = vpop.f32.mrf.mxu1 }
 0xafb   :  { %v2253_v21 = vadd.f32 %v2249_v34, %v4143_v48 }
 0xafc   :  { %v2200_v26 = vpop.f32.mrf.mxu0  ;;  %v2241_v35 = vpop.f32.mrf.mxu1 }
 0xb16   :  { %v2289_v51 = vpop.f32.mrf.mxu0  ;;  %v2330_v57 = vpop.f32.mrf.mxu1 }
 0xb17   :  { %v2337_v29 = vadd.f32 %v2289_v51, %v2251_v58  ;;  %v2339_v61 = vadd.f32 %v2330_v57, %v2253_v21  ;;  %v6232_v21 = vld [vmem:[#allocation22_spill] sm:$0xff] }
 0xb18   :  { %v2291_v49 = vpop.f32.mrf.mxu0  ;;  %v2332_v37 = vpop.f32.mrf.mxu1 }
 0xb19   :  { %v2341_v19 = vmul.f32 0.5, %v2337_v29  ;;  %v2338_v26 = vadd.f32 %v2291_v49, %v2252_v50  ;;  %v2340_v58 = vadd.f32 %v2332_v37, %v2254_v33  ;;  %v6235_v33 = vld [vmem:[#allocation81_spill] sm:$0xff] }
 0xb1a   :  { %v2293_v35 = vpop.f32.mrf.mxu0  ;;  %v2334_v0 = vpop.f32.mrf.mxu1 }
 0xb1b   :  { %3455 = vtanh.f32 %v2341_v19  ;;  %v2345_v25 = vmul.f32 0.5, %v2338_v26  ;;  %v2350_v51 = vmul.f32 0.5, %v2340_v58  ;;  %v6233_v35 = vld [vmem:[#allocation23_spill] sm:$0xff]  ;;  %v6236_v58 = vld [vmem:[#allocation82_spill] sm:$0xff] }
 0xb1c   :  { %v2294_v43 = vpop.f32.mrf.mxu0  ;;  %v2335_v60 = vpop.f32.mrf.mxu1 }
 0xb1d   :  { %3457 = vtanh.f32 %v2345_v25  ;;  %v6234_v43 = vld [vmem:[#allocation24_spill] sm:$0xff] }
 0xb1e   :  { %3459 = vtanh.f32 %v2339_v61 }
 0xb1f   :  { %3461 = vtanh.f32 %v2350_v51  ;;  %v6237_v51 = vld [vmem:[#allocation25_spill] sm:$0xff] }
 0xb28   :  { %v3456_v46 = vpop.eup %3455 }
 0xb29   :  { %v2343_v29 = vadd.f32 1.0, %v3456_v46  ;;  %v6231_v46 = vld [vmem:[#allocation21_spill] sm:$0xff] }
 0xb2a   :  { %v3458_v15 = vpop.eup %3457 }
 0xb2b   :  { %v2344_v34 = vmul.f32 0.5, %v2343_v29  ;;  %v2347_v50 = vadd.f32 1.0, %v3458_v15  ;;  %v3460_v49 = vpop.eup %3459  ;;  %v6230_v15 = vld [vmem:[#allocation20_spill] sm:$0xff]  ;;  %v6238_v29 = vld [vmem:[#allocation26_spill] sm:$0xff] }
 0xb2c   :  { %v3462_v25 = vpop.eup %3461 }
 0xb2d   :  { %v2348_v0 = vmul.f32 0.5, %v2347_v50  ;;  %v2355_v23 = vmul.f32 %v3460_v49, %v2344_v34  ;;  %v2352_v32 = vadd.f32 1.0, %v3462_v25  ;;  %v3828_v34 = vmov 6   ;;  %v5238_v50 = vld [vmem:[%s5517_s0] sm:$0x3] }
 0xb2e   :  { %3208 = vset.pattern.permute.xlu1 %v3828_v34  ;;  %v6240_v25 = vld [vmem:[#allocation80_spill] sm:$0xff] }
 0xb2f   :  { %v2354_v19 = vmul.f32 %v2348_v0, %v4989_v31  ;;  %v2353_v60 = vmul.f32 0.5, %v2352_v32  ;;  %v6226_v31 = vld [vmem:[#allocation16_spill] sm:$0xff]  ;;  %2544 = vperm.xlu1 %3208, %v5238_v50   ;;  %v6239_v0 = vld [vmem:[#allocation79_spill] sm:$0xff]  ;;  %v2198_v32 = vadd.f32 %v5181_v27, %v6240_v25  ;;  %v2239_v27 = vadd.f32 %v5183_v42, %v4276_v1 }
 0xb30   :  { %v2196_v49 = vadd.f32 %v5177_v20, %v6239_v0 }
 0xb31   :  { %v5194_v26 = vadd.f32 %v2355_v23, %v2354_v19 }
 0xb33   :  { %3463 = vtanh.f32 %v5194_v26 }
 0xb40   :  { %v3464_v37 = vpop.eup %3463 }
 0xb41   :  { %v2358_v61 = vmul.f32 %v3464_v37, %v2353_v60 }
 0xb43   :  { %v5197_v57 = vpack.c.bf16 %v2358_v61, %v2358_v61 }
 0xb45   :  { %2393 = vmatmul.mubr.bf16.vlgmr.msra.gmra.mxu0 %v5197_v57  ;;  %2434 = vmatmul.mubr.bf16.vlgmr.msra.gmra.mxu1 %v5197_v57 }
 0xb46   :  { %2462 = vmatpush1.bf16.msra.mxu0 %v4795_v47  ;;  %2503 = vmatpush1.bf16.msra.mxu1 %v4798_v6  ;;  %v6218_v47 = vld [vmem:[#allocation72_spill] sm:$0xff]  ;;  %v6219_v6 = vld [vmem:[#allocation73_spill] sm:$0xff] }
 0xb47   :  { %2463 = vmatprep.subr.bf16.mxu0 %v4801_v5  ;;  %2504 = vmatprep.subr.bf16.mxu1 %v4804_v11  ;;  %v6220_v5 = vld [vmem:[#allocation74_spill] sm:$0xff]  ;;  %v6221_v11 = vld [vmem:[#allocation75_spill] sm:$0xff] }
 0xb48   :  { %2493 = vmatprep.mubr.bf16.mxu0 %v5897_v39  ;;  %2534 = vmatprep.mubr.bf16.mxu1 %v5897_v39 }
 0xb4a   :  { %2464 = vmatpush1.bf16.msra.mxu0 %v4809_v13  ;;  %2505 = vmatpush1.bf16.msra.mxu1 %v4812_v8  ;;  %v6222_v13 = vld [vmem:[#allocation76_spill] sm:$0xff]  ;;  %v6223_v8 = vld [vmem:[#allocation77_spill] sm:$0xff] }
 0xb4b   :  { %2465 = vmatprep.subr.bf16.mxu0 %v4815_v14  ;;  %2506 = vmatprep.subr.bf16.mxu1 %v4818_v36  ;;  %v6224_v14 = vld [vmem:[#allocation78_spill] sm:$0xff]  ;;  %v6225_v36 = vld [vmem:[#allocation15_spill] sm:$0xff] }
 0xb4e   :  { %2466 = vmatpush1.bf16.msra.mxu0 %v6161_v24  ;;  %2507 = vmatpush1.bf16.msra.mxu1 %v6162_v7  ;;  %v6227_v24 = vld [vmem:[#allocation17_spill] sm:$0xff]  ;;  %v6228_v7 = vld [vmem:[#allocation18_spill] sm:$0xff] }
 0xb4f   :  { %2467 = vmatprep.subr.bf16.mxu0 %v6163_v12  ;;  %2508 = vmatprep.subr.bf16.mxu1 %v6218_v47  ;;  %v6229_v12 = vld [vmem:[#allocation19_spill] sm:$0xff]  ;;  %v2237_v47 = vadd.f32 %v5179_v44, %v4271_v3 }
 0xb52   :  { %2468 = vmatpush1.bf16.msra.mxu0 %v6219_v6  ;;  %2509 = vmatpush1.bf16.msra.mxu1 %v6220_v5 }
 0xb53   :  { %2469 = vmatprep.subr.bf16.mxu0 %v6221_v11  ;;  %2510 = vmatprep.subr.bf16.mxu1 %v6222_v13 }
 0xb56   :  { %2470 = vmatpush1.bf16.msra.mxu0 %v6223_v8  ;;  %2511 = vmatpush1.bf16.msra.mxu1 %v6224_v14 }
 0xb57   :  { %2471 = vmatprep.subr.bf16.mxu0 %v6225_v36  ;;  %2512 = vmatprep.subr.bf16.mxu1 %v6226_v31 }
 0xb5a   :  { %2472 = vmatpush1.bf16.msra.mxu0 %v6227_v24  ;;  %2513 = vmatpush1.bf16.msra.mxu1 %v6228_v7 }
 0xb5b   :  { %2473 = vmatprep.subr.bf16.mxu0 %v6229_v12  ;;  %2514 = vmatprep.subr.bf16.mxu1 %v6230_v15 }
 0xb5e   :  { %2474 = vmatpush1.bf16.msra.mxu0 %v6231_v46  ;;  %2515 = vmatpush1.bf16.msra.mxu1 %v6232_v21 }
 0xb5f   :  { %2475 = vmatprep.subr.bf16.mxu0 %v6233_v35  ;;  %2516 = vmatprep.subr.bf16.mxu1 %v6234_v43 }
 0xb62   :  { %2476 = vmatpush1.bf16.msra.mxu0 %v6235_v33  ;;  %2517 = vmatpush1.bf16.msra.mxu1 %v6236_v58 }
 0xb63   :  { %2555 = vmatprep.subr.bf16.mxu0 %v6237_v51  ;;  %2596 = vmatprep.subr.bf16.mxu1 %v6238_v29 }
 0xc05   :  { %v2394_v19 = vpop.f32.mrf.mxu0  ;;  %v2435_v23 = vpop.f32.mrf.mxu1 }
 0xc06   :  { %v2395_v60 = vadd.f32 %v2394_v19, %v2196_v49  ;;  %v2436_v8 = vadd.f32 %v2435_v23, %v2237_v47  ;;  %v6245_v47 = vld [vmem:[#allocation32_spill] sm:$0xff] }
 0xc07   :  { %v2396_v37 = vpop.f32.mrf.mxu0  ;;  %v2437_v61 = vpop.f32.mrf.mxu1 }
 0xc08   :  { %v2442_v6 = vmul.f32 0.5, %v2395_v60  ;;  %v2397_v5 = vadd.f32 %v2396_v37, %v2198_v32  ;;  %v2438_v31 = vadd.f32 %v2437_v61, %v2239_v27  ;;  %v6242_v60 = vld [vmem:[#allocation28_spill] sm:$0xff]  ;;  %v6243_v37 = vld [vmem:[#allocation29_spill] sm:$0xff]  ;;  %v6244_v61 = vld [vmem:[#allocation31_spill] sm:$0xff] }
 0xc09   :  { %v2398_v11 = vpop.f32.mrf.mxu0  ;;  %v2439_v13 = vpop.f32.mrf.mxu1  ;;  %v5293_v27 = vld [vmem:[#allocation7 + $0xe0] ss:$16 sps:$4 sm:$0xff]  }
 0xc0a   :  { %3465 = vtanh.f32 %v2442_v6  ;;  %v2446_v14 = vmul.f32 0.5, %v2397_v5  ;;  %v2451_v24 = vmul.f32 0.5, %v2438_v31  ;;  %v6246_v6 = vld [vmem:[#allocation33_spill] sm:$0xff]  ;;  %v6247_v5 = vld [vmem:[#allocation34_spill] sm:$0xff]  ;;  %v6248_v11 = vld [vmem:[#allocation35_spill] sm:$0xff]  ;;  %6254 = vst [vmem:[#allocation14_spill] sm:$0xff] %v5293_v27 }
 0xc0b   :  { %v2399_v36 = vpop.f32.mrf.mxu0  ;;  %v2440_v20 = vpop.f32.mrf.mxu1  ;;  %v6249_v13 = vld [vmem:[#allocation48_spill] sm:$0xff] }
 0xc0c   :  { %3467 = vtanh.f32 %v2446_v14  ;;  %v6251_v14 = vld [vmem:[#allocation52_spill] sm:$0xff]  ;;  %v5288_v20 = vld [vmem:[#allocation7 + $0xec] ss:$16 sps:$4 sm:$0xff]  }
 0xc0d   :  { %3469 = vtanh.f32 %v2436_v8  ;;  %v6250_v8 = vld [vmem:[#allocation51_spill] sm:$0xff]  ;;  %v5285_v36 = vld [vmem:[#allocation7 + $0xe4] ss:$16 sps:$4 sm:$0xff]   ;;  %6253 = vst [vmem:[#allocation54_spill] sm:$0xff] %v5288_v20  ;;  %v5296_v31 = vld [vmem:[#allocation7 + $0xe8] ss:$16 sps:$4 sm:$0xff]  }
 0xc0e   :  { %3471 = vtanh.f32 %v2451_v24  ;;  %6252 = vst [vmem:[#allocation53_spill] sm:$0xff] %v5285_v36  ;;  %6255 = vst [vmem:[#allocation38_spill] sm:$0xff] %v5296_v31  ;;  %v5299_v24 = vld [vmem:[#allocation7 + $0xc4] ss:$16 sps:$4 sm:$0xff]  }
 0xc0f   :  { %6256 = vst [vmem:[#allocation39_spill] sm:$0xff] %v5299_v24 }
 0xc17   :  { %v3466_v7 = vpop.eup %3465 }
 0xc18   :  { %v2444_v12 = vadd.f32 1.0, %v3466_v7  ;;  %v5302_v7 = vld [vmem:[#allocation7 + $0xcc] ss:$16 sps:$4 sm:$0xff]  }
 0xc19   :  { %v3468_v15 = vpop.eup %3467  ;;  %6257 = vst [vmem:[#allocation40_spill] sm:$0xff] %v5302_v7 }
 0xc1a   :  { %v2445_v44 = vmul.f32 0.5, %v2444_v12  ;;  %v2448_v46 = vadd.f32 1.0, %v3468_v15  ;;  %v3470_v21 = vpop.eup %3469  ;;  %v5310_v12 = vld [vmem:[#allocation7 + $0xc8] ss:$16 sps:$4 sm:$0xff]   ;;  %v5313_v15 = vld [vmem:[#allocation7 + $0xa4] ss:$16 sps:$4 sm:$0xff]  }
 0xc1b   :  { %v3472_v34 = vpop.eup %3471  ;;  %6259 = vst [vmem:[#allocation42_spill] sm:$0xff] %v5310_v12  ;;  %6260 = vst [vmem:[#allocation49_spill] sm:$0xff] %v5313_v15 }
 0xc1c   :  { %v2449_v35 = vmul.f32 0.5, %v2448_v46  ;;  %v2456_v43 = vmul.f32 %v3470_v21, %v2445_v44  ;;  %v2453_v49 = vadd.f32 1.0, %v3472_v34  ;;  %v5316_v44 = vld [vmem:[#allocation7 + $0xac] ss:$16 sps:$4 sm:$0xff]   ;;  %v5319_v46 = vld [vmem:[#allocation7 + $0xa0] ss:$16 sps:$4 sm:$0xff]  }
 0xc1d   :  { %6261 = vst [vmem:[#allocation50_spill] sm:$0xff] %v5316_v44  ;;  %6262 = vst [vmem:[#allocation55_spill] sm:$0xff] %v5319_v46  ;;  %v5322_v21 = vld [vmem:[#allocation7 + $0xa8] ss:$16 sps:$4 sm:$0xff]  }
 0xc1e   :  { %v2455_v33 = vmul.f32 %v2449_v35, %v5044_v9  ;;  %v2454_v42 = vmul.f32 0.5, %v2453_v49  ;;  %v6241_v9 = vld [vmem:[#allocation27_spill] sm:$0xff]  ;;  %6263 = vst [vmem:[#allocation56_spill] sm:$0xff] %v5322_v21  ;;  %v5325_v35 = vld [vmem:[#allocation7 + $0x84] ss:$16 sps:$4 sm:$0xff]  }
 0xc1f   :  { %6264 = vst [vmem:[#allocation69_spill] sm:$0xff] %v5325_v35  ;;  %v5334_v34 = vld [vmem:[#allocation7 + $0x88] ss:$16 sps:$4 sm:$0xff]   ;;  %v5337_v49 = vld [vmem:[#allocation7 + $0x64] ss:$16 sps:$4 sm:$0xff]  }
 0xc20   :  { %v5250_v58 = vadd.f32 %v2456_v43, %v2455_v33  ;;  %v5328_v43 = vld [vmem:[#allocation7 + $0x8c] ss:$16 sps:$4 sm:$0xff]   ;;  %v5331_v33 = vld [vmem:[#allocation7 + $0x80] ss:$16 sps:$4 sm:$0xff]   ;;  %6267 = vst [vmem:[#allocation30_spill] sm:$0xff] %v5334_v34  ;;  %6268 = vst [vmem:[#allocation57_spill] sm:$0xff] %v5337_v49 }
 0xc21   :  { %6265 = vst [vmem:[#allocation70_spill] sm:$0xff] %v5328_v43  ;;  %6266 = vst [vmem:[#allocation71_spill] sm:$0xff] %v5331_v33 }
 0xc22   :  { %3473 = vtanh.f32 %v5250_v58 }
 0xc2f   :  { %v3474_v19 = vpop.eup %3473 }
 0xc30   :  { %v2459_v23 = vmul.f32 %v3474_v19, %v2454_v42  ;;  %v5340_v42 = vld [vmem:[#allocation7 + $0x6c] ss:$16 sps:$4 sm:$0xff]   ;;  %v5343_v19 = vld [vmem:[#allocation7 + $0x60] ss:$16 sps:$4 sm:$0xff]  }
 0xc31   :  { %6269 = vst [vmem:[#allocation58_spill] sm:$0xff] %v5340_v42  ;;  %6270 = vst [vmem:[#allocation59_spill] sm:$0xff] %v5343_v19 }
 0xc32   :  { %v2460_v32 = vpack.c.bf16 %v2459_v23, %v2459_v23  ;;  %v5346_v23 = vld [vmem:[#allocation7 + $0x68] ss:$16 sps:$4 sm:$0xff]  }
 0xc33   :  { %6271 = vst [vmem:[#allocation60_spill] sm:$0xff] %v5346_v23 }
 0xc34   :  { %2494 = vmatmul.mubr.bf16.vlgmr.msra.gmra.mxu0 %v2460_v32  ;;  %2535 = vmatmul.mubr.bf16.vlgmr.msra.gmra.mxu1 %v2460_v32  ;;  %v5349_v32 = vld [vmem:[#allocation7 + $0x44] ss:$16 sps:$4 sm:$0xff]  }
 0xc35   :  { %2556 = vmatpush1.bf16.msra.mxu0 %v5047_v52  ;;  %2597 = vmatpush1.bf16.msra.mxu1 %v5050_v62  ;;  %6272 = vst [vmem:[#allocation61_spill] sm:$0xff] %v5349_v32 }
 0xc36   :  { %2557 = vmatprep.subr.bf16.mxu0 %v5053_v28  ;;  %2598 = vmatprep.subr.bf16.mxu1 %v5056_v54 }
 0xc37   :  { %2587 = vmatprep.mubr.bf16.mxu0 %v5897_v39  ;;  %2628 = vmatprep.mubr.bf16.mxu1 %v5897_v39 }
 0xc39   :  { %2558 = vmatpush1.bf16.msra.mxu0 %v5061_v22  ;;  %2599 = vmatpush1.bf16.msra.mxu1 %v5064_v59 }
 0xc3a   :  { %2559 = vmatprep.subr.bf16.mxu0 %v5067_v38  ;;  %2600 = vmatprep.subr.bf16.mxu1 %v5070_v18 }
 0xc3d   :  { %2560 = vmatpush1.bf16.msra.mxu0 %v5073_v41  ;;  %2601 = vmatpush1.bf16.msra.mxu1 %v5076_v63 }
 0xc3e   :  { %2561 = vmatprep.subr.bf16.mxu0 %v5079_v16  ;;  %2602 = vmatprep.subr.bf16.mxu1 %v5082_v10 }
 0xc41   :  { %2562 = vmatpush1.bf16.msra.mxu0 %v5085_v30  ;;  %2603 = vmatpush1.bf16.msra.mxu1 %v5088_v56 }
 0xc42   :  { %2563 = vmatprep.subr.bf16.mxu0 %v5091_v55  ;;  %2604 = vmatprep.subr.bf16.mxu1 %v5094_v45 }
 0xc45   :  { %2564 = vmatpush1.bf16.msra.mxu0 %v6241_v9  ;;  %2605 = vmatpush1.bf16.msra.mxu1 %v6242_v60 }
 0xc46   :  { %2565 = vmatprep.subr.bf16.mxu0 %v6243_v37  ;;  %2606 = vmatprep.subr.bf16.mxu1 %v6244_v61 }
 0xc49   :  { %2566 = vmatpush1.bf16.msra.mxu0 %v6245_v47  ;;  %2607 = vmatpush1.bf16.msra.mxu1 %v6246_v6 }
 0xc4a   :  { %2567 = vmatprep.subr.bf16.mxu0 %v6247_v5  ;;  %2608 = vmatprep.subr.bf16.mxu1 %v6248_v11 }
 0xc4d   :  { %2568 = vmatpush1.bf16.msra.mxu0 %v5121_v40  ;;  %2609 = vmatpush1.bf16.msra.mxu1 %v5124_v17 }
 0xc4e   :  { %2569 = vmatprep.subr.bf16.mxu0 %v5127_v4  ;;  %2610 = vmatprep.subr.bf16.mxu1 %v6249_v13 }
 0xc51   :  { %2570 = vmatpush1.bf16.msra.mxu0 %v6250_v8  ;;  %2611 = vmatpush1.bf16.msra.mxu1 %v6251_v14 }
 0xc52   :  { %2660 = vmatprep.subr.bf16.mxu0 %v5285_v36  ;;  %2701 = vmatprep.subr.bf16.mxu1 %v5288_v20 }
 0xc54   :  { %2588 = vmatmul.mubr.bf16.vlgmr.msra.gmra.mxu0 %v5197_v57  ;;  %2629 = vmatmul.mubr.bf16.vlgmr.msra.gmra.mxu1 %v5197_v57  ;;  %v5307_v57 = vld [vmem:[#allocation7 + $0xc0] ss:$16 sps:$4 sm:$0xff]  }
 0xc55   :  { %2661 = vmatpush1.bf16.msra.mxu0 %v5293_v27  ;;  %2702 = vmatpush1.bf16.msra.mxu1 %v5296_v31  ;;  %6258 = vst [vmem:[#allocation41_spill] sm:$0xff] %v5307_v57  ;;  %v6288_v31 = vld [vmem:[#allocation47_spill] sm:$0xff] }
 0xc56   :  { %2662 = vmatprep.subr.bf16.mxu0 %v5299_v24  ;;  %2703 = vmatprep.subr.bf16.mxu1 %v5302_v7 }
 0xc57   :  { %2692 = vmatprep.mubr.bf16.mxu0 %v5897_v39  ;;  %2733 = vmatprep.mubr.bf16.mxu1 %v5897_v39 }
 0xc59   :  { %2663 = vmatpush1.bf16.msra.mxu0 %v5307_v57  ;;  %2704 = vmatpush1.bf16.msra.mxu1 %v5310_v12 }
 0xc5a   :  { %2664 = vmatprep.subr.bf16.mxu0 %v5313_v15  ;;  %2705 = vmatprep.subr.bf16.mxu1 %v5316_v44  ;;  %v2545_v44 = vpop.permute.xlu1 %2544  ;;  %v6284_v15 = vld [vmem:[#allocation43_spill] sm:$0xff] }
 0xc5b   :  { %v2547_v12 = vmul.f32 %v2545_v44, %v6284_v15 }
 0xc5d   :  { %2665 = vmatpush1.bf16.msra.mxu0 %v5319_v46  ;;  %2706 = vmatpush1.bf16.msra.mxu1 %v5322_v21 }
 0xc5e   :  { %2666 = vmatprep.subr.bf16.mxu0 %v5325_v35  ;;  %2707 = vmatprep.subr.bf16.mxu1 %v5328_v43 }
 0xc61   :  { %2667 = vmatpush1.bf16.msra.mxu0 %v5331_v33  ;;  %2708 = vmatpush1.bf16.msra.mxu1 %v5334_v34  ;;  %v5352_v34 = vld [vmem:[#allocation7 + $0x4c] ss:$16 sps:$4 sm:$0xff]  }
 0xc62   :  { %2668 = vmatprep.subr.bf16.mxu0 %v5337_v49  ;;  %2709 = vmatprep.subr.bf16.mxu1 %v5340_v42  ;;  %6273 = vst [vmem:[#allocation62_spill] sm:$0xff] %v5352_v34  ;;  %v5355_v49 = vld [vmem:[#allocation7 + $0x40] ss:$16 sps:$4 sm:$0xff]   ;;  %v5358_v42 = vld [vmem:[#allocation7 + $0x48] ss:$16 sps:$4 sm:$0xff]  }
 0xc63   :  { %6274 = vst [vmem:[#allocation63_spill] sm:$0xff] %v5355_v49  ;;  %6275 = vst [vmem:[#allocation64_spill] sm:$0xff] %v5358_v42  ;;  %v3678_v33 = vld [vmem:[#allocation8 + $0xec] ss:$16 sps:$4 sm:$0xff]  }
 0xc65   :  { %2669 = vmatpush1.bf16.msra.mxu0 %v5343_v19  ;;  %2710 = vmatpush1.bf16.msra.mxu1 %v5346_v23  ;;  %v5361_v19 = vld [vmem:[#allocation7 + $0x24] ss:$16 sps:$4 sm:$0xff]   ;;  %v5364_v23 = vld [vmem:[#allocation7 + $0x2c] ss:$16 sps:$4 sm:$0xff]  }
 0xc66   :  { %2670 = vmatprep.subr.bf16.mxu0 %v5349_v32  ;;  %2711 = vmatprep.subr.bf16.mxu1 %v5352_v34  ;;  %6276 = vst [vmem:[#allocation65_spill] sm:$0xff] %v5361_v19  ;;  %6277 = vst [vmem:[#allocation66_spill] sm:$0xff] %v5364_v23  ;;  %v5367_v32 = vld [vmem:[#allocation7 + $0x20] ss:$16 sps:$4 sm:$0xff]   ;;  %v5370_v34 = vld [vmem:[#allocation7 + $0x28] ss:$16 sps:$4 sm:$0xff]  }
 0xc67   :  { %6278 = vst [vmem:[#allocation67_spill] sm:$0xff] %v5367_v32  ;;  %6279 = vst [vmem:[#allocation68_spill] sm:$0xff] %v5370_v34 }
 0xc69   :  { %2671 = vmatpush1.bf16.msra.mxu0 %v5355_v49  ;;  %2712 = vmatpush1.bf16.msra.mxu1 %v5358_v42  ;;  %v5373_v49 = vld [vmem:[#allocation7 + $0x4] ss:$16 sps:$4 sm:$0xff]   ;;  %v5376_v42 = vld [vmem:[#allocation7 + $0xc] ss:$16 sps:$4 sm:$0xff]  }
 0xc6a   :  { %2672 = vmatprep.subr.bf16.mxu0 %v5361_v19  ;;  %2713 = vmatprep.subr.bf16.mxu1 %v5364_v23  ;;  %6280 = vst [vmem:[#allocation72_spill] sm:$0xff] %v5373_v49  ;;  %6281 = vst [vmem:[#allocation73_spill] sm:$0xff] %v5376_v42  ;;  %v5379_v19 = vld [vmem:[#allocation7] ss:$16 sps:$4 sm:$0xff]   ;;  %v5382_v23 = vld [vmem:[#allocation7 + $0x8] ss:$16 sps:$4 sm:$0xff]  }
 0xc6b   :  { %6282 = vst [vmem:[#allocation74_spill] sm:$0xff] %v5379_v19  ;;  %6283 = vst [vmem:[#allocation75_spill] sm:$0xff] %v5382_v23 }
 0xc6d   :  { %2673 = vmatpush1.bf16.msra.mxu0 %v5367_v32  ;;  %2714 = vmatpush1.bf16.msra.mxu1 %v5370_v34  ;;  %v3677_v32 = vld [vmem:[#allocation8 + $0xe4] ss:$16 sps:$4 sm:$0xff]  }
 0xc6e   :  { %2674 = vmatprep.subr.bf16.mxu0 %v5373_v49  ;;  %2715 = vmatprep.subr.bf16.mxu1 %v5376_v42 }
 0xc71   :  { %2675 = vmatpush1.bf16.msra.mxu0 %v5379_v19  ;;  %2716 = vmatpush1.bf16.msra.mxu1 %v5382_v23  ;;  %v6285_v23 = vld [vmem:[#allocation44_spill] sm:$0xff] }
 0xc72   :  { %2761 = vmatprep.subr.bf16.mxu0 %v3677_v32  ;;  %2802 = vmatprep.subr.bf16.mxu1 %v3678_v33  ;;  %v2548_v57 = vmul.f32 %v2545_v44, %v6285_v23  ;;  %v6286_v32 = vld [vmem:[#allocation45_spill] sm:$0xff]  ;;  %v6287_v33 = vld [vmem:[#allocation46_spill] sm:$0xff]  ;;  %v2550_v23 = vmul.f32 %v2545_v44, %v5963_v2 }
 0xc73   :  { %v2551_v7 = vadd.f32 %v2547_v12, %v6286_v32  ;;  %v2549_v24 = vmul.f32 %v2545_v44, %v6287_v33 }
 0xc74   :  { %v2552_v27 = vadd.f32 %v2548_v57, %v6288_v31  ;;  %v2554_v57 = vadd.f32 %v2550_v23, %v4152_v53 }
 0xcf4   :  { %v5385_v34 = vpop.f32.mrf.mxu0  ;;  %v5387_v43 = vpop.f32.mrf.mxu1 }
 0xcf6   :  { %v5389_v49 = vpop.f32.mrf.mxu0  ;;  %v5391_v35 = vpop.f32.mrf.mxu1 }
 0xcf8   :  { %v2499_v42 = vpop.f32.mrf.mxu0  ;;  %v2540_v21 = vpop.f32.mrf.mxu1 }
 0xcfa   :  { %v2500_v46 = vpop.f32.mrf.mxu0  ;;  %v2541_v19 = vpop.f32.mrf.mxu1 }
 0xcfb   :  { %v2553_v46 = vadd.f32 %v2549_v24, %v4143_v48 }
 0xd14   :  { %v2589_v20 = vpop.f32.mrf.mxu0  ;;  %v2630_v36 = vpop.f32.mrf.mxu1 }
 0xd15   :  { %v2637_v14 = vadd.f32 %v2589_v20, %v2551_v7  ;;  %v2639_v33 = vadd.f32 %v2630_v36, %v2553_v46  ;;  %v3682_v46 = vld [vmem:[#allocation8 + $0xcc] ss:$16 sps:$4 sm:$0xff]  }
 0xd16   :  { %v2591_v8 = vpop.f32.mrf.mxu0  ;;  %v2632_v13 = vpop.f32.mrf.mxu1 }
 0xd17   :  { %v2641_v42 = vmul.f32 0.5, %v2637_v14  ;;  %v2638_v21 = vadd.f32 %v2591_v8, %v2552_v27  ;;  %v2640_v20 = vadd.f32 %v2632_v13, %v2554_v57  ;;  %v3685_v57 = vld [vmem:[#allocation8 + $0xa4] ss:$16 sps:$4 sm:$0xff]  }
 0xd18   :  { %v2593_v19 = vpop.f32.mrf.mxu0  ;;  %v2634_v4 = vpop.f32.mrf.mxu1 }
 0xd19   :  { %3475 = vtanh.f32 %v2641_v42  ;;  %v2645_v15 = vmul.f32 0.5, %v2638_v21  ;;  %v2650_v7 = vmul.f32 0.5, %v2640_v20  ;;  %v3683_v19 = vld [vmem:[#allocation8 + $0xc0] ss:$16 sps:$4 sm:$0xff]   ;;  %v3686_v20 = vld [vmem:[#allocation8 + $0xac] ss:$16 sps:$4 sm:$0xff]  }
 0xd1a   :  { %v2594_v12 = vpop.f32.mrf.mxu0  ;;  %v2635_v32 = vpop.f32.mrf.mxu1 }
 0xd1b   :  { %3477 = vtanh.f32 %v2645_v15  ;;  %v3684_v12 = vld [vmem:[#allocation8 + $0xc8] ss:$16 sps:$4 sm:$0xff]  }
 0xd1c   :  { %3479 = vtanh.f32 %v2639_v33 }
 0xd1d   :  { %3481 = vtanh.f32 %v2650_v7  ;;  %v3687_v7 = vld [vmem:[#allocation8 + $0xa0] ss:$16 sps:$4 sm:$0xff]  }
 0xd26   :  { %v3476_v31 = vpop.eup %3475 }
 0xd27   :  { %v2643_v14 = vadd.f32 1.0, %v3476_v31  ;;  %v3680_v31 = vld [vmem:[#allocation8 + $0xe8] ss:$16 sps:$4 sm:$0xff]  }
 0xd28   :  { %v3478_v17 = vpop.eup %3477 }
 0xd29   :  { %v2644_v24 = vmul.f32 0.5, %v2643_v14  ;;  %v2647_v8 = vadd.f32 1.0, %v3478_v17  ;;  %v3480_v27 = vpop.eup %3479  ;;  %v3679_v17 = vld [vmem:[#allocation8 + $0xe0] ss:$16 sps:$4 sm:$0xff]   ;;  %v3688_v14 = vld [vmem:[#allocation8 + $0xa8] ss:$16 sps:$4 sm:$0xff]  }
 0xd2a   :  { %v3482_v36 = vpop.eup %3481 }
 0xd2b   :  { %v2648_v4 = vmul.f32 0.5, %v2647_v8  ;;  %v2655_v44 = vmul.f32 %v3480_v27, %v2644_v24  ;;  %v2652_v15 = vadd.f32 1.0, %v3482_v36  ;;  %v3689_v24 = vld [vmem:[#allocation8 + $0x84] ss:$16 sps:$4 sm:$0xff]   ;;  %v3690_v8 = vld [vmem:[#allocation8 + $0x8c] ss:$16 sps:$4 sm:$0xff]  }
 0xd2c   :  { %v3692_v27 = vld [vmem:[#allocation8 + $0x88] ss:$16 sps:$4 sm:$0xff]   ;;  %v3695_v36 = vld [vmem:[#allocation8 + $0x60] ss:$16 sps:$4 sm:$0xff]  }
 0xd2d   :  { %v2654_v42 = vmul.f32 %v2648_v4, %v5194_v26  ;;  %v2653_v23 = vmul.f32 0.5, %v2652_v15  ;;  %v3681_v26 = vld [vmem:[#allocation8 + $0xc4] ss:$16 sps:$4 sm:$0xff]   ;;  %v3691_v4 = vld [vmem:[#allocation8 + $0x80] ss:$16 sps:$4 sm:$0xff]  }
 0xd2e   :  { %v3696_v15 = vld [vmem:[#allocation8 + $0x68] ss:$16 sps:$4 sm:$0xff]  }
 0xd2f   :  { %v5402_v21 = vadd.f32 %v2655_v44, %v2654_v42  ;;  %v3693_v42 = vld [vmem:[#allocation8 + $0x64] ss:$16 sps:$4 sm:$0xff]   ;;  %v3694_v44 = vld [vmem:[#allocation8 + $0x6c] ss:$16 sps:$4 sm:$0xff]  }
 0xd31   :  { %3483 = vtanh.f32 %v5402_v21 }
 0xd3e   :  { %v3484_v13 = vpop.eup %3483 }
 0xd3f   :  { %v2658_v32 = vmul.f32 %v3484_v13, %v2653_v23  ;;  %v3697_v23 = vld [vmem:[#allocation8 + $0x44] ss:$16 sps:$4 sm:$0xff]   ;;  %v3698_v13 = vld [vmem:[#allocation8 + $0x4c] ss:$16 sps:$4 sm:$0xff]  }
 0xd41   :  { %v5405_v33 = vpack.c.bf16 %v2658_v32, %v2658_v32  ;;  %v3699_v32 = vld [vmem:[#allocation8 + $0x40] ss:$16 sps:$4 sm:$0xff]  }
 0xd43   :  { %2693 = vmatmul.mubr.bf16.vlgmr.msra.gmra.mxu0 %v5405_v33  ;;  %2734 = vmatmul.mubr.bf16.vlgmr.msra.gmra.mxu1 %v5405_v33 }
 0xd44   :  { %2762 = vmatpush1.bf16.msra.mxu0 %v3679_v17  ;;  %2803 = vmatpush1.bf16.msra.mxu1 %v3680_v31  ;;  %v3700_v17 = vld [vmem:[#allocation8 + $0x48] ss:$16 sps:$4 sm:$0xff]   ;;  %v3701_v31 = vld [vmem:[#allocation8 + $0x24] ss:$16 sps:$4 sm:$0xff]  }
 0xd45   :  { %2763 = vmatprep.subr.bf16.mxu0 %v3681_v26  ;;  %2804 = vmatprep.subr.bf16.mxu1 %v3682_v46  ;;  %v3702_v26 = vld [vmem:[#allocation8 + $0x2c] ss:$16 sps:$4 sm:$0xff]   ;;  %v3703_v46 = vld [vmem:[#allocation8 + $0x20] ss:$16 sps:$4 sm:$0xff]  }
 0xd46   :  { %2793 = vmatprep.mubr.bf16.mxu0 %v5897_v39  ;;  %2834 = vmatprep.mubr.bf16.mxu1 %v5897_v39 }
 0xd48   :  { %2764 = vmatpush1.bf16.msra.mxu0 %v3683_v19  ;;  %2805 = vmatpush1.bf16.msra.mxu1 %v3684_v12  ;;  %v3704_v19 = vld [vmem:[#allocation8 + $0x28] ss:$16 sps:$4 sm:$0xff]   ;;  %v3705_v12 = vld [vmem:[#allocation8 + $0x4] ss:$16 sps:$4 sm:$0xff]  }
 0xd49   :  { %2765 = vmatprep.subr.bf16.mxu0 %v3685_v57  ;;  %2806 = vmatprep.subr.bf16.mxu1 %v3686_v20  ;;  %v3706_v57 = vld [vmem:[#allocation8 + $0xc] ss:$16 sps:$4 sm:$0xff]   ;;  %v3707_v20 = vld [vmem:[#allocation8] ss:$16 sps:$4 sm:$0xff]  }
 0xd4c   :  { %2766 = vmatpush1.bf16.msra.mxu0 %v3687_v7  ;;  %2807 = vmatpush1.bf16.msra.mxu1 %v3688_v14  ;;  %v3708_v7 = vld [vmem:[#allocation8 + $0x8] ss:$16 sps:$4 sm:$0xff]   ;;  %v3829_v14 = vmov 7  }
 0xd4d   :  { %2767 = vmatprep.subr.bf16.mxu0 %v3689_v24  ;;  %2808 = vmatprep.subr.bf16.mxu1 %v3690_v8  ;;  %v2496_v24 = vadd.f32 %v5385_v34, %v6239_v0 }
 0xd4e   :  { %3209 = vset.pattern.permute.xlu1 %v3829_v14  ;;  %3210 = vset.pattern.permute.xlu0 %v3829_v14 }
 0xd4f   :  { %2844 = vperm.xlu1 %3209, %v5238_v50  }
 0xd50   :  { %2768 = vmatpush1.bf16.msra.mxu0 %v3691_v4  ;;  %2809 = vmatpush1.bf16.msra.mxu1 %v3692_v27  ;;  %v2498_v27 = vadd.f32 %v5389_v49, %v6240_v25  ;;  %v2539_v49 = vadd.f32 %v5391_v35, %v4276_v1 }
 0xd51   :  { %2769 = vmatprep.subr.bf16.mxu0 %v3693_v42  ;;  %2810 = vmatprep.subr.bf16.mxu1 %v3694_v44 }
 0xd54   :  { %2770 = vmatpush1.bf16.msra.mxu0 %v3695_v36  ;;  %2811 = vmatpush1.bf16.msra.mxu1 %v3696_v15 }
 0xd55   :  { %2771 = vmatprep.subr.bf16.mxu0 %v3697_v23  ;;  %2812 = vmatprep.subr.bf16.mxu1 %v3698_v13 }
 0xd58   :  { %2772 = vmatpush1.bf16.msra.mxu0 %v3699_v32  ;;  %2813 = vmatpush1.bf16.msra.mxu1 %v3700_v17 }
 0xd59   :  { %2773 = vmatprep.subr.bf16.mxu0 %v3701_v31  ;;  %2814 = vmatprep.subr.bf16.mxu1 %v3702_v26 }
 0xd5c   :  { %2774 = vmatpush1.bf16.msra.mxu0 %v3703_v46  ;;  %2815 = vmatpush1.bf16.msra.mxu1 %v3704_v19 }
 0xd5d   :  { %2775 = vmatprep.subr.bf16.mxu0 %v3705_v12  ;;  %2816 = vmatprep.subr.bf16.mxu1 %v3706_v57 }
 0xd60   :  { %2776 = vmatpush1.bf16.msra.mxu0 %v3707_v20  ;;  %2817 = vmatpush1.bf16.msra.mxu1 %v3708_v7 }
 0xd61   :  { %2855 = vmatprep.subr.bf16.mxu0 %v6237_v51  ;;  %2896 = vmatprep.subr.bf16.mxu1 %v6238_v29  ;;  %v2537_v51 = vadd.f32 %v5387_v43, %v4271_v3 }
 0xe03   :  { %v2694_v8 = vpop.f32.mrf.mxu0  ;;  %v2735_v4 = vpop.f32.mrf.mxu1 }
 0xe04   :  { %v2695_v42 = vadd.f32 %v2694_v8, %v2496_v24  ;;  %v2736_v50 = vadd.f32 %v2735_v4, %v2537_v51  ;;  %v6317_v51 = vld [vmem:[#allocation64_spill] sm:$0xff] }
 0xe05   :  { %v2696_v44 = vpop.f32.mrf.mxu0  ;;  %v2737_v36 = vpop.f32.mrf.mxu1 }
 0xe06   :  { %v2742_v29 = vmul.f32 0.5, %v2695_v42  ;;  %v2697_v15 = vadd.f32 %v2696_v44, %v2498_v27  ;;  %v2738_v31 = vadd.f32 %v2737_v36, %v2539_v49 }
 0xe07   :  { %v2698_v23 = vpop.f32.mrf.mxu0  ;;  %v2739_v13 = vpop.f32.mrf.mxu1 }
 0xe08   :  { %3485 = vtanh.f32 %v2742_v29  ;;  %v2746_v32 = vmul.f32 0.5, %v2697_v15  ;;  %v2751_v26 = vmul.f32 0.5, %v2738_v31  ;;  %v6318_v29 = vld [vmem:[#allocation65_spill] sm:$0xff]  ;;  %v6319_v15 = vld [vmem:[#allocation66_spill] sm:$0xff]  ;;  %v6320_v23 = vld [vmem:[#allocation67_spill] sm:$0xff] }
 0xe09   :  { %v2699_v17 = vpop.f32.mrf.mxu0  ;;  %v2740_v34 = vpop.f32.mrf.mxu1  ;;  %v6321_v13 = vld [vmem:[#allocation68_spill] sm:$0xff] }
 0xe0a   :  { %3487 = vtanh.f32 %v2746_v32  ;;  %v6323_v32 = vld [vmem:[#allocation73_spill] sm:$0xff]  ;;  %v6324_v17 = vld [vmem:[#allocation74_spill] sm:$0xff]  ;;  %v6325_v34 = vld [vmem:[#allocation75_spill] sm:$0xff] }
 0xe0b   :  { %3489 = vtanh.f32 %v2736_v50  ;;  %v6322_v50 = vld [vmem:[#allocation72_spill] sm:$0xff] }
 0xe0c   :  { %3491 = vtanh.f32 %v2751_v26 }
 0xe15   :  { %v3486_v46 = vpop.eup %3485 }
 0xe16   :  { %v2744_v19 = vadd.f32 1.0, %v3486_v46 }
 0xe17   :  { %v3488_v12 = vpop.eup %3487 }
 0xe18   :  { %v2745_v43 = vmul.f32 0.5, %v2744_v19  ;;  %v2748_v57 = vadd.f32 1.0, %v3488_v12  ;;  %v3490_v20 = vpop.eup %3489 }
 0xe19   :  { %v3492_v4 = vpop.eup %3491 }
 0xe1a   :  { %v2749_v7 = vmul.f32 0.5, %v2748_v57  ;;  %v2756_v14 = vmul.f32 %v3490_v20, %v2745_v43  ;;  %v2753_v27 = vadd.f32 1.0, %v3492_v4  ;;  %v2845_v20 = vpop.permute.xlu1 %2844 }
 0xe1c   :  { %v2755_v24 = vmul.f32 %v2749_v7, %v5250_v58  ;;  %v2754_v35 = vmul.f32 0.5, %v2753_v27  ;;  %v6306_v58 = vld [vmem:[#allocation69_spill] sm:$0xff]  ;;  %v6326_v7 = vld [vmem:[#allocation43_spill] sm:$0xff] }
 0xe1d   :  { %v6328_v27 = vld [vmem:[#allocation45_spill] sm:$0xff] }
 0xe1e   :  { %v5423_v8 = vadd.f32 %v2756_v14, %v2755_v24  ;;  %v2847_v14 = vmul.f32 %v2845_v20, %v6326_v7  ;;  %v6327_v24 = vld [vmem:[#allocation44_spill] sm:$0xff] }
 0xe1f   :  { %v2848_v4 = vmul.f32 %v2845_v20, %v6327_v24 }
 0xe20   :  { %3493 = vtanh.f32 %v5423_v8 }
 0xe2d   :  { %v3494_v42 = vpop.eup %3493 }
 0xe2e   :  { %v2759_v44 = vmul.f32 %v3494_v42, %v2754_v35  ;;  %v2851_v35 = vadd.f32 %v2847_v14, %v6328_v27  ;;  %v6329_v42 = vld [vmem:[#allocation46_spill] sm:$0xff] }
 0xe30   :  { %v2760_v36 = vpack.c.bf16 %v2759_v44, %v2759_v44  ;;  %v2849_v44 = vmul.f32 %v2845_v20, %v6329_v42 }
 0xe32   :  { %2794 = vmatmul.mubr.bf16.vlgmr.msra.gmra.mxu0 %v2760_v36  ;;  %2835 = vmatmul.mubr.bf16.vlgmr.msra.gmra.mxu1 %v2760_v36  ;;  %v6330_v36 = vld [vmem:[#allocation47_spill] sm:$0xff] }
 0xe33   :  { %2856 = vmatpush1.bf16.msra.mxu0 %v5047_v52  ;;  %2897 = vmatpush1.bf16.msra.mxu1 %v5050_v62  ;;  %v6289_v52 = vld [vmem:[#allocation36_spill] sm:$0xff]  ;;  %v6290_v62 = vld [vmem:[#allocation37_spill] sm:$0xff] }
 0xe34   :  { %2857 = vmatprep.subr.bf16.mxu0 %v5053_v28  ;;  %2898 = vmatprep.subr.bf16.mxu1 %v5056_v54  ;;  %v6291_v28 = vld [vmem:[#allocation48_spill] sm:$0xff]  ;;  %v6292_v54 = vld [vmem:[#allocation51_spill] sm:$0xff] }
 0xe35   :  { %2887 = vmatprep.mubr.bf16.mxu0 %v5897_v39  ;;  %2928 = vmatprep.mubr.bf16.mxu1 %v5897_v39 }
 0xe37   :  { %2858 = vmatpush1.bf16.msra.mxu0 %v5061_v22  ;;  %2899 = vmatpush1.bf16.msra.mxu1 %v5064_v59  ;;  %v6293_v22 = vld [vmem:[#allocation52_spill] sm:$0xff]  ;;  %v6294_v59 = vld [vmem:[#allocation53_spill] sm:$0xff] }
 0xe38   :  { %2859 = vmatprep.subr.bf16.mxu0 %v5067_v38  ;;  %2900 = vmatprep.subr.bf16.mxu1 %v5070_v18  ;;  %v6295_v38 = vld [vmem:[#allocation54_spill] sm:$0xff] }
 0xe39   :  { %v6296_v18 = vld [vmem:[#allocation14_spill] sm:$0xff] }
 0xe3b   :  { %2860 = vmatpush1.bf16.msra.mxu0 %v5073_v41  ;;  %2901 = vmatpush1.bf16.msra.mxu1 %v5076_v63  ;;  %v6297_v41 = vld [vmem:[#allocation38_spill] sm:$0xff]  ;;  %v6298_v63 = vld [vmem:[#allocation39_spill] sm:$0xff] }
 0xe3c   :  { %2861 = vmatprep.subr.bf16.mxu0 %v5079_v16  ;;  %2902 = vmatprep.subr.bf16.mxu1 %v5082_v10  ;;  %v6299_v16 = vld [vmem:[#allocation40_spill] sm:$0xff]  ;;  %v6300_v10 = vld [vmem:[#allocation41_spill] sm:$0xff] }
 0xe3f   :  { %2862 = vmatpush1.bf16.msra.mxu0 %v5085_v30  ;;  %2903 = vmatpush1.bf16.msra.mxu1 %v5088_v56  ;;  %v6301_v30 = vld [vmem:[#allocation42_spill] sm:$0xff]  ;;  %v6302_v56 = vld [vmem:[#allocation49_spill] sm:$0xff] }
 0xe40   :  { %2863 = vmatprep.subr.bf16.mxu0 %v5091_v55  ;;  %2904 = vmatprep.subr.bf16.mxu1 %v5094_v45  ;;  %v6303_v55 = vld [vmem:[#allocation50_spill] sm:$0xff]  ;;  %v6304_v45 = vld [vmem:[#allocation55_spill] sm:$0xff] }
 0xe43   :  { %2864 = vmatpush1.bf16.msra.mxu0 %v6241_v9  ;;  %2905 = vmatpush1.bf16.msra.mxu1 %v6242_v60  ;;  %v6307_v9 = vld [vmem:[#allocation70_spill] sm:$0xff]  ;;  %v6308_v60 = vld [vmem:[#allocation71_spill] sm:$0xff] }
 0xe44   :  { %2865 = vmatprep.subr.bf16.mxu0 %v6243_v37  ;;  %2906 = vmatprep.subr.bf16.mxu1 %v6244_v61  ;;  %v6309_v37 = vld [vmem:[#allocation30_spill] sm:$0xff] }
 0xe45   :  { %v6311_v61 = vld [vmem:[#allocation58_spill] sm:$0xff] }
 0xe47   :  { %2866 = vmatpush1.bf16.msra.mxu0 %v6245_v47  ;;  %2907 = vmatpush1.bf16.msra.mxu1 %v6246_v6  ;;  %v6312_v47 = vld [vmem:[#allocation59_spill] sm:$0xff]  ;;  %v6313_v6 = vld [vmem:[#allocation60_spill] sm:$0xff] }
 0xe48   :  { %2867 = vmatprep.subr.bf16.mxu0 %v6247_v5  ;;  %2908 = vmatprep.subr.bf16.mxu1 %v6248_v11  ;;  %v6314_v5 = vld [vmem:[#allocation61_spill] sm:$0xff]  ;;  %v6315_v11 = vld [vmem:[#allocation62_spill] sm:$0xff] }
 0xe4b   :  { %2868 = vmatpush1.bf16.msra.mxu0 %v5121_v40  ;;  %2909 = vmatpush1.bf16.msra.mxu1 %v6289_v52  ;;  %v6305_v40 = vld [vmem:[#allocation56_spill] sm:$0xff]  ;;  %v2852_v52 = vadd.f32 %v2848_v4, %v6330_v36 }
 0xe4c   :  { %2869 = vmatprep.subr.bf16.mxu0 %v6290_v62  ;;  %2910 = vmatprep.subr.bf16.mxu1 %v6291_v28 }
 0xe4f   :  { %2870 = vmatpush1.bf16.msra.mxu0 %v6292_v54  ;;  %2911 = vmatpush1.bf16.msra.mxu1 %v6293_v22 }
 0xe50   :  { %2960 = vmatprep.subr.bf16.mxu0 %v6294_v59  ;;  %3001 = vmatprep.subr.bf16.mxu1 %v6295_v38 }
 0xe52   :  { %2888 = vmatmul.mubr.bf16.vlgmr.msra.gmra.mxu0 %v5405_v33  ;;  %2929 = vmatmul.mubr.bf16.vlgmr.msra.gmra.mxu1 %v5405_v33  ;;  %v6316_v33 = vld [vmem:[#allocation63_spill] sm:$0xff] }
 0xe53   :  { %2961 = vmatpush1.bf16.msra.mxu0 %v6296_v18  ;;  %3002 = vmatpush1.bf16.msra.mxu1 %v6297_v41  ;;  %v2853_v18 = vadd.f32 %v2849_v44, %v4143_v48 }
 0xe54   :  { %2962 = vmatprep.subr.bf16.mxu0 %v6298_v63  ;;  %3003 = vmatprep.subr.bf16.mxu1 %v6299_v16 }
 0xe55   :  { %2992 = vmatprep.mubr.bf16.mxu0 %v5897_v39  ;;  %3033 = vmatprep.mubr.bf16.mxu1 %v5897_v39  ;;  %v6310_v39 = vld [vmem:[#allocation57_spill] sm:$0xff] }
 0xe57   :  { %2963 = vmatpush1.bf16.msra.mxu0 %v6300_v10  ;;  %3004 = vmatpush1.bf16.msra.mxu1 %v6301_v30  ;;  %v2850_v10 = vmul.f32 %v2845_v20, %v5963_v2 }
 0xe58   :  { %2964 = vmatprep.subr.bf16.mxu0 %v6302_v56  ;;  %3005 = vmatprep.subr.bf16.mxu1 %v6303_v55 }
 0xe5b   :  { %2965 = vmatpush1.bf16.msra.mxu0 %v6304_v45  ;;  %3006 = vmatpush1.bf16.msra.mxu1 %v6305_v40  ;;  %v2854_v40 = vadd.f32 %v2850_v10, %v4152_v53 }
 0xe5c   :  { %2966 = vmatprep.subr.bf16.mxu0 %v6306_v58  ;;  %3007 = vmatprep.subr.bf16.mxu1 %v6307_v9 }
 0xe5f   :  { %2967 = vmatpush1.bf16.msra.mxu0 %v6308_v60  ;;  %3008 = vmatpush1.bf16.msra.mxu1 %v6309_v37 }
 0xe60   :  { %2968 = vmatprep.subr.bf16.mxu0 %v6310_v39  ;;  %3009 = vmatprep.subr.bf16.mxu1 %v6311_v61 }
 0xe63   :  { %2969 = vmatpush1.bf16.msra.mxu0 %v6312_v47  ;;  %3010 = vmatpush1.bf16.msra.mxu1 %v6313_v6 }
 0xe64   :  { %2970 = vmatprep.subr.bf16.mxu0 %v6314_v5  ;;  %3011 = vmatprep.subr.bf16.mxu1 %v6315_v11 }
 0xe67   :  { %2971 = vmatpush1.bf16.msra.mxu0 %v6316_v33  ;;  %3012 = vmatpush1.bf16.msra.mxu1 %v6317_v51 }
 0xe68   :  { %2972 = vmatprep.subr.bf16.mxu0 %v6318_v29  ;;  %3013 = vmatprep.subr.bf16.mxu1 %v6319_v15 }
 0xe6b   :  { %2973 = vmatpush1.bf16.msra.mxu0 %v6320_v23  ;;  %3014 = vmatpush1.bf16.msra.mxu1 %v6321_v13 }
 0xe6c   :  { %2974 = vmatprep.subr.bf16.mxu0 %v6322_v50  ;;  %3015 = vmatprep.subr.bf16.mxu1 %v6323_v32 }
 0xe6f   :  { %2975 = vmatpush1.bf16.msra.mxu0 %v6324_v17  ;;  %3016 = vmatpush1.bf16.msra.mxu1 %v6325_v34 }
 0xef2   :  { %v2795_v49 = vpop.f32.mrf.mxu0  ;;  %v2836_v31 = vpop.f32.mrf.mxu1 }
 0xef3   :  { %v2796_v13 = vadd.f32 %v2795_v49, %v6239_v0 }
 0xef4   :  { %v2797_v26 = vpop.f32.mrf.mxu0  ;;  %v5494_v46 = vpop.f32.mrf.mxu1 }
 0xef5   :  { %v2798_v17 = vadd.f32 %v2797_v26, %v6240_v25  ;;  %v2839_v0 = vadd.f32 %v5494_v46, %v4276_v1  ;;  %v3185_v1 = vld [vmem:[%s5524_s7] ss:$0 sm:$0xff] }
 0xef6   :  { %v2799_v19 = vpop.f32.mrf.mxu0  ;;  %v2840_v12 = vpop.f32.mrf.mxu1 }
 0xef7   :  { %v2837_v12 = vadd.f32 %v2836_v31, %v4271_v3 }
 0xef8   :  { %v2800_v43 = vpop.f32.mrf.mxu0  ;;  %v2841_v57 = vpop.f32.mrf.mxu1 }
 0xf12   :  { %v2889_v62 = vpop.f32.mrf.mxu0  ;;  %v2930_v28 = vpop.f32.mrf.mxu1 }
 0xf13   :  { %v2937_v54 = vadd.f32 %v2889_v62, %v2851_v35  ;;  %v2939_v45 = vadd.f32 %v2930_v28, %v2853_v18 }
 0xf14   :  { %v2891_v22 = vpop.f32.mrf.mxu0  ;;  %v2932_v59 = vpop.f32.mrf.mxu1 }
 0xf15   :  { %v2941_v38 = vmul.f32 0.5, %v2937_v54  ;;  %v2938_v41 = vadd.f32 %v2891_v22, %v2852_v52  ;;  %v2940_v58 = vadd.f32 %v2932_v59, %v2854_v40 }
 0xf16   :  { %v2893_v63 = vpop.f32.mrf.mxu0  ;;  %v2934_v16 = vpop.f32.mrf.mxu1 }
 0xf17   :  { %3495 = vtanh.f32 %v2941_v38  ;;  %v2945_v30 = vmul.f32 0.5, %v2938_v41  ;;  %v2950_v9 = vmul.f32 0.5, %v2940_v58  ;;  %v3186_v63 = vld [vmem:[#allocation2] ss:$0 sm:$0xff] }
 0xf18   :  { %v2894_v56 = vpop.f32.mrf.mxu0  ;;  %v2935_v55 = vpop.f32.mrf.mxu1 }
 0xf19   :  { %3497 = vtanh.f32 %v2945_v30 }
 0xf1a   :  { %3499 = vtanh.f32 %v2939_v45 }
 0xf1b   :  { %3501 = vtanh.f32 %v2950_v9 }
 0xf24   :  { %v3496_v60 = vpop.eup %3495 }
 0xf25   :  { %v2943_v37 = vadd.f32 1.0, %v3496_v60 }
 0xf26   :  { %v3498_v39 = vpop.eup %3497 }
 0xf27   :  { %v2944_v48 = vmul.f32 0.5, %v2943_v37  ;;  %v2947_v61 = vadd.f32 1.0, %v3498_v39  ;;  %v3500_v6 = vpop.eup %3499 }
 0xf28   :  { %v3502_v33 = vpop.eup %3501 }
 0xf29   :  { %v2948_v47 = vmul.f32 0.5, %v2947_v61  ;;  %v2955_v5 = vmul.f32 %v3500_v6, %v2944_v48  ;;  %v2952_v51 = vadd.f32 1.0, %v3502_v33 }
 0xf2b   :  { %v2954_v2 = vmul.f32 %v2948_v47, %v5402_v21  ;;  %v2953_v29 = vmul.f32 0.5, %v2952_v51 }
 0xf2d   :  { %v2956_v11 = vadd.f32 %v2955_v5, %v2954_v2 }
 0xf2f   :  { %3503 = vtanh.f32 %v2956_v11 }
 0xf3c   :  { %v3504_v53 = vpop.eup %3503 }
 0xf3d   :  { %v2958_v15 = vmul.f32 %v3504_v53, %v2953_v29 }
 0xf3f   :  { %v2959_v23 = vpack.c.bf16 %v2958_v15, %v2958_v15 }
 0xf41   :  { %2993 = vmatmul.mubr.bf16.vlgmr.msra.gmra.mxu0 %v2959_v23  ;;  %3034 = vmatmul.mubr.bf16.vlgmr.msra.gmra.mxu1 %v2959_v23 }
0x1001   :  { %v2994_v50 = vpop.f32.mrf.mxu0  ;;  %v3035_v32 = vpop.f32.mrf.mxu1 }
0x1002   :  { %v2995_v34 = vadd.f32 %v2994_v50, %v2796_v13  ;;  %v3036_v14 = vadd.f32 %v3035_v32, %v2837_v12 }
0x1003   :  { %v2996_v19 = vpop.f32.mrf.mxu0  ;;  %v3037_v21 = vpop.f32.mrf.mxu1 }
0x1004   :  { %v3042_v43 = vmul.f32 0.5, %v2995_v34  ;;  %v2997_v57 = vadd.f32 %v2996_v19, %v2798_v17  ;;  %v3038_v25 = vadd.f32 %v3037_v21, %v2839_v0 }
0x1005   :  { %v2998_v20 = vpop.f32.mrf.mxu0  ;;  %v3039_v7 = vpop.f32.mrf.mxu1 }
0x1006   :  { %3505 = vtanh.f32 %v3042_v43  ;;  %v3046_v24 = vmul.f32 0.5, %v2997_v57  ;;  %v3051_v49 = vmul.f32 0.5, %v3038_v25 }
0x1007   :  { %v2999_v4 = vpop.f32.mrf.mxu0  ;;  %v3040_v27 = vpop.f32.mrf.mxu1 }
0x1008   :  { %3507 = vtanh.f32 %v3046_v24 }
0x1009   :  { %3509 = vtanh.f32 %v3036_v14 }
0x100a   :  { %3511 = vtanh.f32 %v3051_v49 }
0x1013   :  { %v3506_v26 = vpop.eup %3505 }
0x1014   :  { %v3044_v35 = vadd.f32 1.0, %v3506_v26 }
0x1015   :  { %v3508_v42 = vpop.eup %3507 }
0x1016   :  { %v3045_v3 = vmul.f32 0.5, %v3044_v35  ;;  %v3048_v31 = vadd.f32 1.0, %v3508_v42  ;;  %v3510_v44 = vpop.eup %3509 }
0x1017   :  { %v3512_v54 = vpop.eup %3511 }
0x1018   :  { %v3049_v36 = vmul.f32 0.5, %v3048_v31  ;;  %v3056_v52 = vmul.f32 %v3510_v44, %v3045_v3  ;;  %v3053_v22 = vadd.f32 1.0, %v3512_v54 }
0x101a   :  { %v3055_v62 = vmul.f32 %v3049_v36, %v5423_v8  ;;  %v3054_v59 = vmul.f32 0.5, %v3053_v22 }
0x101c   :  { %v3057_v28 = vadd.f32 %v3056_v52, %v3055_v62 }
0x101e   :  { %3513 = vtanh.f32 %v3057_v28 }
0x102b   :  { %v3514_v38 = vpop.eup %3513 }
0x102c   :  { %v3059_v46 = vmul.f32 %v3514_v38, %v3054_v59 }
0x102e   :  { %v3067_v18 = vmul.f32 %v3185_v1, %v3059_v46 }
0x1030   :  { %v3069_v41 = vsel %vm3068_vm0, %v3067_v18, 0.0 }
0x1031   :  { %3070 = vadd.xlane.f32.xlu0 %v3069_v41 }
0x10ba   :  { %v3071_v16 = vpop.xlane.xlu0 %3070 }
0x10bb   :  { %v3079_v10 = vadd.f32 %v3186_v63, %v3071_v16 }
0x10bd   :  { %3081 = vst.msk [vmem:[%s5526_s9] sm:$0x3] %vm3080_vm1, %v3079_v10 }
0x10be   :  { %3086 = vsyncpa [#allocation4], 1 }
0x10bf   :  { %3087 = vsyncpa [#allocation6], 1 }
0x10c0   :  { %3088 = vsyncpa [#allocation9], 1 }

</bundles_post_ra>
